<compile_context>
chip_gen: v7x
topology: tpu7x:2x2x1
jax: 0.10.0
libtpu: 0.0.40
codegen_flags: <defaults>
</compile_context>

<pallas_src>
import functools

import jax
import jax.numpy as jnp
from jax.experimental import pallas as pl
from jax.experimental.pallas import tpu as pltpu


# ---------------------------------------------------------------------------
# Fused conv kernels.
# ---------------------------------------------------------------------------

def _conv_in_relu_kernel(w_ref, p_ref, o_ref, acc_ref, sum_ref, ssq_ref, *,
                         use_relu, eps, tile_p, num_p_tiles, p_valid):
    """Conv (im2col matmul) + InstanceNorm2d + ReLU, one (image, tile) step.

    w_ref  : (Cout, K)     bf16, resident (constant block index)
    p_ref  : (K, Tp)       bf16, one spatial tile of im2col patches
    o_ref  : (Cout, Ppad)  out dtype, resident across the spatial axis
    acc_ref: (Cout, Ppad)  f32 scratch holding the raw conv result
    sum/ssq: (Cout, 1)     f32 running sum / sum-of-squares
    """
    pt = pl.program_id(1)

    @pl.when(pt == 0)
    def _():
        sum_ref[...] = jnp.zeros_like(sum_ref)
        ssq_ref[...] = jnp.zeros_like(ssq_ref)

    # Single lane-dense MXU matmul: bf16 operands, f32 accumulation.
    y = jnp.dot(w_ref[...], p_ref[...], preferred_element_type=jnp.float32)
    off = pl.multiple_of(pt * tile_p, tile_p)
    acc_ref[:, pl.ds(off, tile_p)] = y
    # Padded (zero) patch columns contribute 0 to both running stats.
    sum_ref[...] += jnp.sum(y, axis=1, keepdims=True)
    ssq_ref[...] += jnp.sum(y * y, axis=1, keepdims=True)

    @pl.when(pt == num_p_tiles - 1)
    def _():
        inv_n = 1.0 / p_valid                       # true spatial count
        mean = sum_ref[...] * inv_n
        var = jnp.maximum(ssq_ref[...] * inv_n - mean * mean, 0.0)
        out = (acc_ref[...] - mean) * jax.lax.rsqrt(var + eps)
        if use_relu:
            out = jnp.maximum(out, 0.0)
        o_ref[...] = out.astype(o_ref.dtype)


def _conv_plain_kernel(w_ref, p_ref, o_ref, *, use_relu):
    """Bias-free conv (im2col matmul), fully independent spatial tiles."""
    y = jnp.dot(w_ref[...], p_ref[...], preferred_element_type=jnp.float32)
    if use_relu:
        y = jnp.maximum(y, 0.0)
    o_ref[...] = y.astype(o_ref.dtype)


# ---------------------------------------------------------------------------
# Wrapper.
# ---------------------------------------------------------------------------

def _round_up(x, m):
    return (x + m - 1) // m * m


def _pick_spatial_tile(p_pad, max_tile=2048):
    """Largest multiple of 128 dividing p_pad (p_pad is a multiple of 128)."""
    t = min(p_pad, max_tile)
    t -= t % 128
    while p_pad % t != 0:
        t -= 128
    return t


def _im2col_bf16(x_nchw, kh, kw, stride):
    """(N, Cin*KH*KW, Hout*Wout) bf16 patches, padding = (k-1)//2 (as nn.Conv2d)."""
    n, c_in, h, w = x_nchw.shape
    pad = (kh - 1) // 2
    h_out = (h + 2 * pad - kh) // stride + 1
    w_out = (w + 2 * pad - kw) // stride + 1
    xb = x_nchw.astype(jnp.bfloat16)                 # cast BEFORE pad/stack
    xp = jnp.pad(xb, ((0, 0), (0, 0), (pad, pad), (pad, pad)))
    cols = []
    for ih in range(kh):
        for iw in range(kw):
            cols.append(xp[:, :, ih: ih + (h_out - 1) * stride + 1: stride,
                                 iw: iw + (w_out - 1) * stride + 1: stride])
    patches = jnp.stack(cols, axis=2)                # (N, Cin, KH*KW, Ho, Wo)
    return patches.reshape(n, c_in * kh * kw, h_out * w_out), h_out, w_out


def conv2d_block(x_nchw, weight_oihw, *, stride=1, bn=True, relu=True,
                 eps=1e-5, out_dtype=None):
    """Torch `Conv2d` block: conv(pad=(k-1)//2, no bias) [-> InstanceNorm -> ReLU].

    NCHW in, NCHW out. bn layers emit bf16 feature maps, plain convs emit f32.
    """
    assert stride in (1, 2)
    n, c_in, _, _ = x_nchw.shape
    c_out, c_in_w, kh, kw = weight_oihw.shape
    assert c_in == c_in_w and kh == kw, "square kernels only (per module)"
    if out_dtype is None:
        out_dtype = jnp.bfloat16 if bn else jnp.float32

    # TODO(synk): wrapper-side im2col kept (bf16 end-to-end); an in-kernel
    # row-band im2col with halo DMA would cut HBM reads another 4.5-12.5x.
    patches, h_out, w_out = _im2col_bf16(x_nchw, kh, kw, stride)
    k_dim = c_in * kh * kw
    p_total = h_out * w_out

    # TODO(synk): weight cast/reshape could be hoisted out of the per-call path.
    w2 = weight_oihw.reshape(c_out, k_dim).astype(jnp.bfloat16)

    # Fold batch into the lane axis for lane-sparse bias-free convs (keeps the
    # output lane-dense at coarse pyramid levels, e.g. 8x8).
    fold_batch = (not bn) and n > 1 and (p_total % 128 != 0 or p_total < 128)
    if fold_batch:
        patches = patches.transpose(1, 0, 2).reshape(1, k_dim, n * p_total)
        n_entries, lanes = 1, n * p_total
    else:
        n_entries, lanes = n, p_total

    lanes_pad = _round_up(lanes, 128)
    if lanes_pad != lanes:
        patches = jnp.pad(patches, ((0, 0), (0, 0), (0, lanes_pad - lanes)))

    tile_p = _pick_spatial_tile(lanes_pad)
    num_p = lanes_pad // tile_p
    out_isz = jnp.dtype(out_dtype).itemsize

    if bn:
        # Resident full-spatial output block; per-tile running stats; finalize
        # (normalize + relu + cast) on the last spatial tile.
        out_spec = pl.BlockSpec((None, c_out, lanes_pad), lambda b, p: (b, 0, 0))
        scratch = [pltpu.VMEM((c_out, lanes_pad), jnp.float32),
                   pltpu.VMEM((c_out, 1), jnp.float32),
                   pltpu.VMEM((c_out, 1), jnp.float32)]
        dims = ("parallel", "arbitrary")
        kernel = functools.partial(_conv_in_relu_kernel, use_relu=relu, eps=eps,
                                   tile_p=tile_p, num_p_tiles=num_p,
                                   p_valid=float(lanes))
        # weight + resident output are single-buffered; patch tiles double.
        est = (c_out * k_dim * 2 + 2 * k_dim * tile_p * 2
               + c_out * lanes_pad * out_isz + c_out * lanes_pad * 4 + 4096)
        # TODO(synk): for v7x with batch < 2, split the spatial axis across the
        # two TensorCores (per-core partial stats) instead of batch-only "parallel".
    else:
        out_spec = pl.BlockSpec((None, c_out, tile_p), lambda b, p: (b, 0, p))
        scratch = []
        dims = ("parallel", "parallel")
        kernel = functools.partial(_conv_plain_kernel, use_relu=relu)
        est = (c_out * k_dim * 2 + 2 * k_dim * tile_p * 2
               + 2 * c_out * tile_p * out_isz)

    cparams = {"dimension_semantics": dims}
    if est > (12 << 20):        # below v5e's 16 MiB default scoped-VMEM limit
        try:
            cap = pltpu.get_tpu_info().vmem_capacity_bytes
        except Exception:
            cap = 64 << 20      # v7x has the smallest per-TC VMEM
        cparams["vmem_limit_bytes"] = int(min(est + (8 << 20), cap - (4 << 20)))

    cost = pl.CostEstimate(
        flops=2 * n_entries * c_out * k_dim * lanes_pad,
        transcendentals=0,
        bytes_accessed=int(patches.size * 2 + w2.size * 2
                           + n_entries * c_out * lanes_pad * out_isz))

    out = pl.pallas_call(
        kernel,
        out_shape=jax.ShapeDtypeStruct((n_entries, c_out, lanes_pad), out_dtype),
        grid_spec=pltpu.PrefetchScalarGridSpec(
            num_scalar_prefetch=0,
            grid=(n_entries, num_p),
            in_specs=[
                pl.BlockSpec((c_out, k_dim), lambda b, p: (0, 0)),
                pl.BlockSpec((None, k_dim, tile_p), lambda b, p: (b, 0, p)),
            ],
            out_specs=out_spec,
            scratch_shapes=scratch,
        ),
        compiler_params=pltpu.CompilerParams(**cparams),
        cost_estimate=cost,
    )(w2, patches)

    if fold_batch:
        out = out[0, :, :n * p_total].reshape(c_out, n, p_total)
        out = out.transpose(1, 0, 2)
    else:
        out = out[:, :, :p_total]
    return out.reshape(n, c_out, h_out, w_out)


# ---------------------------------------------------------------------------
# Bilinear x2 upsampling (align_corners=True, as the module requests).
# TODO(synk): upsample + skip-add kept as plain-JAX glue (separable
# interpolation matmul), not a dedicated Pallas kernel.
# ---------------------------------------------------------------------------

def _interp_matrix(size_in, size_out):
    dst = jnp.arange(size_out, dtype=jnp.float32)
    scale = (size_in - 1) / (size_out - 1) if size_out > 1 else 0.0
    src = dst * scale
    i0 = jnp.clip(jnp.floor(src), 0, size_in - 1).astype(jnp.int32)
    i1 = jnp.minimum(i0 + 1, size_in - 1)
    frac = src - i0.astype(jnp.float32)
    m = jnp.zeros((size_out, size_in), jnp.float32)
    rows = jnp.arange(size_out)
    m = m.at[rows, i0].add(1.0 - frac)
    m = m.at[rows, i1].add(frac)
    return m


def bilinear_upsample_x2(x_nchw):
    n, c, h, w = x_nchw.shape
    uh = _interp_matrix(h, 2 * h)
    uw = _interp_matrix(w, 2 * w)
    return jnp.einsum("oh,nchw,pw->ncop", uh, x_nchw.astype(jnp.float32), uw)


# ---------------------------------------------------------------------------
# FeatureNetworkOld: parameters + forward.
# ---------------------------------------------------------------------------

def _conv_w(key, c_out, c_in, k):
    fan_in = c_in * k * k
    return jax.random.normal(key, (c_out, c_in, k, k),
                             jnp.float32) / jnp.sqrt(fan_in)


def init_feature_network_params(key, d_base, d_out):
    ks = jax.random.split(key, 13)
    d = d_base
    return {
        "conv0": [(_conv_w(ks[0], d, 3, 3), 1),
                  (_conv_w(ks[1], d, d, 3), 1)],
        "conv1": [(_conv_w(ks[2], 2 * d, d, 5), 2),
                  (_conv_w(ks[3], 2 * d, 2 * d, 3), 1),
                  (_conv_w(ks[4], 2 * d, 2 * d, 3), 1)],
        "conv2": [(_conv_w(ks[5], 4 * d, 2 * d, 5), 2),
                  (_conv_w(ks[6], 4 * d, 4 * d, 3), 1),
                  (_conv_w(ks[7], 4 * d, 4 * d, 3), 1)],
        "out2": _conv_w(ks[8], d_out, 4 * d, 3),
        "out1": _conv_w(ks[9], d_out, 4 * d, 3),
        "out0": _conv_w(ks[10], d_out, 4 * d, 3),
        "inner1": _conv_w(ks[11], 4 * d, 2 * d, 3),
        "inner0": _conv_w(ks[12], 4 * d, d, 3),
    }


def feature_network_forward(params, x, conv_fn=conv2d_block):
    """Mirrors FeatureNetworkOld.forward; x is (nv, 3, h, w) -> [out2, out1, out0]."""
    # TODO(synk): conv0/conv1/conv2 sequences could be fused into fewer
    # pallas_calls with VMEM-resident intermediates to cut launch overhead.
    def seq(blocks, y):
        for wgt, stride in blocks:
            y = conv_fn(y, wgt, stride=stride, bn=True, relu=True)
        return y

    feat0 = seq(params["conv0"], x)
    feat1 = seq(params["conv1"], feat0)
    feat2 = seq(params["conv2"], feat1)

    out2 = conv_fn(feat2, params["out2"], stride=1, bn=False, relu=False)
    intra = (bilinear_upsample_x2(feat2)
             + conv_fn(feat1, params["inner1"], stride=1, bn=False, relu=False))
    out1 = conv_fn(intra, params["out1"], stride=1, bn=False, relu=False)
    intra = (bilinear_upsample_x2(intra)
             + conv_fn(feat0, params["inner0"], stride=1, bn=False, relu=False))
    out0 = conv_fn(intra, params["out0"], stride=1, bn=False, relu=False)
    return [out2, out1, out0]


# ---------------------------------------------------------------------------
# Pure-JAX reference with matching quantization points (bf16 conv operands,
# f32 accumulation / InstanceNorm, bf16 bn-layer outputs).
# ---------------------------------------------------------------------------

def _conv2d_block_ref(x, weight, *, stride=1, bn=True, relu=True, eps=1e-5,
                      out_dtype=None):
    if out_dtype is None:
        out_dtype = jnp.bfloat16 if bn else jnp.float32
    pad = (weight.shape[2] - 1) // 2
    y = jax.lax.conv_general_dilated(
        x.astype(jnp.bfloat16), weight.astype(jnp.bfloat16),
        window_strides=(stride, stride), padding=[(pad, pad), (pad, pad)],
        dimension_numbers=("NCHW", "OIHW", "NCHW"),
        preferred_element_type=jnp.float32)
    if bn:
        mean = jnp.mean(y, axis=(2, 3), keepdims=True)
        var = jnp.mean((y - mean) ** 2, axis=(2, 3), keepdims=True)
        y = (y - mean) * jax.lax.rsqrt(var + eps)
    if relu:
        y = jnp.maximum(y, 0.0)
    return y.astype(out_dtype)


if __name__ == "__main__":
    d_base, d_out = 8, 8
    nv, h, w = 2, 32, 32

    key = jax.random.PRNGKey(0)
    k_params, k_x = jax.random.split(key)
    params = init_feature_network_params(k_params, d_base, d_out)
    x = jax.random.normal(k_x, (nv, 3, h, w), jnp.float32)

    fwd = jax.jit(functools.partial(feature_network_forward, params))
    outs = jax.block_until_ready(fwd(x))

    assert outs[0].shape == (nv, d_out, h // 4, w // 4)
    assert outs[1].shape == (nv, d_out, h // 2, w // 2)
    assert outs[2].shape == (nv, d_out, h, w)

    refs = feature_network_forward(params, x, conv_fn=_conv2d_block_ref)
    # Deep bf16 pipeline (8 convs + InstanceNorm) vs an independent XLA conv
    # reference: accumulation-order differences compound; bound the max abs
    # error rather than demanding bit-level agreement.
    for o, r in zip(outs, refs):
        o32 = jnp.asarray(o, jnp.float32)
        r32 = jnp.asarray(r, jnp.float32)
        err = float(jnp.max(jnp.abs(o32 - r32)))
        assert err < 8e-2, f"max abs error {err}"

    print("KERNEL_OK")
</pallas_src>

<mosaic_0001>
module attributes {stable_mosaic.version = 11 : i64} {
  func.func private @main(%arg0: i32) attributes {dimension_semantics = [#tpu.dimension_semantics<core_parallel>], iteration_bounds = array<i64: 2>, tpu.core_type = #tpu.core_type<sc_scalar_subcore>, window_params = []} {
    return
  }
}

module attributes {stable_mosaic.version = 11 : i64} {
  func.func private @main(%arg0: i32) attributes {dimension_semantics = [#tpu.dimension_semantics<core_parallel>], iteration_bounds = array<i64: 2>, tpu.core_type = #tpu.core_type<sc_scalar_subcore>, window_params = []} {
    return
  }
}

module attributes {stable_mosaic.version = 11 : i64} {
  func.func @_conv_in_relu_kernel(%arg0: i32, %arg1: i32, %arg2: memref<8x27xbf16, #tpu.memory_space<vmem>>, %arg3: memref<1x27x1024xbf16, #tpu.memory_space<vmem>>, %arg4: memref<1x8x1024xbf16, #tpu.memory_space<vmem>>, %arg5: memref<8x1024xf32, #tpu.memory_space<vmem>>, %arg6: memref<8x1xf32, #tpu.memory_space<vmem>>, %arg7: memref<8x1xf32, #tpu.memory_space<vmem>>) attributes {dimension_semantics = [#tpu.dimension_semantics<parallel>, #tpu.dimension_semantics<arbitrary>], iteration_bounds = array<i64: 2, 1>, scalar_prefetch = 0 : i64, scratch_operands = 3 : i64, tpu.core_type = #tpu.core_type<tc>, window_params = [{pipeline_mode = #tpu.pipeline_mode<synchronous>, transform_indices = @transform_0, window_bounds = array<i64: 8, 27>}, {transform_indices = @transform_1, window_bounds = array<i64: 1, 27, 1024>}, {transform_indices = @transform_2, window_bounds = array<i64: 1, 8, 1024>}]} {
    %c0_i32 = arith.constant 0 : i32
    %0 = arith.cmpi eq, %arg1, %c0_i32 : i32
    %1 = arith.extui %0 : i1 to i32
    %c0_i32_0 = arith.constant 0 : i32
    %2 = arith.cmpi ne, %1, %c0_i32_0 : i32
    scf.if %2 {
      %cst_18 = arith.constant 0.000000e+00 : f32
      %25 = vector.broadcast %cst_18 : f32 to vector<8x1xf32>
      %c0_19 = arith.constant 0 : index
      %c0_20 = arith.constant 0 : index
      %26 = vector.load %arg6[%c0_19, %c0_20] : memref<8x1xf32, #tpu.memory_space<vmem>>, vector<8x1xf32>
      tpu.vector_store %arg6[%c0_19, %c0_20], %25 {strides = array<i32>} : memref<8x1xf32, #tpu.memory_space<vmem>>, vector<8x1xf32>,
      %cst_21 = arith.constant 0.000000e+00 : f32
      %27 = vector.broadcast %cst_21 : f32 to vector<8x1xf32>
      %c0_22 = arith.constant 0 : index
      %c0_23 = arith.constant 0 : index
      %28 = vector.load %arg7[%c0_22, %c0_23] : memref<8x1xf32, #tpu.memory_space<vmem>>, vector<8x1xf32>
      tpu.vector_store %arg7[%c0_22, %c0_23], %27 {strides = array<i32>} : memref<8x1xf32, #tpu.memory_space<vmem>>, vector<8x1xf32>,
    } else {
    }
    %c0 = arith.constant 0 : index
    %c0_1 = arith.constant 0 : index
    %3 = vector.load %arg2[%c0, %c0_1] : memref<8x27xbf16, #tpu.memory_space<vmem>>, vector<8x27xbf16>
    %c0_2 = arith.constant 0 : index
    %c0_3 = arith.constant 0 : index
    %c0_4 = arith.constant 0 : index
    %4 = vector.load %arg3[%c0_2, %c0_3, %c0_4] : memref<1x27x1024xbf16, #tpu.memory_space<vmem>>, vector<1x27x1024xbf16>
    %5 = vector.shape_cast %4 : vector<1x27x1024xbf16> to vector<27x1024xbf16>
    %cst = arith.constant dense<0.000000e+00> : vector<8x1024xf32>
    %6 = tpu.matmul %3, %5, %cst {dimension_numbers = #tpu.dot_dimension_numbers<[1], [0], [0], [1], [0, 0, 1, 1], [], []>} : vector<8x27xbf16>, vector<27x1024xbf16>, vector<8x1024xf32> -> vector<8x1024xf32>
    %c1024_i32 = arith.constant 1024 : i32
    %7 = arith.muli %arg1, %c1024_i32 : i32
    %8 = tpu.assume_multiple %7, 1024 : i32
    %c0_5 = arith.constant 0 : index
    %9 = arith.index_cast %8 : i32 to index
    %10 = vector.load %arg5[%c0_5, %9] : memref<8x1024xf32, #tpu.memory_space<vmem>>, vector<8x1024xf32>
    tpu.vector_store %arg5[%c0_5, %9], %6 {strides = array<i32>} : memref<8x1024xf32, #tpu.memory_space<vmem>>, vector<8x1024xf32>,
    %c0_6 = arith.constant 0 : index
    %c0_7 = arith.constant 0 : index
    %11 = vector.load %arg6[%c0_6, %c0_7] : memref<8x1xf32, #tpu.memory_space<vmem>>, vector<8x1xf32>
    %cst_8 = arith.constant dense<0.000000e+00> : vector<8xf32>
    %12 = vector.multi_reduction <add>, %6, %cst_8 [1] : vector<8x1024xf32> to vector<8xf32>
    %13 = vector.shape_cast %12 : vector<8xf32> to vector<8x1xf32>
    %14 = arith.addf %11, %13 : vector<8x1xf32>
    %c0_9 = arith.constant 0 : index
    %c0_10 = arith.constant 0 : index
    %15 = vector.load %arg6[%c0_9, %c0_10] : memref<8x1xf32, #tpu.memory_space<vmem>>, vector<8x1xf32>
    tpu.vector_store %arg6[%c0_9, %c0_10], %14 {strides = array<i32>} : memref<8x1xf32, #tpu.memory_space<vmem>>, vector<8x1xf32>,
    %c0_11 = arith.constant 0 : index
    %c0_12 = arith.constant 0 : index
    %16 = vector.load %arg7[%c0_11, %c0_12] : memref<8x1xf32, #tpu.memory_space<vmem>>, vector<8x1xf32>
    %17 = arith.mulf %6, %6 : vector<8x1024xf32>
    %cst_13 = arith.constant dense<0.000000e+00> : vector<8xf32>
    %18 = vector.multi_reduction <add>, %17, %cst_13 [1] : vector<8x1024xf32> to vector<8xf32>
    %19 = vector.shape_cast %18 : vector<8xf32> to vector<8x1xf32>
    %20 = arith.addf %16, %19 : vector<8x1xf32>
    %c0_14 = arith.constant 0 : index
    %c0_15 = arith.constant 0 : index
    %21 = vector.load %arg7[%c0_14, %c0_15] : memref<8x1xf32, #tpu.memory_space<vmem>>, vector<8x1xf32>
    tpu.vector_store %arg7[%c0_14, %c0_15], %20 {strides = array<i32>} : memref<8x1xf32, #tpu.memory_space<vmem>>, vector<8x1xf32>,
    %c0_i32_16 = arith.constant 0 : i32
    %22 = arith.cmpi eq, %arg1, %c0_i32_16 : i32
    %23 = arith.extui %22 : i1 to i32
    %c0_i32_17 = arith.constant 0 : i32
    %24 = arith.cmpi ne, %23, %c0_i32_17 : i32
    scf.if %24 {
      %c0_18 = arith.constant 0 : index
      %c0_19 = arith.constant 0 : index
      %25 = vector.load %arg6[%c0_18, %c0_19] : memref<8x1xf32, #tpu.memory_space<vmem>>, vector<8x1xf32>
      %cst_20 = arith.constant 9.765625E-4 : f32
      %26 = vector.broadcast %cst_20 : f32 to vector<8x1xf32>
      %27 = arith.mulf %25, %26 : vector<8x1xf32>
      %c0_21 = arith.constant 0 : index
      %c0_22 = arith.constant 0 : index
      %28 = vector.load %arg7[%c0_21, %c0_22] : memref<8x1xf32, #tpu.memory_space<vmem>>, vector<8x1xf32>
      %cst_23 = arith.constant 9.765625E-4 : f32
      %29 = vector.broadcast %cst_23 : f32 to vector<8x1xf32>
      %30 = arith.mulf %28, %29 : vector<8x1xf32>
      %31 = arith.mulf %27, %27 : vector<8x1xf32>
      %32 = arith.subf %30, %31 : vector<8x1xf32>
      %cst_24 = arith.constant 0.000000e+00 : f32
      %33 = vector.broadcast %cst_24 : f32 to vector<8x1xf32>
      %34 = arith.maximumf %32, %33 : vector<8x1xf32>
      %c0_25 = arith.constant 0 : index
      %c0_26 = arith.constant 0 : index
      %35 = vector.load %arg5[%c0_25, %c0_26] : memref<8x1024xf32, #tpu.memory_space<vmem>>, vector<8x1024xf32>
      %36 = vector.broadcast %27 : vector<8x1xf32> to vector<8x1024xf32>
      %37 = arith.subf %35, %36 : vector<8x1024xf32>
      %cst_27 = arith.constant 9.99999974E-6 : f32
      %38 = vector.broadcast %cst_27 : f32 to vector<8x1xf32>
      %39 = arith.addf %34, %38 : vector<8x1xf32>
      %40 = math.rsqrt %39 : vector<8x1xf32>
      %41 = vector.broadcast %40 : vector<8x1xf32> to vector<8x1024xf32>
      %42 = arith.mulf %37, %41 : vector<8x1024xf32>
      %cst_28 = arith.constant 0.000000e+00 : f32
      %43 = vector.broadcast %cst_28 : f32 to vector<8x1024xf32>
      %44 = arith.maximumf %42, %43 : vector<8x1024xf32>
      %45 = arith.truncf %44 : vector<8x1024xf32> to vector<8x1024xbf16>
      %c0_29 = arith.constant 0 : index
      %c0_30 = arith.constant 0 : index
      %c0_31 = arith.constant 0 : index
      %46 = vector.load %arg4[%c0_29, %c0_30, %c0_31] : memref<1x8x1024xbf16, #tpu.memory_space<vmem>>, vector<1x8x1024xbf16>
      %47 = vector.shape_cast %46 : vector<1x8x1024xbf16> to vector<8x1024xbf16>
      %48 = vector.shape_cast %45 : vector<8x1024xbf16> to vector<1x8x1024xbf16>
      tpu.vector_store %arg4[%c0_29, %c0_30, %c0_31], %48 {strides = array<i32>} : memref<1x8x1024xbf16, #tpu.memory_space<vmem>>, vector<1x8x1024xbf16>,
    } else {
    }
    return
  }
  func.func @transform_0(%arg0: i32, %arg1: i32) -> (i32, i32) {
    %c0_i32 = arith.constant 0 : i32
    %c0_i32_0 = arith.constant 0 : i32
    %c0_i32_1 = arith.constant 0 : i32
    return %c0_i32, %c0_i32_0 : i32, i32
  }
  func.func @transform_1(%arg0: i32, %arg1: i32) -> (i32, i32, i32) {
    %c0_i32 = arith.constant 0 : i32
    %c0_i32_0 = arith.constant 0 : i32
    return %arg0, %c0_i32, %arg1 : i32, i32, i32
  }
  func.func @transform_2(%arg0: i32, %arg1: i32) -> (i32, i32, i32) {
    %c0_i32 = arith.constant 0 : i32
    %c0_i32_0 = arith.constant 0 : i32
    %c0_i32_1 = arith.constant 0 : i32
    return %arg0, %c0_i32, %c0_i32_0 : i32, i32, i32
  }
}

module attributes {stable_mosaic.version = 11 : i64} {
  func.func @_conv_in_relu_kernel(%arg0: i32, %arg1: i32, %arg2: memref<8x72xbf16, #tpu.memory_space<vmem>>, %arg3: memref<1x72x1024xbf16, #tpu.memory_space<vmem>>, %arg4: memref<1x8x1024xbf16, #tpu.memory_space<vmem>>, %arg5: memref<8x1024xf32, #tpu.memory_space<vmem>>, %arg6: memref<8x1xf32, #tpu.memory_space<vmem>>, %arg7: memref<8x1xf32, #tpu.memory_space<vmem>>) attributes {dimension_semantics = [#tpu.dimension_semantics<parallel>, #tpu.dimension_semantics<arbitrary>], iteration_bounds = array<i64: 2, 1>, scalar_prefetch = 0 : i64, scratch_operands = 3 : i64, tpu.core_type = #tpu.core_type<tc>, window_params = [{pipeline_mode = #tpu.pipeline_mode<synchronous>, transform_indices = @transform_0, window_bounds = array<i64: 8, 72>}, {transform_indices = @transform_1, window_bounds = array<i64: 1, 72, 1024>}, {transform_indices = @transform_2, window_bounds = array<i64: 1, 8, 1024>}]} {
    %c0_i32 = arith.constant 0 : i32
    %0 = arith.cmpi eq, %arg1, %c0_i32 : i32
    %1 = arith.extui %0 : i1 to i32
    %c0_i32_0 = arith.constant 0 : i32
    %2 = arith.cmpi ne, %1, %c0_i32_0 : i32
    scf.if %2 {
      %cst_18 = arith.constant 0.000000e+00 : f32
      %25 = vector.broadcast %cst_18 : f32 to vector<8x1xf32>
      %c0_19 = arith.constant 0 : index
      %c0_20 = arith.constant 0 : index
      %26 = vector.load %arg6[%c0_19, %c0_20] : memref<8x1xf32, #tpu.memory_space<vmem>>, vector<8x1xf32>
      tpu.vector_store %arg6[%c0_19, %c0_20], %25 {strides = array<i32>} : memref<8x1xf32, #tpu.memory_space<vmem>>, vector<8x1xf32>,
      %cst_21 = arith.constant 0.000000e+00 : f32
      %27 = vector.broadcast %cst_21 : f32 to vector<8x1xf32>
      %c0_22 = arith.constant 0 : index
      %c0_23 = arith.constant 0 : index
      %28 = vector.load %arg7[%c0_22, %c0_23] : memref<8x1xf32, #tpu.memory_space<vmem>>, vector<8x1xf32>
      tpu.vector_store %arg7[%c0_22, %c0_23], %27 {strides = array<i32>} : memref<8x1xf32, #tpu.memory_space<vmem>>, vector<8x1xf32>,
    } else {
    }
    %c0 = arith.constant 0 : index
    %c0_1 = arith.constant 0 : index
    %3 = vector.load %arg2[%c0, %c0_1] : memref<8x72xbf16, #tpu.memory_space<vmem>>, vector<8x72xbf16>
    %c0_2 = arith.constant 0 : index
    %c0_3 = arith.constant 0 : index
    %c0_4 = arith.constant 0 : index
    %4 = vector.load %arg3[%c0_2, %c0_3, %c0_4] : memref<1x72x1024xbf16, #tpu.memory_space<vmem>>, vector<1x72x1024xbf16>
    %5 = vector.shape_cast %4 : vector<1x72x1024xbf16> to vector<72x1024xbf16>
    %cst = arith.constant dense<0.000000e+00> : vector<8x1024xf32>
    %6 = tpu.matmul %3, %5, %cst {dimension_numbers = #tpu.dot_dimension_numbers<[1], [0], [0], [1], [0, 0, 1, 1], [], []>} : vector<8x72xbf16>, vector<72x1024xbf16>, vector<8x1024xf32> -> vector<8x1024xf32>
    %c1024_i32 = arith.constant 1024 : i32
    %7 = arith.muli %arg1, %c1024_i32 : i32
    %8 = tpu.assume_multiple %7, 1024 : i32
    %c0_5 = arith.constant 0 : index
    %9 = arith.index_cast %8 : i32 to index
    %10 = vector.load %arg5[%c0_5, %9] : memref<8x1024xf32, #tpu.memory_space<vmem>>, vector<8x1024xf32>
    tpu.vector_store %arg5[%c0_5, %9], %6 {strides = array<i32>} : memref<8x1024xf32, #tpu.memory_space<vmem>>, vector<8x1024xf32>,
    %c0_6 = arith.constant 0 : index
    %c0_7 = arith.constant 0 : index
    %11 = vector.load %arg6[%c0_6, %c0_7] : memref<8x1xf32, #tpu.memory_space<vmem>>, vector<8x1xf32>
    %cst_8 = arith.constant dense<0.000000e+00> : vector<8xf32>
    %12 = vector.multi_reduction <add>, %6, %cst_8 [1] : vector<8x1024xf32> to vector<8xf32>
    %13 = vector.shape_cast %12 : vector<8xf32> to vector<8x1xf32>
    %14 = arith.addf %11, %13 : vector<8x1xf32>
    %c0_9 = arith.constant 0 : index
    %c0_10 = arith.constant 0 : index
    %15 = vector.load %arg6[%c0_9, %c0_10] : memref<8x1xf32, #tpu.memory_space<vmem>>, vector<8x1xf32>
    tpu.vector_store %arg6[%c0_9, %c0_10], %14 {strides = array<i32>} : memref<8x1xf32, #tpu.memory_space<vmem>>, vector<8x1xf32>,
    %c0_11 = arith.constant 0 : index
    %c0_12 = arith.constant 0 : index
    %16 = vector.load %arg7[%c0_11, %c0_12] : memref<8x1xf32, #tpu.memory_space<vmem>>, vector<8x1xf32>
    %17 = arith.mulf %6, %6 : vector<8x1024xf32>
    %cst_13 = arith.constant dense<0.000000e+00> : vector<8xf32>
    %18 = vector.multi_reduction <add>, %17, %cst_13 [1] : vector<8x1024xf32> to vector<8xf32>
    %19 = vector.shape_cast %18 : vector<8xf32> to vector<8x1xf32>
    %20 = arith.addf %16, %19 : vector<8x1xf32>
    %c0_14 = arith.constant 0 : index
    %c0_15 = arith.constant 0 : index
    %21 = vector.load %arg7[%c0_14, %c0_15] : memref<8x1xf32, #tpu.memory_space<vmem>>, vector<8x1xf32>
    tpu.vector_store %arg7[%c0_14, %c0_15], %20 {strides = array<i32>} : memref<8x1xf32, #tpu.memory_space<vmem>>, vector<8x1xf32>,
    %c0_i32_16 = arith.constant 0 : i32
    %22 = arith.cmpi eq, %arg1, %c0_i32_16 : i32
    %23 = arith.extui %22 : i1 to i32
    %c0_i32_17 = arith.constant 0 : i32
    %24 = arith.cmpi ne, %23, %c0_i32_17 : i32
    scf.if %24 {
      %c0_18 = arith.constant 0 : index
      %c0_19 = arith.constant 0 : index
      %25 = vector.load %arg6[%c0_18, %c0_19] : memref<8x1xf32, #tpu.memory_space<vmem>>, vector<8x1xf32>
      %cst_20 = arith.constant 9.765625E-4 : f32
      %26 = vector.broadcast %cst_20 : f32 to vector<8x1xf32>
      %27 = arith.mulf %25, %26 : vector<8x1xf32>
      %c0_21 = arith.constant 0 : index
      %c0_22 = arith.constant 0 : index
      %28 = vector.load %arg7[%c0_21, %c0_22] : memref<8x1xf32, #tpu.memory_space<vmem>>, vector<8x1xf32>
      %cst_23 = arith.constant 9.765625E-4 : f32
      %29 = vector.broadcast %cst_23 : f32 to vector<8x1xf32>
      %30 = arith.mulf %28, %29 : vector<8x1xf32>
      %31 = arith.mulf %27, %27 : vector<8x1xf32>
      %32 = arith.subf %30, %31 : vector<8x1xf32>
      %cst_24 = arith.constant 0.000000e+00 : f32
      %33 = vector.broadcast %cst_24 : f32 to vector<8x1xf32>
      %34 = arith.maximumf %32, %33 : vector<8x1xf32>
      %c0_25 = arith.constant 0 : index
      %c0_26 = arith.constant 0 : index
      %35 = vector.load %arg5[%c0_25, %c0_26] : memref<8x1024xf32, #tpu.memory_space<vmem>>, vector<8x1024xf32>
      %36 = vector.broadcast %27 : vector<8x1xf32> to vector<8x1024xf32>
      %37 = arith.subf %35, %36 : vector<8x1024xf32>
      %cst_27 = arith.constant 9.99999974E-6 : f32
      %38 = vector.broadcast %cst_27 : f32 to vector<8x1xf32>
      %39 = arith.addf %34, %38 : vector<8x1xf32>
      %40 = math.rsqrt %39 : vector<8x1xf32>
      %41 = vector.broadcast %40 : vector<8x1xf32> to vector<8x1024xf32>
      %42 = arith.mulf %37, %41 : vector<8x1024xf32>
      %cst_28 = arith.constant 0.000000e+00 : f32
      %43 = vector.broadcast %cst_28 : f32 to vector<8x1024xf32>
      %44 = arith.maximumf %42, %43 : vector<8x1024xf32>
      %45 = arith.truncf %44 : vector<8x1024xf32> to vector<8x1024xbf16>
      %c0_29 = arith.constant 0 : index
      %c0_30 = arith.constant 0 : index
      %c0_31 = arith.constant 0 : index
      %46 = vector.load %arg4[%c0_29, %c0_30, %c0_31] : memref<1x8x1024xbf16, #tpu.memory_space<vmem>>, vector<1x8x1024xbf16>
      %47 = vector.shape_cast %46 : vector<1x8x1024xbf16> to vector<8x1024xbf16>
      %48 = vector.shape_cast %45 : vector<8x1024xbf16> to vector<1x8x1024xbf16>
      tpu.vector_store %arg4[%c0_29, %c0_30, %c0_31], %48 {strides = array<i32>} : memref<1x8x1024xbf16, #tpu.memory_space<vmem>>, vector<1x8x1024xbf16>,
    } else {
    }
    return
  }
  func.func @transform_0(%arg0: i32, %arg1: i32) -> (i32, i32) {
    %c0_i32 = arith.constant 0 : i32
    %c0_i32_0 = arith.constant 0 : i32
    %c0_i32_1 = arith.constant 0 : i32
    return %c0_i32, %c0_i32_0 : i32, i32
  }
  func.func @transform_1(%arg0: i32, %arg1: i32) -> (i32, i32, i32) {
    %c0_i32 = arith.constant 0 : i32
    %c0_i32_0 = arith.constant 0 : i32
    return %arg0, %c0_i32, %arg1 : i32, i32, i32
  }
  func.func @transform_2(%arg0: i32, %arg1: i32) -> (i32, i32, i32) {
    %c0_i32 = arith.constant 0 : i32
    %c0_i32_0 = arith.constant 0 : i32
    %c0_i32_1 = arith.constant 0 : i32
    return %arg0, %c0_i32, %c0_i32_0 : i32, i32, i32
  }
}

module attributes {stable_mosaic.version = 11 : i64} {
  func.func @_conv_in_relu_kernel(%arg0: i32, %arg1: i32, %arg2: memref<16x200xbf16, #tpu.memory_space<vmem>>, %arg3: memref<1x200x256xbf16, #tpu.memory_space<vmem>>, %arg4: memref<1x16x256xbf16, #tpu.memory_space<vmem>>, %arg5: memref<16x256xf32, #tpu.memory_space<vmem>>, %arg6: memref<16x1xf32, #tpu.memory_space<vmem>>, %arg7: memref<16x1xf32, #tpu.memory_space<vmem>>) attributes {dimension_semantics = [#tpu.dimension_semantics<parallel>, #tpu.dimension_semantics<arbitrary>], iteration_bounds = array<i64: 2, 1>, scalar_prefetch = 0 : i64, scratch_operands = 3 : i64, tpu.core_type = #tpu.core_type<tc>, window_params = [{pipeline_mode = #tpu.pipeline_mode<synchronous>, transform_indices = @transform_0, window_bounds = array<i64: 16, 200>}, {transform_indices = @transform_1, window_bounds = array<i64: 1, 200, 256>}, {transform_indices = @transform_2, window_bounds = array<i64: 1, 16, 256>}]} {
    %c0_i32 = arith.constant 0 : i32
    %0 = arith.cmpi eq, %arg1, %c0_i32 : i32
    %1 = arith.extui %0 : i1 to i32
    %c0_i32_0 = arith.constant 0 : i32
    %2 = arith.cmpi ne, %1, %c0_i32_0 : i32
    scf.if %2 {
      %cst_18 = arith.constant 0.000000e+00 : f32
      %25 = vector.broadcast %cst_18 : f32 to vector<16x1xf32>
      %c0_19 = arith.constant 0 : index
      %c0_20 = arith.constant 0 : index
      %26 = vector.load %arg6[%c0_19, %c0_20] : memref<16x1xf32, #tpu.memory_space<vmem>>, vector<16x1xf32>
      tpu.vector_store %arg6[%c0_19, %c0_20], %25 {strides = array<i32>} : memref<16x1xf32, #tpu.memory_space<vmem>>, vector<16x1xf32>,
      %cst_21 = arith.constant 0.000000e+00 : f32
      %27 = vector.broadcast %cst_21 : f32 to vector<16x1xf32>
      %c0_22 = arith.constant 0 : index
      %c0_23 = arith.constant 0 : index
      %28 = vector.load %arg7[%c0_22, %c0_23] : memref<16x1xf32, #tpu.memory_space<vmem>>, vector<16x1xf32>
      tpu.vector_store %arg7[%c0_22, %c0_23], %27 {strides = array<i32>} : memref<16x1xf32, #tpu.memory_space<vmem>>, vector<16x1xf32>,
    } else {
    }
    %c0 = arith.constant 0 : index
    %c0_1 = arith.constant 0 : index
    %3 = vector.load %arg2[%c0, %c0_1] : memref<16x200xbf16, #tpu.memory_space<vmem>>, vector<16x200xbf16>
    %c0_2 = arith.constant 0 : index
    %c0_3 = arith.constant 0 : index
    %c0_4 = arith.constant 0 : index
    %4 = vector.load %arg3[%c0_2, %c0_3, %c0_4] : memref<1x200x256xbf16, #tpu.memory_space<vmem>>, vector<1x200x256xbf16>
    %5 = vector.shape_cast %4 : vector<1x200x256xbf16> to vector<200x256xbf16>
    %cst = arith.constant dense<0.000000e+00> : vector<16x256xf32>
    %6 = tpu.matmul %3, %5, %cst {dimension_numbers = #tpu.dot_dimension_numbers<[1], [0], [0], [1], [0, 0, 1, 1], [], []>} : vector<16x200xbf16>, vector<200x256xbf16>, vector<16x256xf32> -> vector<16x256xf32>
    %c256_i32 = arith.constant 256 : i32
    %7 = arith.muli %arg1, %c256_i32 : i32
    %8 = tpu.assume_multiple %7, 256 : i32
    %c0_5 = arith.constant 0 : index
    %9 = arith.index_cast %8 : i32 to index
    %10 = vector.load %arg5[%c0_5, %9] : memref<16x256xf32, #tpu.memory_space<vmem>>, vector<16x256xf32>
    tpu.vector_store %arg5[%c0_5, %9], %6 {strides = array<i32>} : memref<16x256xf32, #tpu.memory_space<vmem>>, vector<16x256xf32>,
    %c0_6 = arith.constant 0 : index
    %c0_7 = arith.constant 0 : index
    %11 = vector.load %arg6[%c0_6, %c0_7] : memref<16x1xf32, #tpu.memory_space<vmem>>, vector<16x1xf32>
    %cst_8 = arith.constant dense<0.000000e+00> : vector<16xf32>
    %12 = vector.multi_reduction <add>, %6, %cst_8 [1] : vector<16x256xf32> to vector<16xf32>
    %13 = vector.shape_cast %12 : vector<16xf32> to vector<16x1xf32>
    %14 = arith.addf %11, %13 : vector<16x1xf32>
    %c0_9 = arith.constant 0 : index
    %c0_10 = arith.constant 0 : index
    %15 = vector.load %arg6[%c0_9, %c0_10] : memref<16x1xf32, #tpu.memory_space<vmem>>, vector<16x1xf32>
    tpu.vector_store %arg6[%c0_9, %c0_10], %14 {strides = array<i32>} : memref<16x1xf32, #tpu.memory_space<vmem>>, vector<16x1xf32>,
    %c0_11 = arith.constant 0 : index
    %c0_12 = arith.constant 0 : index
    %16 = vector.load %arg7[%c0_11, %c0_12] : memref<16x1xf32, #tpu.memory_space<vmem>>, vector<16x1xf32>
    %17 = arith.mulf %6, %6 : vector<16x256xf32>
    %cst_13 = arith.constant dense<0.000000e+00> : vector<16xf32>
    %18 = vector.multi_reduction <add>, %17, %cst_13 [1] : vector<16x256xf32> to vector<16xf32>
    %19 = vector.shape_cast %18 : vector<16xf32> to vector<16x1xf32>
    %20 = arith.addf %16, %19 : vector<16x1xf32>
    %c0_14 = arith.constant 0 : index
    %c0_15 = arith.constant 0 : index
    %21 = vector.load %arg7[%c0_14, %c0_15] : memref<16x1xf32, #tpu.memory_space<vmem>>, vector<16x1xf32>
    tpu.vector_store %arg7[%c0_14, %c0_15], %20 {strides = array<i32>} : memref<16x1xf32, #tpu.memory_space<vmem>>, vector<16x1xf32>,
    %c0_i32_16 = arith.constant 0 : i32
    %22 = arith.cmpi eq, %arg1, %c0_i32_16 : i32
    %23 = arith.extui %22 : i1 to i32
    %c0_i32_17 = arith.constant 0 : i32
    %24 = arith.cmpi ne, %23, %c0_i32_17 : i32
    scf.if %24 {
      %c0_18 = arith.constant 0 : index
      %c0_19 = arith.constant 0 : index
      %25 = vector.load %arg6[%c0_18, %c0_19] : memref<16x1xf32, #tpu.memory_space<vmem>>, vector<16x1xf32>
      %cst_20 = arith.constant 3.906250e-03 : f32
      %26 = vector.broadcast %cst_20 : f32 to vector<16x1xf32>
      %27 = arith.mulf %25, %26 : vector<16x1xf32>
      %c0_21 = arith.constant 0 : index
      %c0_22 = arith.constant 0 : index
      %28 = vector.load %arg7[%c0_21, %c0_22] : memref<16x1xf32, #tpu.memory_space<vmem>>, vector<16x1xf32>
      %cst_23 = arith.constant 3.906250e-03 : f32
      %29 = vector.broadcast %cst_23 : f32 to vector<16x1xf32>
      %30 = arith.mulf %28, %29 : vector<16x1xf32>
      %31 = arith.mulf %27, %27 : vector<16x1xf32>
      %32 = arith.subf %30, %31 : vector<16x1xf32>
      %cst_24 = arith.constant 0.000000e+00 : f32
      %33 = vector.broadcast %cst_24 : f32 to vector<16x1xf32>
      %34 = arith.maximumf %32, %33 : vector<16x1xf32>
      %c0_25 = arith.constant 0 : index
      %c0_26 = arith.constant 0 : index
      %35 = vector.load %arg5[%c0_25, %c0_26] : memref<16x256xf32, #tpu.memory_space<vmem>>, vector<16x256xf32>
      %36 = vector.broadcast %27 : vector<16x1xf32> to vector<16x256xf32>
      %37 = arith.subf %35, %36 : vector<16x256xf32>
      %cst_27 = arith.constant 9.99999974E-6 : f32
      %38 = vector.broadcast %cst_27 : f32 to vector<16x1xf32>
      %39 = arith.addf %34, %38 : vector<16x1xf32>
      %40 = math.rsqrt %39 : vector<16x1xf32>
      %41 = vector.broadcast %40 : vector<16x1xf32> to vector<16x256xf32>
      %42 = arith.mulf %37, %41 : vector<16x256xf32>
      %cst_28 = arith.constant 0.000000e+00 : f32
      %43 = vector.broadcast %cst_28 : f32 to vector<16x256xf32>
      %44 = arith.maximumf %42, %43 : vector<16x256xf32>
      %45 = arith.truncf %44 : vector<16x256xf32> to vector<16x256xbf16>
      %c0_29 = arith.constant 0 : index
      %c0_30 = arith.constant 0 : index
      %c0_31 = arith.constant 0 : index
      %46 = vector.load %arg4[%c0_29, %c0_30, %c0_31] : memref<1x16x256xbf16, #tpu.memory_space<vmem>>, vector<1x16x256xbf16>
      %47 = vector.shape_cast %46 : vector<1x16x256xbf16> to vector<16x256xbf16>
      %48 = vector.shape_cast %45 : vector<16x256xbf16> to vector<1x16x256xbf16>
      tpu.vector_store %arg4[%c0_29, %c0_30, %c0_31], %48 {strides = array<i32>} : memref<1x16x256xbf16, #tpu.memory_space<vmem>>, vector<1x16x256xbf16>,
    } else {
    }
    return
  }
  func.func @transform_0(%arg0: i32, %arg1: i32) -> (i32, i32) {
    %c0_i32 = arith.constant 0 : i32
    %c0_i32_0 = arith.constant 0 : i32
    %c0_i32_1 = arith.constant 0 : i32
    return %c0_i32, %c0_i32_0 : i32, i32
  }
  func.func @transform_1(%arg0: i32, %arg1: i32) -> (i32, i32, i32) {
    %c0_i32 = arith.constant 0 : i32
    %c0_i32_0 = arith.constant 0 : i32
    return %arg0, %c0_i32, %arg1 : i32, i32, i32
  }
  func.func @transform_2(%arg0: i32, %arg1: i32) -> (i32, i32, i32) {
    %c0_i32 = arith.constant 0 : i32
    %c0_i32_0 = arith.constant 0 : i32
    %c0_i32_1 = arith.constant 0 : i32
    return %arg0, %c0_i32, %c0_i32_0 : i32, i32, i32
  }
}

module attributes {stable_mosaic.version = 11 : i64} {
  func.func @_conv_in_relu_kernel(%arg0: i32, %arg1: i32, %arg2: memref<16x144xbf16, #tpu.memory_space<vmem>>, %arg3: memref<1x144x256xbf16, #tpu.memory_space<vmem>>, %arg4: memref<1x16x256xbf16, #tpu.memory_space<vmem>>, %arg5: memref<16x256xf32, #tpu.memory_space<vmem>>, %arg6: memref<16x1xf32, #tpu.memory_space<vmem>>, %arg7: memref<16x1xf32, #tpu.memory_space<vmem>>) attributes {dimension_semantics = [#tpu.dimension_semantics<parallel>, #tpu.dimension_semantics<arbitrary>], iteration_bounds = array<i64: 2, 1>, scalar_prefetch = 0 : i64, scratch_operands = 3 : i64, tpu.core_type = #tpu.core_type<tc>, window_params = [{pipeline_mode = #tpu.pipeline_mode<synchronous>, transform_indices = @transform_0, window_bounds = array<i64: 16, 144>}, {transform_indices = @transform_1, window_bounds = array<i64: 1, 144, 256>}, {transform_indices = @transform_2, window_bounds = array<i64: 1, 16, 256>}]} {
    %c0_i32 = arith.constant 0 : i32
    %0 = arith.cmpi eq, %arg1, %c0_i32 : i32
    %1 = arith.extui %0 : i1 to i32
    %c0_i32_0 = arith.constant 0 : i32
    %2 = arith.cmpi ne, %1, %c0_i32_0 : i32
    scf.if %2 {
      %cst_18 = arith.constant 0.000000e+00 : f32
      %25 = vector.broadcast %cst_18 : f32 to vector<16x1xf32>
      %c0_19 = arith.constant 0 : index
      %c0_20 = arith.constant 0 : index
      %26 = vector.load %arg6[%c0_19, %c0_20] : memref<16x1xf32, #tpu.memory_space<vmem>>, vector<16x1xf32>
      tpu.vector_store %arg6[%c0_19, %c0_20], %25 {strides = array<i32>} : memref<16x1xf32, #tpu.memory_space<vmem>>, vector<16x1xf32>,
      %cst_21 = arith.constant 0.000000e+00 : f32
      %27 = vector.broadcast %cst_21 : f32 to vector<16x1xf32>
      %c0_22 = arith.constant 0 : index
      %c0_23 = arith.constant 0 : index
      %28 = vector.load %arg7[%c0_22, %c0_23] : memref<16x1xf32, #tpu.memory_space<vmem>>, vector<16x1xf32>
      tpu.vector_store %arg7[%c0_22, %c0_23], %27 {strides = array<i32>} : memref<16x1xf32, #tpu.memory_space<vmem>>, vector<16x1xf32>,
    } else {
    }
    %c0 = arith.constant 0 : index
    %c0_1 = arith.constant 0 : index
    %3 = vector.load %arg2[%c0, %c0_1] : memref<16x144xbf16, #tpu.memory_space<vmem>>, vector<16x144xbf16>
    %c0_2 = arith.constant 0 : index
    %c0_3 = arith.constant 0 : index
    %c0_4 = arith.constant 0 : index
    %4 = vector.load %arg3[%c0_2, %c0_3, %c0_4] : memref<1x144x256xbf16, #tpu.memory_space<vmem>>, vector<1x144x256xbf16>
    %5 = vector.shape_cast %4 : vector<1x144x256xbf16> to vector<144x256xbf16>
    %cst = arith.constant dense<0.000000e+00> : vector<16x256xf32>
    %6 = tpu.matmul %3, %5, %cst {dimension_numbers = #tpu.dot_dimension_numbers<[1], [0], [0], [1], [0, 0, 1, 1], [], []>} : vector<16x144xbf16>, vector<144x256xbf16>, vector<16x256xf32> -> vector<16x256xf32>
    %c256_i32 = arith.constant 256 : i32
    %7 = arith.muli %arg1, %c256_i32 : i32
    %8 = tpu.assume_multiple %7, 256 : i32
    %c0_5 = arith.constant 0 : index
    %9 = arith.index_cast %8 : i32 to index
    %10 = vector.load %arg5[%c0_5, %9] : memref<16x256xf32, #tpu.memory_space<vmem>>, vector<16x256xf32>
    tpu.vector_store %arg5[%c0_5, %9], %6 {strides = array<i32>} : memref<16x256xf32, #tpu.memory_space<vmem>>, vector<16x256xf32>,
    %c0_6 = arith.constant 0 : index
    %c0_7 = arith.constant 0 : index
    %11 = vector.load %arg6[%c0_6, %c0_7] : memref<16x1xf32, #tpu.memory_space<vmem>>, vector<16x1xf32>
    %cst_8 = arith.constant dense<0.000000e+00> : vector<16xf32>
    %12 = vector.multi_reduction <add>, %6, %cst_8 [1] : vector<16x256xf32> to vector<16xf32>
    %13 = vector.shape_cast %12 : vector<16xf32> to vector<16x1xf32>
    %14 = arith.addf %11, %13 : vector<16x1xf32>
    %c0_9 = arith.constant 0 : index
    %c0_10 = arith.constant 0 : index
    %15 = vector.load %arg6[%c0_9, %c0_10] : memref<16x1xf32, #tpu.memory_space<vmem>>, vector<16x1xf32>
    tpu.vector_store %arg6[%c0_9, %c0_10], %14 {strides = array<i32>} : memref<16x1xf32, #tpu.memory_space<vmem>>, vector<16x1xf32>,
    %c0_11 = arith.constant 0 : index
    %c0_12 = arith.constant 0 : index
    %16 = vector.load %arg7[%c0_11, %c0_12] : memref<16x1xf32, #tpu.memory_space<vmem>>, vector<16x1xf32>
    %17 = arith.mulf %6, %6 : vector<16x256xf32>
    %cst_13 = arith.constant dense<0.000000e+00> : vector<16xf32>
    %18 = vector.multi_reduction <add>, %17, %cst_13 [1] : vector<16x256xf32> to vector<16xf32>
    %19 = vector.shape_cast %18 : vector<16xf32> to vector<16x1xf32>
    %20 = arith.addf %16, %19 : vector<16x1xf32>
    %c0_14 = arith.constant 0 : index
    %c0_15 = arith.constant 0 : index
    %21 = vector.load %arg7[%c0_14, %c0_15] : memref<16x1xf32, #tpu.memory_space<vmem>>, vector<16x1xf32>
    tpu.vector_store %arg7[%c0_14, %c0_15], %20 {strides = array<i32>} : memref<16x1xf32, #tpu.memory_space<vmem>>, vector<16x1xf32>,
    %c0_i32_16 = arith.constant 0 : i32
    %22 = arith.cmpi eq, %arg1, %c0_i32_16 : i32
    %23 = arith.extui %22 : i1 to i32
    %c0_i32_17 = arith.constant 0 : i32
    %24 = arith.cmpi ne, %23, %c0_i32_17 : i32
    scf.if %24 {
      %c0_18 = arith.constant 0 : index
      %c0_19 = arith.constant 0 : index
      %25 = vector.load %arg6[%c0_18, %c0_19] : memref<16x1xf32, #tpu.memory_space<vmem>>, vector<16x1xf32>
      %cst_20 = arith.constant 3.906250e-03 : f32
      %26 = vector.broadcast %cst_20 : f32 to vector<16x1xf32>
      %27 = arith.mulf %25, %26 : vector<16x1xf32>
      %c0_21 = arith.constant 0 : index
      %c0_22 = arith.constant 0 : index
      %28 = vector.load %arg7[%c0_21, %c0_22] : memref<16x1xf32, #tpu.memory_space<vmem>>, vector<16x1xf32>
      %cst_23 = arith.constant 3.906250e-03 : f32
      %29 = vector.broadcast %cst_23 : f32 to vector<16x1xf32>
      %30 = arith.mulf %28, %29 : vector<16x1xf32>
      %31 = arith.mulf %27, %27 : vector<16x1xf32>
      %32 = arith.subf %30, %31 : vector<16x1xf32>
      %cst_24 = arith.constant 0.000000e+00 : f32
      %33 = vector.broadcast %cst_24 : f32 to vector<16x1xf32>
      %34 = arith.maximumf %32, %33 : vector<16x1xf32>
      %c0_25 = arith.constant 0 : index
      %c0_26 = arith.constant 0 : index
      %35 = vector.load %arg5[%c0_25, %c0_26] : memref<16x256xf32, #tpu.memory_space<vmem>>, vector<16x256xf32>
      %36 = vector.broadcast %27 : vector<16x1xf32> to vector<16x256xf32>
      %37 = arith.subf %35, %36 : vector<16x256xf32>
      %cst_27 = arith.constant 9.99999974E-6 : f32
      %38 = vector.broadcast %cst_27 : f32 to vector<16x1xf32>
      %39 = arith.addf %34, %38 : vector<16x1xf32>
      %40 = math.rsqrt %39 : vector<16x1xf32>
      %41 = vector.broadcast %40 : vector<16x1xf32> to vector<16x256xf32>
      %42 = arith.mulf %37, %41 : vector<16x256xf32>
      %cst_28 = arith.constant 0.000000e+00 : f32
      %43 = vector.broadcast %cst_28 : f32 to vector<16x256xf32>
      %44 = arith.maximumf %42, %43 : vector<16x256xf32>
      %45 = arith.truncf %44 : vector<16x256xf32> to vector<16x256xbf16>
      %c0_29 = arith.constant 0 : index
      %c0_30 = arith.constant 0 : index
      %c0_31 = arith.constant 0 : index
      %46 = vector.load %arg4[%c0_29, %c0_30, %c0_31] : memref<1x16x256xbf16, #tpu.memory_space<vmem>>, vector<1x16x256xbf16>
      %47 = vector.shape_cast %46 : vector<1x16x256xbf16> to vector<16x256xbf16>
      %48 = vector.shape_cast %45 : vector<16x256xbf16> to vector<1x16x256xbf16>
      tpu.vector_store %arg4[%c0_29, %c0_30, %c0_31], %48 {strides = array<i32>} : memref<1x16x256xbf16, #tpu.memory_space<vmem>>, vector<1x16x256xbf16>,
    } else {
    }
    return
  }
  func.func @transform_0(%arg0: i32, %arg1: i32) -> (i32, i32) {
    %c0_i32 = arith.constant 0 : i32
    %c0_i32_0 = arith.constant 0 : i32
    %c0_i32_1 = arith.constant 0 : i32
    return %c0_i32, %c0_i32_0 : i32, i32
  }
  func.func @transform_1(%arg0: i32, %arg1: i32) -> (i32, i32, i32) {
    %c0_i32 = arith.constant 0 : i32
    %c0_i32_0 = arith.constant 0 : i32
    return %arg0, %c0_i32, %arg1 : i32, i32, i32
  }
  func.func @transform_2(%arg0: i32, %arg1: i32) -> (i32, i32, i32) {
    %c0_i32 = arith.constant 0 : i32
    %c0_i32_0 = arith.constant 0 : i32
    %c0_i32_1 = arith.constant 0 : i32
    return %arg0, %c0_i32, %c0_i32_0 : i32, i32, i32
  }
}

module attributes {stable_mosaic.version = 11 : i64} {
  func.func @_conv_plain_kernel(%arg0: i32, %arg1: i32, %arg2: memref<32x72xbf16, #tpu.memory_space<vmem>>, %arg3: memref<1x72x1024xbf16, #tpu.memory_space<vmem>>, %arg4: memref<1x32x1024xf32, #tpu.memory_space<vmem>>) attributes {dimension_semantics = [#tpu.dimension_semantics<parallel>, #tpu.dimension_semantics<parallel>], iteration_bounds = array<i64: 2, 1>, scalar_prefetch = 0 : i64, scratch_operands = 0 : i64, tpu.core_type = #tpu.core_type<tc>, window_params = [{pipeline_mode = #tpu.pipeline_mode<synchronous>, transform_indices = @transform_0, window_bounds = array<i64: 32, 72>}, {transform_indices = @transform_1, window_bounds = array<i64: 1, 72, 1024>}, {transform_indices = @transform_2, window_bounds = array<i64: 1, 32, 1024>}]} {
    %c0 = arith.constant 0 : index
    %c0_0 = arith.constant 0 : index
    %0 = vector.load %arg2[%c0, %c0_0] : memref<32x72xbf16, #tpu.memory_space<vmem>>, vector<32x72xbf16>
    %c0_1 = arith.constant 0 : index
    %c0_2 = arith.constant 0 : index
    %c0_3 = arith.constant 0 : index
    %1 = vector.load %arg3[%c0_1, %c0_2, %c0_3] : memref<1x72x1024xbf16, #tpu.memory_space<vmem>>, vector<1x72x1024xbf16>
    %2 = vector.shape_cast %1 : vector<1x72x1024xbf16> to vector<72x1024xbf16>
    %cst = arith.constant dense<0.000000e+00> : vector<32x1024xf32>
    %3 = tpu.matmul %0, %2, %cst {dimension_numbers = #tpu.dot_dimension_numbers<[1], [0], [0], [1], [0, 0, 1, 1], [], []>} : vector<32x72xbf16>, vector<72x1024xbf16>, vector<32x1024xf32> -> vector<32x1024xf32>
    %c0_4 = arith.constant 0 : index
    %c0_5 = arith.constant 0 : index
    %c0_6 = arith.constant 0 : index
    %4 = vector.load %arg4[%c0_4, %c0_5, %c0_6] : memref<1x32x1024xf32, #tpu.memory_space<vmem>>, vector<1x32x1024xf32>
    %5 = vector.shape_cast %4 : vector<1x32x1024xf32> to vector<32x1024xf32>
    %6 = vector.shape_cast %3 : vector<32x1024xf32> to vector<1x32x1024xf32>
    tpu.vector_store %arg4[%c0_4, %c0_5, %c0_6], %6 {strides = array<i32>} : memref<1x32x1024xf32, #tpu.memory_space<vmem>>, vector<1x32x1024xf32>,
    return
  }
  func.func @transform_0(%arg0: i32, %arg1: i32) -> (i32, i32) {
    %c0_i32 = arith.constant 0 : i32
    %c0_i32_0 = arith.constant 0 : i32
    %c0_i32_1 = arith.constant 0 : i32
    return %c0_i32, %c0_i32_0 : i32, i32
  }
  func.func @transform_1(%arg0: i32, %arg1: i32) -> (i32, i32, i32) {
    %c0_i32 = arith.constant 0 : i32
    %c0_i32_0 = arith.constant 0 : i32
    return %arg0, %c0_i32, %arg1 : i32, i32, i32
  }
  func.func @transform_2(%arg0: i32, %arg1: i32) -> (i32, i32, i32) {
    %c0_i32 = arith.constant 0 : i32
    %c0_i32_0 = arith.constant 0 : i32
    return %arg0, %c0_i32, %arg1 : i32, i32, i32
  }
}

module attributes {stable_mosaic.version = 11 : i64} {
  func.func @_conv_plain_kernel(%arg0: i32, %arg1: i32, %arg2: memref<32x144xbf16, #tpu.memory_space<vmem>>, %arg3: memref<1x144x256xbf16, #tpu.memory_space<vmem>>, %arg4: memref<1x32x256xf32, #tpu.memory_space<vmem>>) attributes {dimension_semantics = [#tpu.dimension_semantics<parallel>, #tpu.dimension_semantics<parallel>], iteration_bounds = array<i64: 2, 1>, scalar_prefetch = 0 : i64, scratch_operands = 0 : i64, tpu.core_type = #tpu.core_type<tc>, window_params = [{pipeline_mode = #tpu.pipeline_mode<synchronous>, transform_indices = @transform_0, window_bounds = array<i64: 32, 144>}, {transform_indices = @transform_1, window_bounds = array<i64: 1, 144, 256>}, {transform_indices = @transform_2, window_bounds = array<i64: 1, 32, 256>}]} {
    %c0 = arith.constant 0 : index
    %c0_0 = arith.constant 0 : index
    %0 = vector.load %arg2[%c0, %c0_0] : memref<32x144xbf16, #tpu.memory_space<vmem>>, vector<32x144xbf16>
    %c0_1 = arith.constant 0 : index
    %c0_2 = arith.constant 0 : index
    %c0_3 = arith.constant 0 : index
    %1 = vector.load %arg3[%c0_1, %c0_2, %c0_3] : memref<1x144x256xbf16, #tpu.memory_space<vmem>>, vector<1x144x256xbf16>
    %2 = vector.shape_cast %1 : vector<1x144x256xbf16> to vector<144x256xbf16>
    %cst = arith.constant dense<0.000000e+00> : vector<32x256xf32>
    %3 = tpu.matmul %0, %2, %cst {dimension_numbers = #tpu.dot_dimension_numbers<[1], [0], [0], [1], [0, 0, 1, 1], [], []>} : vector<32x144xbf16>, vector<144x256xbf16>, vector<32x256xf32> -> vector<32x256xf32>
    %c0_4 = arith.constant 0 : index
    %c0_5 = arith.constant 0 : index
    %c0_6 = arith.constant 0 : index
    %4 = vector.load %arg4[%c0_4, %c0_5, %c0_6] : memref<1x32x256xf32, #tpu.memory_space<vmem>>, vector<1x32x256xf32>
    %5 = vector.shape_cast %4 : vector<1x32x256xf32> to vector<32x256xf32>
    %6 = vector.shape_cast %3 : vector<32x256xf32> to vector<1x32x256xf32>
    tpu.vector_store %arg4[%c0_4, %c0_5, %c0_6], %6 {strides = array<i32>} : memref<1x32x256xf32, #tpu.memory_space<vmem>>, vector<1x32x256xf32>,
    return
  }
  func.func @transform_0(%arg0: i32, %arg1: i32) -> (i32, i32) {
    %c0_i32 = arith.constant 0 : i32
    %c0_i32_0 = arith.constant 0 : i32
    %c0_i32_1 = arith.constant 0 : i32
    return %c0_i32, %c0_i32_0 : i32, i32
  }
  func.func @transform_1(%arg0: i32, %arg1: i32) -> (i32, i32, i32) {
    %c0_i32 = arith.constant 0 : i32
    %c0_i32_0 = arith.constant 0 : i32
    return %arg0, %c0_i32, %arg1 : i32, i32, i32
  }
  func.func @transform_2(%arg0: i32, %arg1: i32) -> (i32, i32, i32) {
    %c0_i32 = arith.constant 0 : i32
    %c0_i32_0 = arith.constant 0 : i32
    return %arg0, %c0_i32, %arg1 : i32, i32, i32
  }
}

module attributes {stable_mosaic.version = 11 : i64} {
  func.func @_conv_in_relu_kernel(%arg0: i32, %arg1: i32, %arg2: memref<32x400xbf16, #tpu.memory_space<vmem>>, %arg3: memref<1x400x128xbf16, #tpu.memory_space<vmem>>, %arg4: memref<1x32x128xbf16, #tpu.memory_space<vmem>>, %arg5: memref<32x128xf32, #tpu.memory_space<vmem>>, %arg6: memref<32x1xf32, #tpu.memory_space<vmem>>, %arg7: memref<32x1xf32, #tpu.memory_space<vmem>>) attributes {dimension_semantics = [#tpu.dimension_semantics<parallel>, #tpu.dimension_semantics<arbitrary>], iteration_bounds = array<i64: 2, 1>, scalar_prefetch = 0 : i64, scratch_operands = 3 : i64, tpu.core_type = #tpu.core_type<tc>, window_params = [{pipeline_mode = #tpu.pipeline_mode<synchronous>, transform_indices = @transform_0, window_bounds = array<i64: 32, 400>}, {transform_indices = @transform_1, window_bounds = array<i64: 1, 400, 128>}, {transform_indices = @transform_2, window_bounds = array<i64: 1, 32, 128>}]} {
    %c0_i32 = arith.constant 0 : i32
    %0 = arith.cmpi eq, %arg1, %c0_i32 : i32
    %1 = arith.extui %0 : i1 to i32
    %c0_i32_0 = arith.constant 0 : i32
    %2 = arith.cmpi ne, %1, %c0_i32_0 : i32
    scf.if %2 {
      %cst_18 = arith.constant 0.000000e+00 : f32
      %25 = vector.broadcast %cst_18 : f32 to vector<32x1xf32>
      %c0_19 = arith.constant 0 : index
      %c0_20 = arith.constant 0 : index
      %26 = vector.load %arg6[%c0_19, %c0_20] : memref<32x1xf32, #tpu.memory_space<vmem>>, vector<32x1xf32>
      tpu.vector_store %arg6[%c0_19, %c0_20], %25 {strides = array<i32>} : memref<32x1xf32, #tpu.memory_space<vmem>>, vector<32x1xf32>,
      %cst_21 = arith.constant 0.000000e+00 : f32
      %27 = vector.broadcast %cst_21 : f32 to vector<32x1xf32>
      %c0_22 = arith.constant 0 : index
      %c0_23 = arith.constant 0 : index
      %28 = vector.load %arg7[%c0_22, %c0_23] : memref<32x1xf32, #tpu.memory_space<vmem>>, vector<32x1xf32>
      tpu.vector_store %arg7[%c0_22, %c0_23], %27 {strides = array<i32>} : memref<32x1xf32, #tpu.memory_space<vmem>>, vector<32x1xf32>,
    } else {
    }
    %c0 = arith.constant 0 : index
    %c0_1 = arith.constant 0 : index
    %3 = vector.load %arg2[%c0, %c0_1] : memref<32x400xbf16, #tpu.memory_space<vmem>>, vector<32x400xbf16>
    %c0_2 = arith.constant 0 : index
    %c0_3 = arith.constant 0 : index
    %c0_4 = arith.constant 0 : index
    %4 = vector.load %arg3[%c0_2, %c0_3, %c0_4] : memref<1x400x128xbf16, #tpu.memory_space<vmem>>, vector<1x400x128xbf16>
    %5 = vector.shape_cast %4 : vector<1x400x128xbf16> to vector<400x128xbf16>
    %cst = arith.constant dense<0.000000e+00> : vector<32x128xf32>
    %6 = tpu.matmul %3, %5, %cst {dimension_numbers = #tpu.dot_dimension_numbers<[1], [0], [0], [1], [0, 0, 1, 1], [], []>} : vector<32x400xbf16>, vector<400x128xbf16>, vector<32x128xf32> -> vector<32x128xf32>
    %c128_i32 = arith.constant 128 : i32
    %7 = arith.muli %arg1, %c128_i32 : i32
    %8 = tpu.assume_multiple %7, 128 : i32
    %c0_5 = arith.constant 0 : index
    %9 = arith.index_cast %8 : i32 to index
    %10 = vector.load %arg5[%c0_5, %9] : memref<32x128xf32, #tpu.memory_space<vmem>>, vector<32x128xf32>
    tpu.vector_store %arg5[%c0_5, %9], %6 {strides = array<i32>} : memref<32x128xf32, #tpu.memory_space<vmem>>, vector<32x128xf32>,
    %c0_6 = arith.constant 0 : index
    %c0_7 = arith.constant 0 : index
    %11 = vector.load %arg6[%c0_6, %c0_7] : memref<32x1xf32, #tpu.memory_space<vmem>>, vector<32x1xf32>
    %cst_8 = arith.constant dense<0.000000e+00> : vector<32xf32>
    %12 = vector.multi_reduction <add>, %6, %cst_8 [1] : vector<32x128xf32> to vector<32xf32>
    %13 = vector.shape_cast %12 : vector<32xf32> to vector<32x1xf32>
    %14 = arith.addf %11, %13 : vector<32x1xf32>
    %c0_9 = arith.constant 0 : index
    %c0_10 = arith.constant 0 : index
    %15 = vector.load %arg6[%c0_9, %c0_10] : memref<32x1xf32, #tpu.memory_space<vmem>>, vector<32x1xf32>
    tpu.vector_store %arg6[%c0_9, %c0_10], %14 {strides = array<i32>} : memref<32x1xf32, #tpu.memory_space<vmem>>, vector<32x1xf32>,
    %c0_11 = arith.constant 0 : index
    %c0_12 = arith.constant 0 : index
    %16 = vector.load %arg7[%c0_11, %c0_12] : memref<32x1xf32, #tpu.memory_space<vmem>>, vector<32x1xf32>
    %17 = arith.mulf %6, %6 : vector<32x128xf32>
    %cst_13 = arith.constant dense<0.000000e+00> : vector<32xf32>
    %18 = vector.multi_reduction <add>, %17, %cst_13 [1] : vector<32x128xf32> to vector<32xf32>
    %19 = vector.shape_cast %18 : vector<32xf32> to vector<32x1xf32>
    %20 = arith.addf %16, %19 : vector<32x1xf32>
    %c0_14 = arith.constant 0 : index
    %c0_15 = arith.constant 0 : index
    %21 = vector.load %arg7[%c0_14, %c0_15] : memref<32x1xf32, #tpu.memory_space<vmem>>, vector<32x1xf32>
    tpu.vector_store %arg7[%c0_14, %c0_15], %20 {strides = array<i32>} : memref<32x1xf32, #tpu.memory_space<vmem>>, vector<32x1xf32>,
    %c0_i32_16 = arith.constant 0 : i32
    %22 = arith.cmpi eq, %arg1, %c0_i32_16 : i32
    %23 = arith.extui %22 : i1 to i32
    %c0_i32_17 = arith.constant 0 : i32
    %24 = arith.cmpi ne, %23, %c0_i32_17 : i32
    scf.if %24 {
      %c0_18 = arith.constant 0 : index
      %c0_19 = arith.constant 0 : index
      %25 = vector.load %arg6[%c0_18, %c0_19] : memref<32x1xf32, #tpu.memory_space<vmem>>, vector<32x1xf32>
      %cst_20 = arith.constant 1.562500e-02 : f32
      %26 = vector.broadcast %cst_20 : f32 to vector<32x1xf32>
      %27 = arith.mulf %25, %26 : vector<32x1xf32>
      %c0_21 = arith.constant 0 : index
      %c0_22 = arith.constant 0 : index
      %28 = vector.load %arg7[%c0_21, %c0_22] : memref<32x1xf32, #tpu.memory_space<vmem>>, vector<32x1xf32>
      %cst_23 = arith.constant 1.562500e-02 : f32
      %29 = vector.broadcast %cst_23 : f32 to vector<32x1xf32>
      %30 = arith.mulf %28, %29 : vector<32x1xf32>
      %31 = arith.mulf %27, %27 : vector<32x1xf32>
      %32 = arith.subf %30, %31 : vector<32x1xf32>
      %cst_24 = arith.constant 0.000000e+00 : f32
      %33 = vector.broadcast %cst_24 : f32 to vector<32x1xf32>
      %34 = arith.maximumf %32, %33 : vector<32x1xf32>
      %c0_25 = arith.constant 0 : index
      %c0_26 = arith.constant 0 : index
      %35 = vector.load %arg5[%c0_25, %c0_26] : memref<32x128xf32, #tpu.memory_space<vmem>>, vector<32x128xf32>
      %36 = vector.broadcast %27 : vector<32x1xf32> to vector<32x128xf32>
      %37 = arith.subf %35, %36 : vector<32x128xf32>
      %cst_27 = arith.constant 9.99999974E-6 : f32
      %38 = vector.broadcast %cst_27 : f32 to vector<32x1xf32>
      %39 = arith.addf %34, %38 : vector<32x1xf32>
      %40 = math.rsqrt %39 : vector<32x1xf32>
      %41 = vector.broadcast %40 : vector<32x1xf32> to vector<32x128xf32>
      %42 = arith.mulf %37, %41 : vector<32x128xf32>
      %cst_28 = arith.constant 0.000000e+00 : f32
      %43 = vector.broadcast %cst_28 : f32 to vector<32x128xf32>
      %44 = arith.maximumf %42, %43 : vector<32x128xf32>
      %45 = arith.truncf %44 : vector<32x128xf32> to vector<32x128xbf16>
      %c0_29 = arith.constant 0 : index
      %c0_30 = arith.constant 0 : index
      %c0_31 = arith.constant 0 : index
      %46 = vector.load %arg4[%c0_29, %c0_30, %c0_31] : memref<1x32x128xbf16, #tpu.memory_space<vmem>>, vector<1x32x128xbf16>
      %47 = vector.shape_cast %46 : vector<1x32x128xbf16> to vector<32x128xbf16>
      %48 = vector.shape_cast %45 : vector<32x128xbf16> to vector<1x32x128xbf16>
      tpu.vector_store %arg4[%c0_29, %c0_30, %c0_31], %48 {strides = array<i32>} : memref<1x32x128xbf16, #tpu.memory_space<vmem>>, vector<1x32x128xbf16>,
    } else {
    }
    return
  }
  func.func @transform_0(%arg0: i32, %arg1: i32) -> (i32, i32) {
    %c0_i32 = arith.constant 0 : i32
    %c0_i32_0 = arith.constant 0 : i32
    %c0_i32_1 = arith.constant 0 : i32
    return %c0_i32, %c0_i32_0 : i32, i32
  }
  func.func @transform_1(%arg0: i32, %arg1: i32) -> (i32, i32, i32) {
    %c0_i32 = arith.constant 0 : i32
    %c0_i32_0 = arith.constant 0 : i32
    return %arg0, %c0_i32, %arg1 : i32, i32, i32
  }
  func.func @transform_2(%arg0: i32, %arg1: i32) -> (i32, i32, i32) {
    %c0_i32 = arith.constant 0 : i32
    %c0_i32_0 = arith.constant 0 : i32
    %c0_i32_1 = arith.constant 0 : i32
    return %arg0, %c0_i32, %c0_i32_0 : i32, i32, i32
  }
}

module attributes {stable_mosaic.version = 11 : i64} {
  func.func @_conv_in_relu_kernel(%arg0: i32, %arg1: i32, %arg2: memref<32x288xbf16, #tpu.memory_space<vmem>>, %arg3: memref<1x288x128xbf16, #tpu.memory_space<vmem>>, %arg4: memref<1x32x128xbf16, #tpu.memory_space<vmem>>, %arg5: memref<32x128xf32, #tpu.memory_space<vmem>>, %arg6: memref<32x1xf32, #tpu.memory_space<vmem>>, %arg7: memref<32x1xf32, #tpu.memory_space<vmem>>) attributes {dimension_semantics = [#tpu.dimension_semantics<parallel>, #tpu.dimension_semantics<arbitrary>], iteration_bounds = array<i64: 2, 1>, scalar_prefetch = 0 : i64, scratch_operands = 3 : i64, tpu.core_type = #tpu.core_type<tc>, window_params = [{pipeline_mode = #tpu.pipeline_mode<synchronous>, transform_indices = @transform_0, window_bounds = array<i64: 32, 288>}, {transform_indices = @transform_1, window_bounds = array<i64: 1, 288, 128>}, {transform_indices = @transform_2, window_bounds = array<i64: 1, 32, 128>}]} {
    %c0_i32 = arith.constant 0 : i32
    %0 = arith.cmpi eq, %arg1, %c0_i32 : i32
    %1 = arith.extui %0 : i1 to i32
    %c0_i32_0 = arith.constant 0 : i32
    %2 = arith.cmpi ne, %1, %c0_i32_0 : i32
    scf.if %2 {
      %cst_18 = arith.constant 0.000000e+00 : f32
      %25 = vector.broadcast %cst_18 : f32 to vector<32x1xf32>
      %c0_19 = arith.constant 0 : index
      %c0_20 = arith.constant 0 : index
      %26 = vector.load %arg6[%c0_19, %c0_20] : memref<32x1xf32, #tpu.memory_space<vmem>>, vector<32x1xf32>
      tpu.vector_store %arg6[%c0_19, %c0_20], %25 {strides = array<i32>} : memref<32x1xf32, #tpu.memory_space<vmem>>, vector<32x1xf32>,
      %cst_21 = arith.constant 0.000000e+00 : f32
      %27 = vector.broadcast %cst_21 : f32 to vector<32x1xf32>
      %c0_22 = arith.constant 0 : index
      %c0_23 = arith.constant 0 : index
      %28 = vector.load %arg7[%c0_22, %c0_23] : memref<32x1xf32, #tpu.memory_space<vmem>>, vector<32x1xf32>
      tpu.vector_store %arg7[%c0_22, %c0_23], %27 {strides = array<i32>} : memref<32x1xf32, #tpu.memory_space<vmem>>, vector<32x1xf32>,
    } else {
    }
    %c0 = arith.constant 0 : index
    %c0_1 = arith.constant 0 : index
    %3 = vector.load %arg2[%c0, %c0_1] : memref<32x288xbf16, #tpu.memory_space<vmem>>, vector<32x288xbf16>
    %c0_2 = arith.constant 0 : index
    %c0_3 = arith.constant 0 : index
    %c0_4 = arith.constant 0 : index
    %4 = vector.load %arg3[%c0_2, %c0_3, %c0_4] : memref<1x288x128xbf16, #tpu.memory_space<vmem>>, vector<1x288x128xbf16>
    %5 = vector.shape_cast %4 : vector<1x288x128xbf16> to vector<288x128xbf16>
    %cst = arith.constant dense<0.000000e+00> : vector<32x128xf32>
    %6 = tpu.matmul %3, %5, %cst {dimension_numbers = #tpu.dot_dimension_numbers<[1], [0], [0], [1], [0, 0, 1, 1], [], []>} : vector<32x288xbf16>, vector<288x128xbf16>, vector<32x128xf32> -> vector<32x128xf32>
    %c128_i32 = arith.constant 128 : i32
    %7 = arith.muli %arg1, %c128_i32 : i32
    %8 = tpu.assume_multiple %7, 128 : i32
    %c0_5 = arith.constant 0 : index
    %9 = arith.index_cast %8 : i32 to index
    %10 = vector.load %arg5[%c0_5, %9] : memref<32x128xf32, #tpu.memory_space<vmem>>, vector<32x128xf32>
    tpu.vector_store %arg5[%c0_5, %9], %6 {strides = array<i32>} : memref<32x128xf32, #tpu.memory_space<vmem>>, vector<32x128xf32>,
    %c0_6 = arith.constant 0 : index
    %c0_7 = arith.constant 0 : index
    %11 = vector.load %arg6[%c0_6, %c0_7] : memref<32x1xf32, #tpu.memory_space<vmem>>, vector<32x1xf32>
    %cst_8 = arith.constant dense<0.000000e+00> : vector<32xf32>
    %12 = vector.multi_reduction <add>, %6, %cst_8 [1] : vector<32x128xf32> to vector<32xf32>
    %13 = vector.shape_cast %12 : vector<32xf32> to vector<32x1xf32>
    %14 = arith.addf %11, %13 : vector<32x1xf32>
    %c0_9 = arith.constant 0 : index
    %c0_10 = arith.constant 0 : index
    %15 = vector.load %arg6[%c0_9, %c0_10] : memref<32x1xf32, #tpu.memory_space<vmem>>, vector<32x1xf32>
    tpu.vector_store %arg6[%c0_9, %c0_10], %14 {strides = array<i32>} : memref<32x1xf32, #tpu.memory_space<vmem>>, vector<32x1xf32>,
    %c0_11 = arith.constant 0 : index
    %c0_12 = arith.constant 0 : index
    %16 = vector.load %arg7[%c0_11, %c0_12] : memref<32x1xf32, #tpu.memory_space<vmem>>, vector<32x1xf32>
    %17 = arith.mulf %6, %6 : vector<32x128xf32>
    %cst_13 = arith.constant dense<0.000000e+00> : vector<32xf32>
    %18 = vector.multi_reduction <add>, %17, %cst_13 [1] : vector<32x128xf32> to vector<32xf32>
    %19 = vector.shape_cast %18 : vector<32xf32> to vector<32x1xf32>
    %20 = arith.addf %16, %19 : vector<32x1xf32>
    %c0_14 = arith.constant 0 : index
    %c0_15 = arith.constant 0 : index
    %21 = vector.load %arg7[%c0_14, %c0_15] : memref<32x1xf32, #tpu.memory_space<vmem>>, vector<32x1xf32>
    tpu.vector_store %arg7[%c0_14, %c0_15], %20 {strides = array<i32>} : memref<32x1xf32, #tpu.memory_space<vmem>>, vector<32x1xf32>,
    %c0_i32_16 = arith.constant 0 : i32
    %22 = arith.cmpi eq, %arg1, %c0_i32_16 : i32
    %23 = arith.extui %22 : i1 to i32
    %c0_i32_17 = arith.constant 0 : i32
    %24 = arith.cmpi ne, %23, %c0_i32_17 : i32
    scf.if %24 {
      %c0_18 = arith.constant 0 : index
      %c0_19 = arith.constant 0 : index
      %25 = vector.load %arg6[%c0_18, %c0_19] : memref<32x1xf32, #tpu.memory_space<vmem>>, vector<32x1xf32>
      %cst_20 = arith.constant 1.562500e-02 : f32
      %26 = vector.broadcast %cst_20 : f32 to vector<32x1xf32>
      %27 = arith.mulf %25, %26 : vector<32x1xf32>
      %c0_21 = arith.constant 0 : index
      %c0_22 = arith.constant 0 : index
      %28 = vector.load %arg7[%c0_21, %c0_22] : memref<32x1xf32, #tpu.memory_space<vmem>>, vector<32x1xf32>
      %cst_23 = arith.constant 1.562500e-02 : f32
      %29 = vector.broadcast %cst_23 : f32 to vector<32x1xf32>
      %30 = arith.mulf %28, %29 : vector<32x1xf32>
      %31 = arith.mulf %27, %27 : vector<32x1xf32>
      %32 = arith.subf %30, %31 : vector<32x1xf32>
      %cst_24 = arith.constant 0.000000e+00 : f32
      %33 = vector.broadcast %cst_24 : f32 to vector<32x1xf32>
      %34 = arith.maximumf %32, %33 : vector<32x1xf32>
      %c0_25 = arith.constant 0 : index
      %c0_26 = arith.constant 0 : index
      %35 = vector.load %arg5[%c0_25, %c0_26] : memref<32x128xf32, #tpu.memory_space<vmem>>, vector<32x128xf32>
      %36 = vector.broadcast %27 : vector<32x1xf32> to vector<32x128xf32>
      %37 = arith.subf %35, %36 : vector<32x128xf32>
      %cst_27 = arith.constant 9.99999974E-6 : f32
      %38 = vector.broadcast %cst_27 : f32 to vector<32x1xf32>
      %39 = arith.addf %34, %38 : vector<32x1xf32>
      %40 = math.rsqrt %39 : vector<32x1xf32>
      %41 = vector.broadcast %40 : vector<32x1xf32> to vector<32x128xf32>
      %42 = arith.mulf %37, %41 : vector<32x128xf32>
      %cst_28 = arith.constant 0.000000e+00 : f32
      %43 = vector.broadcast %cst_28 : f32 to vector<32x128xf32>
      %44 = arith.maximumf %42, %43 : vector<32x128xf32>
      %45 = arith.truncf %44 : vector<32x128xf32> to vector<32x128xbf16>
      %c0_29 = arith.constant 0 : index
      %c0_30 = arith.constant 0 : index
      %c0_31 = arith.constant 0 : index
      %46 = vector.load %arg4[%c0_29, %c0_30, %c0_31] : memref<1x32x128xbf16, #tpu.memory_space<vmem>>, vector<1x32x128xbf16>
      %47 = vector.shape_cast %46 : vector<1x32x128xbf16> to vector<32x128xbf16>
      %48 = vector.shape_cast %45 : vector<32x128xbf16> to vector<1x32x128xbf16>
      tpu.vector_store %arg4[%c0_29, %c0_30, %c0_31], %48 {strides = array<i32>} : memref<1x32x128xbf16, #tpu.memory_space<vmem>>, vector<1x32x128xbf16>,
    } else {
    }
    return
  }
  func.func @transform_0(%arg0: i32, %arg1: i32) -> (i32, i32) {
    %c0_i32 = arith.constant 0 : i32
    %c0_i32_0 = arith.constant 0 : i32
    %c0_i32_1 = arith.constant 0 : i32
    return %c0_i32, %c0_i32_0 : i32, i32
  }
  func.func @transform_1(%arg0: i32, %arg1: i32) -> (i32, i32, i32) {
    %c0_i32 = arith.constant 0 : i32
    %c0_i32_0 = arith.constant 0 : i32
    return %arg0, %c0_i32, %arg1 : i32, i32, i32
  }
  func.func @transform_2(%arg0: i32, %arg1: i32) -> (i32, i32, i32) {
    %c0_i32 = arith.constant 0 : i32
    %c0_i32_0 = arith.constant 0 : i32
    %c0_i32_1 = arith.constant 0 : i32
    return %arg0, %c0_i32, %c0_i32_0 : i32, i32, i32
  }
}

module attributes {stable_mosaic.version = 11 : i64} {
  func.func @_conv_plain_kernel(%arg0: i32, %arg1: i32, %arg2: memref<8x288xbf16, #tpu.memory_space<vmem>>, %arg3: memref<1x288x128xbf16, #tpu.memory_space<vmem>>, %arg4: memref<1x8x128xf32, #tpu.memory_space<vmem>>) attributes {dimension_semantics = [#tpu.dimension_semantics<parallel>, #tpu.dimension_semantics<parallel>], iteration_bounds = array<i64: 1, 1>, scalar_prefetch = 0 : i64, scratch_operands = 0 : i64, tpu.core_type = #tpu.core_type<tc>, window_params = [{pipeline_mode = #tpu.pipeline_mode<synchronous>, transform_indices = @transform_0, window_bounds = array<i64: 8, 288>}, {transform_indices = @transform_1, window_bounds = array<i64: 1, 288, 128>}, {transform_indices = @transform_2, window_bounds = array<i64: 1, 8, 128>}]} {
    %c0 = arith.constant 0 : index
    %c0_0 = arith.constant 0 : index
    %0 = vector.load %arg2[%c0, %c0_0] : memref<8x288xbf16, #tpu.memory_space<vmem>>, vector<8x288xbf16>
    %c0_1 = arith.constant 0 : index
    %c0_2 = arith.constant 0 : index
    %c0_3 = arith.constant 0 : index
    %1 = vector.load %arg3[%c0_1, %c0_2, %c0_3] : memref<1x288x128xbf16, #tpu.memory_space<vmem>>, vector<1x288x128xbf16>
    %2 = vector.shape_cast %1 : vector<1x288x128xbf16> to vector<288x128xbf16>
    %cst = arith.constant dense<0.000000e+00> : vector<8x128xf32>
    %3 = tpu.matmul %0, %2, %cst {dimension_numbers = #tpu.dot_dimension_numbers<[1], [0], [0], [1], [0, 0, 1, 1], [], []>} : vector<8x288xbf16>, vector<288x128xbf16>, vector<8x128xf32> -> vector<8x128xf32>
    %c0_4 = arith.constant 0 : index
    %c0_5 = arith.constant 0 : index
    %c0_6 = arith.constant 0 : index
    %4 = vector.load %arg4[%c0_4, %c0_5, %c0_6] : memref<1x8x128xf32, #tpu.memory_space<vmem>>, vector<1x8x128xf32>
    %5 = vector.shape_cast %4 : vector<1x8x128xf32> to vector<8x128xf32>
    %6 = vector.shape_cast %3 : vector<8x128xf32> to vector<1x8x128xf32>
    tpu.vector_store %arg4[%c0_4, %c0_5, %c0_6], %6 {strides = array<i32>} : memref<1x8x128xf32, #tpu.memory_space<vmem>>, vector<1x8x128xf32>,
    return
  }
  func.func @transform_0(%arg0: i32, %arg1: i32) -> (i32, i32) {
    %c0_i32 = arith.constant 0 : i32
    %c0_i32_0 = arith.constant 0 : i32
    %c0_i32_1 = arith.constant 0 : i32
    return %c0_i32, %c0_i32_0 : i32, i32
  }
  func.func @transform_1(%arg0: i32, %arg1: i32) -> (i32, i32, i32) {
    %c0_i32 = arith.constant 0 : i32
    %c0_i32_0 = arith.constant 0 : i32
    return %arg0, %c0_i32, %arg1 : i32, i32, i32
  }
  func.func @transform_2(%arg0: i32, %arg1: i32) -> (i32, i32, i32) {
    %c0_i32 = arith.constant 0 : i32
    %c0_i32_0 = arith.constant 0 : i32
    return %arg0, %c0_i32, %arg1 : i32, i32, i32
  }
}

module attributes {stable_mosaic.version = 11 : i64} {
  func.func @_conv_plain_kernel(%arg0: i32, %arg1: i32, %arg2: memref<8x288xbf16, #tpu.memory_space<vmem>>, %arg3: memref<1x288x1024xbf16, #tpu.memory_space<vmem>>, %arg4: memref<1x8x1024xf32, #tpu.memory_space<vmem>>) attributes {dimension_semantics = [#tpu.dimension_semantics<parallel>, #tpu.dimension_semantics<parallel>], iteration_bounds = array<i64: 2, 1>, scalar_prefetch = 0 : i64, scratch_operands = 0 : i64, tpu.core_type = #tpu.core_type<tc>, window_params = [{pipeline_mode = #tpu.pipeline_mode<synchronous>, transform_indices = @transform_0, window_bounds = array<i64: 8, 288>}, {transform_indices = @transform_1, window_bounds = array<i64: 1, 288, 1024>}, {transform_indices = @transform_2, window_bounds = array<i64: 1, 8, 1024>}]} {
    %c0 = arith.constant 0 : index
    %c0_0 = arith.constant 0 : index
    %0 = vector.load %arg2[%c0, %c0_0] : memref<8x288xbf16, #tpu.memory_space<vmem>>, vector<8x288xbf16>
    %c0_1 = arith.constant 0 : index
    %c0_2 = arith.constant 0 : index
    %c0_3 = arith.constant 0 : index
    %1 = vector.load %arg3[%c0_1, %c0_2, %c0_3] : memref<1x288x1024xbf16, #tpu.memory_space<vmem>>, vector<1x288x1024xbf16>
    %2 = vector.shape_cast %1 : vector<1x288x1024xbf16> to vector<288x1024xbf16>
    %cst = arith.constant dense<0.000000e+00> : vector<8x1024xf32>
    %3 = tpu.matmul %0, %2, %cst {dimension_numbers = #tpu.dot_dimension_numbers<[1], [0], [0], [1], [0, 0, 1, 1], [], []>} : vector<8x288xbf16>, vector<288x1024xbf16>, vector<8x1024xf32> -> vector<8x1024xf32>
    %c0_4 = arith.constant 0 : index
    %c0_5 = arith.constant 0 : index
    %c0_6 = arith.constant 0 : index
    %4 = vector.load %arg4[%c0_4, %c0_5, %c0_6] : memref<1x8x1024xf32, #tpu.memory_space<vmem>>, vector<1x8x1024xf32>
    %5 = vector.shape_cast %4 : vector<1x8x1024xf32> to vector<8x1024xf32>
    %6 = vector.shape_cast %3 : vector<8x1024xf32> to vector<1x8x1024xf32>
    tpu.vector_store %arg4[%c0_4, %c0_5, %c0_6], %6 {strides = array<i32>} : memref<1x8x1024xf32, #tpu.memory_space<vmem>>, vector<1x8x1024xf32>,
    return
  }
  func.func @transform_0(%arg0: i32, %arg1: i32) -> (i32, i32) {
    %c0_i32 = arith.constant 0 : i32
    %c0_i32_0 = arith.constant 0 : i32
    %c0_i32_1 = arith.constant 0 : i32
    return %c0_i32, %c0_i32_0 : i32, i32
  }
  func.func @transform_1(%arg0: i32, %arg1: i32) -> (i32, i32, i32) {
    %c0_i32 = arith.constant 0 : i32
    %c0_i32_0 = arith.constant 0 : i32
    return %arg0, %c0_i32, %arg1 : i32, i32, i32
  }
  func.func @transform_2(%arg0: i32, %arg1: i32) -> (i32, i32, i32) {
    %c0_i32 = arith.constant 0 : i32
    %c0_i32_0 = arith.constant 0 : i32
    return %arg0, %c0_i32, %arg1 : i32, i32, i32
  }
}

module attributes {stable_mosaic.version = 11 : i64} {
  func.func @_conv_plain_kernel(%arg0: i32, %arg1: i32, %arg2: memref<8x288xbf16, #tpu.memory_space<vmem>>, %arg3: memref<1x288x256xbf16, #tpu.memory_space<vmem>>, %arg4: memref<1x8x256xf32, #tpu.memory_space<vmem>>) attributes {dimension_semantics = [#tpu.dimension_semantics<parallel>, #tpu.dimension_semantics<parallel>], iteration_bounds = array<i64: 2, 1>, scalar_prefetch = 0 : i64, scratch_operands = 0 : i64, tpu.core_type = #tpu.core_type<tc>, window_params = [{pipeline_mode = #tpu.pipeline_mode<synchronous>, transform_indices = @transform_0, window_bounds = array<i64: 8, 288>}, {transform_indices = @transform_1, window_bounds = array<i64: 1, 288, 256>}, {transform_indices = @transform_2, window_bounds = array<i64: 1, 8, 256>}]} {
    %c0 = arith.constant 0 : index
    %c0_0 = arith.constant 0 : index
    %0 = vector.load %arg2[%c0, %c0_0] : memref<8x288xbf16, #tpu.memory_space<vmem>>, vector<8x288xbf16>
    %c0_1 = arith.constant 0 : index
    %c0_2 = arith.constant 0 : index
    %c0_3 = arith.constant 0 : index
    %1 = vector.load %arg3[%c0_1, %c0_2, %c0_3] : memref<1x288x256xbf16, #tpu.memory_space<vmem>>, vector<1x288x256xbf16>
    %2 = vector.shape_cast %1 : vector<1x288x256xbf16> to vector<288x256xbf16>
    %cst = arith.constant dense<0.000000e+00> : vector<8x256xf32>
    %3 = tpu.matmul %0, %2, %cst {dimension_numbers = #tpu.dot_dimension_numbers<[1], [0], [0], [1], [0, 0, 1, 1], [], []>} : vector<8x288xbf16>, vector<288x256xbf16>, vector<8x256xf32> -> vector<8x256xf32>
    %c0_4 = arith.constant 0 : index
    %c0_5 = arith.constant 0 : index
    %c0_6 = arith.constant 0 : index
    %4 = vector.load %arg4[%c0_4, %c0_5, %c0_6] : memref<1x8x256xf32, #tpu.memory_space<vmem>>, vector<1x8x256xf32>
    %5 = vector.shape_cast %4 : vector<1x8x256xf32> to vector<8x256xf32>
    %6 = vector.shape_cast %3 : vector<8x256xf32> to vector<1x8x256xf32>
    tpu.vector_store %arg4[%c0_4, %c0_5, %c0_6], %6 {strides = array<i32>} : memref<1x8x256xf32, #tpu.memory_space<vmem>>, vector<1x8x256xf32>,
    return
  }
  func.func @transform_0(%arg0: i32, %arg1: i32) -> (i32, i32) {
    %c0_i32 = arith.constant 0 : i32
    %c0_i32_0 = arith.constant 0 : i32
    %c0_i32_1 = arith.constant 0 : i32
    return %c0_i32, %c0_i32_0 : i32, i32
  }
  func.func @transform_1(%arg0: i32, %arg1: i32) -> (i32, i32, i32) {
    %c0_i32 = arith.constant 0 : i32
    %c0_i32_0 = arith.constant 0 : i32
    return %arg0, %c0_i32, %arg1 : i32, i32, i32
  }
  func.func @transform_2(%arg0: i32, %arg1: i32) -> (i32, i32, i32) {
    %c0_i32 = arith.constant 0 : i32
    %c0_i32_0 = arith.constant 0 : i32
    return %arg0, %c0_i32, %arg1 : i32, i32, i32
  }
}

</mosaic_0001>

<bundles_post_ra>
// kernel: feature_network_forward.13
= control target key start
LH: loop header
LB: loop body
LE: loop exit
PB: predicated region body
PF: predicated region fallthrough
CT: control target
= control target key end

     0   :  { %s786_s9 = smov 0   ;;  %s788_s10 = smov 0   ;;  %s882_s0 = inlined_call_operand.vmem [shape: bf16[8,27], index: 0, kind: input, shape index: {}]   ;;  %s883_s1 = inlined_call_operand.vmem [shape: bf16[2,27,1024], index: 1, kind: input, shape index: {}]   ;;  %s884_s2 = inlined_call_operand.vmem [shape: bf16[2,8,1024], index: 2, kind: output, shape index: {}]  }
   0x1   :  { %s790_s11 = smov 0  }
   0x2 LB: > { %s24_s12 = sadd.s32 1, %s762_s10  ;;  %p676_p0 = scmp.ge.s32.totalorder %s766_s11, 1  ;;  %s766_s11 = sphi %s790_s11, %s12_s11   ;;  %s762_s10 = sphi %s788_s10, %s886_s10   ;;  %s758_s9 = sphi %s786_s9, %s885_s9  }
   0x3   : > { %p26_p1 = scmp.ge.s32.totalorder %s24_s12, 2  ;;  %p131_p2 = scmp.lt.s32.totalorder %s766_s11, 3 }
   0x5   : > { %s888_s12 = smov (%p26_p1, %s24_s12), 0  ;;  %p132_p3 = pnand %p676_p0, %p131_p2 }
   0x6   : > { %p158_p4 = scmp.lt.s32.totalorder (!%p132_p3), %s758_s9, 1  ;;  %vm273_vm0 = vcmask (!%p132_p3), 1044480   ;;  %v768_v0 = vmov (!%p132_p3), 0   ;;  %vm274_vm1 = vcmask (!%p132_p3), 1045504   ;;  %v769_v1 = vmov (!%p132_p3), 65535  }
   0x7   : > { %135 = sbr.rel (%p132_p3) target bundleno = 568 (0x238), region = 28  ;;  %333 = vmatprep.mubr.bf16.mxu0 (!%p132_p3), %v768_v0  ;;  %374 = vmatprep.mubr.bf16.mxu1 (!%p132_p3), %v768_v0  ;;  %v275_v2 = vsel (!%p132_p3), %vm273_vm0, 4294967295, %v769_v1  ;;  %v180_v36 = vld [vmem:[%s882_s0] sm:$0xf] (!%p132_p3)  ;;  %vm269_vm2 = vcmask (!%p132_p3), 220160   ;;  %vm177_vm3 = vcmask (!%p132_p3), 7168  }
   0x8   : > { %740 = vset.pattern.permute.xlu1 (!%p132_p3), %v768_v0  ;;  %741 = vset.pattern.permute.xlu0 (!%p132_p3), %v768_v0  ;;  %v276_v11 = vsel (!%p132_p3), %vm274_vm1, %v275_v2, 0  ;;  %v770_v45 = vmov (!%p132_p3), 0.0  }
   0x9   : > { %178 = vst.msk [vmem:[#allocation3] sm:$0xff] (!%p132_p3), %vm177_vm3, %v770_v45  ;;  %179 = vst.msk [vmem:[#allocation4] sm:$0xff] (!%p132_p3), %vm177_vm3, %v770_v45 }
   0xe   : > { %s890_s9 = smov (!%p158_p4, %s758_s9), 1 }
   0xf   : > { %s707_s13 = sshll.u32 %s890_s9, 7  ;;  %s708_s19 = sshll.u32 %s890_s9, 5 }
  0x10   : > { %s814_s16 = scalar_lea.vmem %s883_s1, %s707_s13  ;;  %s171_s22 = scalar_lea.vmem %s884_s2, %s708_s19 }
  0x11   : > { %v181_v3 = vld [vmem:[%s814_s16] sm:$0xff]  ;;  %v182_v5 = vld [vmem:[%s814_s16 + $0x8] sm:$0xff]  ;;  %v183_v18 = vld [vmem:[%s814_s16 + $0x10] sm:$0xff] }
  0x12   : > { %v185_v4 = vld [vmem:[%s814_s16 + $0x20] sm:$0xff]  ;;  %v186_v8 = vld [vmem:[%s814_s16 + $0x28] sm:$0xff]  ;;  %v187_v21 = vld [vmem:[%s814_s16 + $0x30] sm:$0xff] }
  0x13   : > { %v682_v6 = vcombine.high %v181_v3, %v185_v4  ;;  %v681_v7 = vcombine.low %v181_v3, %v185_v4  ;;  %v189_v9 = vld [vmem:[%s814_s16 + $0x40] sm:$0xff]  ;;  %v684_v12 = vcombine.high %v182_v5, %v186_v8  ;;  %v683_v13 = vcombine.low %v182_v5, %v186_v8  ;;  %v190_v16 = vld [vmem:[%s814_s16 + $0x48] sm:$0xff]  ;;  %v184_v22 = vld [vmem:[%s814_s16 + $0x18] sm:$0xff] }
  0x14   : > { %v193_v10 = vld [vmem:[%s814_s16 + $0x60] sm:$0x33]  ;;  %v194_v17 = vld [vmem:[%s814_s16 + $0x68] sm:$0x33]  ;;  %v188_v23 = vld [vmem:[%s814_s16 + $0x38] sm:$0xff]  ;;  %v686_v31 = vcombine.high %v183_v18, %v187_v21  ;;  %v685_v37 = vcombine.low %v183_v18, %v187_v21 }
  0x15   : > { %v690_v14 = vcombine.high %v189_v9, %v193_v10  ;;  %v689_v15 = vcombine.low %v189_v9, %v193_v10  ;;  %301 = vmatprep.subr.bf16.mxu0 %v682_v6  ;;  %v692_v19 = vcombine.high %v190_v16, %v194_v17  ;;  %v691_v20 = vcombine.low %v190_v16, %v194_v17  ;;  %v191_v26 = vld [vmem:[%s814_s16 + $0x50] sm:$0xff]  ;;  %v192_v28 = vld [vmem:[%s814_s16 + $0x58] sm:$0xff] }
  0x16   : > { %302 = vmatpush1.bf16.msra.mxu0 %v681_v7  ;;  %342 = vmatprep.subr.bf16.mxu1 %v684_v12  ;;  %v195_v27 = vld [vmem:[%s814_s16 + $0x70] sm:$0x33]  ;;  %v196_v32 = vld [vmem:[%s814_s16 + $0x78] sm:$0x33]  ;;  %v688_v33 = vcombine.high %v184_v22, %v188_v23  ;;  %v687_v39 = vcombine.low %v184_v22, %v188_v23  ;;  %v491_v23 = vld [vmem:[#allocation4] sm:$0xff] }
  0x17   : > { %v281_v24 = vand.u32 %v690_v14, %v276_v11  ;;  %v278_v25 = vand.u32 %v689_v15, %v276_v11  ;;  %343 = vmatpush1.bf16.msra.mxu1 %v683_v13  ;;  %v287_v29 = vand.u32 %v692_v19, %v276_v11  ;;  %v284_v30 = vand.u32 %v691_v20, %v276_v11  ;;  %v478_v20 = vld [vmem:[#allocation3] sm:$0xff] }
  0x18   : > { %v694_v34 = vcombine.high %v191_v26, %v195_v27  ;;  %v696_v35 = vcombine.high %v192_v28, %v196_v32  ;;  %v693_v38 = vcombine.low %v191_v26, %v195_v27  ;;  %v695_v41 = vcombine.low %v192_v28, %v196_v32 }
  0x19   : > { %303 = vmatprep.subr.bf16.mxu0 %v281_v24  ;;  %344 = vmatprep.subr.bf16.mxu1 %v287_v29 }
  0x1a   : > { %304 = vmatpush1.bf16.msra.mxu0 %v278_v25  ;;  %v293_v40 = vand.u32 %v694_v34, %v276_v11  ;;  %v299_v42 = vand.u32 %v696_v35, %v276_v11  ;;  %v290_v43 = vand.u32 %v693_v38, %v276_v11  ;;  %v296_v44 = vand.u32 %v695_v41, %v276_v11 }
  0x1b   : > { %345 = vmatpush1.bf16.msra.mxu1 %v284_v30  ;;  %383 = vmatprep.subr.bf16.mxu0 %v686_v31 }
  0x1c   : > { %424 = vmatprep.subr.bf16.mxu1 %v688_v33 }
  0x1d   : > { %697 = vmatmul.mubr.msk.bf16.vlgmr.msra.gmra.mrb[0].mxu0 %vm269_vm2, %v180_v36 }
  0x1e   : > { %384 = vmatpush1.bf16.msra.mxu0 %v685_v37  ;;  %698 = vmatmul.mubr.msk.bf16.vlgmr.msra.gmra.mrb[0].mxu1 %vm269_vm2, %v180_v36 }
  0x1f   : > { %425 = vmatpush1.bf16.msra.mxu1 %v687_v39  ;;  %385 = vmatprep.subr.bf16.mxu0 %v293_v40 }
  0x20   : > { %426 = vmatprep.subr.bf16.mxu1 %v299_v42  ;;  %415 = vmatprep.mubr.bf16.mxu0 %v768_v0 }
  0x21   : > { %456 = vmatprep.mubr.bf16.mxu1 %v768_v0 }
  0x22   : > { %386 = vmatpush1.bf16.msra.mxu0 %v290_v43 }
  0x23   : > { %427 = vmatpush1.bf16.msra.mxu1 %v296_v44 }
  0x25   : > { %699 = vmatmul.mubr.msk.bf16.vlgmr.msra.gmra.mrb[4].mxu0 %vm269_vm2, %v180_v36 }
  0x26   : > { %700 = vmatmul.mubr.msk.bf16.vlgmr.msra.gmra.mrb[4].mxu1 %vm269_vm2, %v180_v36 }
  0xf0   : > { %v843_v46 = vpop.f32.mrb[0].mxu0 }
  0xf1   : > { %v492_v47 = vmul.f32 %v843_v46, %v843_v46  ;;  %v847_v48 = vpop.f32.mrb[1].mxu0  ;;  %v849_v49 = vpop.f32.mrb[0].mxu1 }
  0xf2   : > { %v479_v50 = vadd.f32 %v847_v48, %v843_v46  ;;  %v493_v51 = vmul.f32 %v847_v48, %v847_v48  ;;  %v339_v52 = vpop.f32.mrb[2].mxu0  ;;  %v494_v53 = vmul.f32 %v849_v49, %v849_v49  ;;  %v857_v54 = vpop.f32.mrb[1].mxu1 }
  0xf3   : > { %v340_v55 = vpop.f32.mrb[3].mxu0  ;;  %v380_v56 = vpop.f32.mrb[2].mxu1  ;;  %v495_v59 = vmul.f32 %v857_v54, %v857_v54 }
  0xf4   : > { %v500_v57 = vadd.f32 %v493_v51, %v492_v47  ;;  %v480_v58 = vadd.f32 %v479_v50, %v849_v49  ;;  %v381_v60 = vpop.f32.mrb[3].mxu1 }
  0xf6   : > { %v501_v61 = vadd.f32 %v500_v57, %v494_v53  ;;  %v481_v62 = vadd.f32 %v480_v58, %v857_v54 }
  0xf8   : > { %v502_v63 = vadd.f32 %v501_v61, %v495_v59  ;;  %v417_v0 = vpop.f32.mrb[4].mxu0 }
  0xf9   : > { %v482_v1 = vadd.f32 %v481_v62, %v417_v0  ;;  %v496_v2 = vmul.f32 %v417_v0, %v417_v0  ;;  %v419_v3 = vpop.f32.mrb[5].mxu0  ;;  %v458_v4 = vpop.f32.mrb[4].mxu1 }
  0xfa   : > { %v497_v5 = vmul.f32 %v419_v3, %v419_v3  ;;  %v421_v6 = vpop.f32.mrb[6].mxu0  ;;  %v460_v7 = vpop.f32.mrb[5].mxu1  ;;  %v498_v10 = vmul.f32 %v458_v4, %v458_v4 }
  0xfb   : > { %v503_v8 = vadd.f32 %v502_v63, %v496_v2  ;;  %v483_v9 = vadd.f32 %v482_v1, %v419_v3  ;;  %v422_v11 = vpop.f32.mrb[7].mxu0  ;;  %v462_v12 = vpop.f32.mrb[6].mxu1  ;;  %v499_v17 = vmul.f32 %v460_v7, %v460_v7 }
  0xfc   : > { %v463_v13 = vpop.f32.mrb[7].mxu1 }
  0xfd   : > { %v484_v14 = vadd.f32 %v483_v9, %v458_v4  ;;  %v504_v15 = vadd.f32 %v503_v8, %v497_v5 }
  0xff   : > { %v485_v16 = vadd.f32 %v484_v14, %v460_v7  ;;  %v505_v18 = vadd.f32 %v504_v15, %v498_v10 }
 0x101   : > { %486 = vadd.xlane.f32.xlu0 %v485_v16  ;;  %v506_v19 = vadd.f32 %v505_v18, %v499_v17 }
 0x105   : > { %507 = vadd.xlane.f32.xlu0 %v506_v19 }
 0x18e   : > { %v487_v21 = vpop.xlane.xlu0 %486 }
 0x18f   : > { %v488_v22 = vadd.f32 %v487_v21, %v478_v20 }
 0x191   : > { %490 = vst.msk [vmem:[#allocation3] sm:$0xff] %vm177_vm3, %v488_v22 }
 0x192   : > { %v508_v24 = vpop.xlane.xlu0 %507 }
 0x193   : > { %v509_v25 = vadd.f32 %v508_v24, %v491_v23 }
 0x195   : > { %510 = vst.msk [vmem:[#allocation4] sm:$0xff] %vm177_vm3, %v509_v25 }
 0x198   : > { %v514_v26 = vld [vmem:[#allocation3] sm:$0xff] }
 0x199   : > { %v515_v27 = vmul.f32 0.0009765625, %v514_v26 }
 0x19b   : > { %531 = vperm.xlu1 %740, %v515_v27   ;;  %v518_v30 = vmul.f32 %v515_v27, %v515_v27 }
 0x19c   : > { %v516_v28 = vld [vmem:[#allocation4] sm:$0xff] }
 0x19d   : > { %v517_v29 = vmul.f32 0.0009765625, %v516_v28 }
 0x19f   : > { %v519_v31 = vsub.f32 %v517_v29, %v518_v30 }
 0x1a1   : > { %v520_v32 = vmax.f32 %v519_v31, 0.0 }
 0x1a3   : > { %v542_v33 = vadd.f32 1e-05, %v520_v32 }
 0x1a5   : > { %742 = vrsqrt.f32 %v542_v33 }
 0x1af   : > { %v743_v34 = vpop.eup %742 }
 0x1b0   : > { %546 = vperm.xlu1 %740, %v743_v34  }
 0x21a   : > { %v532_v35 = vpop.permute.xlu1 %531 }
 0x21b   : > { %v534_v36 = vsub.f32 %v843_v46, %v532_v35  ;;  %v535_v37 = vsub.f32 %v847_v48, %v532_v35  ;;  %v536_v38 = vsub.f32 %v849_v49, %v532_v35  ;;  %v537_v39 = vsub.f32 %v857_v54, %v532_v35 }
 0x21c   : > { %v538_v40 = vsub.f32 %v417_v0, %v532_v35  ;;  %v539_v41 = vsub.f32 %v419_v3, %v532_v35  ;;  %v540_v42 = vsub.f32 %v458_v4, %v532_v35  ;;  %v541_v43 = vsub.f32 %v460_v7, %v532_v35 }
 0x22f   : > { %v547_v44 = vpop.permute.xlu1 %546 }
 0x230   : > { %v549_v45 = vmul.f32 %v547_v44, %v534_v36  ;;  %v550_v47 = vmul.f32 %v547_v44, %v535_v37  ;;  %v551_v50 = vmul.f32 %v547_v44, %v536_v38  ;;  %v552_v51 = vmul.f32 %v547_v44, %v537_v39 }
 0x231   : > { %v553_v52 = vmul.f32 %v547_v44, %v538_v40  ;;  %v554_v53 = vmul.f32 %v547_v44, %v539_v41  ;;  %v555_v55 = vmul.f32 %v547_v44, %v540_v42  ;;  %v556_v46 = vmul.f32 %v547_v44, %v541_v43 }
 0x232   : > { %v557_v56 = vmax.f32 %v549_v45, 0.0  ;;  %v558_v48 = vmax.f32 %v550_v47, 0.0  ;;  %v559_v57 = vmax.f32 %v551_v50, 0.0  ;;  %v560_v49 = vmax.f32 %v552_v51, 0.0 }
 0x233   : > { %v561_v54 = vmax.f32 %v553_v52, 0.0  ;;  %v562_v58 = vmax.f32 %v554_v53, 0.0  ;;  %v563_v59 = vmax.f32 %v555_v55, 0.0  ;;  %v564_v60 = vmax.f32 %v556_v46, 0.0 }
 0x234   : > { %v709_v61 = vpack.c.bf16 %v558_v48, %v557_v56  ;;  %v710_v62 = vpack.c.bf16 %v560_v49, %v559_v57 }
 0x235   : > { %v711_v63 = vpack.c.bf16 %v562_v58, %v561_v54  ;;  %v712_v0 = vpack.c.bf16 %v564_v60, %v563_v59 }
 0x236   : > { %597 = vst [vmem:[%s171_s22] sm:$0xff] %v709_v61  ;;  %598 = vst [vmem:[%s171_s22 + $0x8] sm:$0xff] %v710_v62 }
 0x237   : > { %599 = vst [vmem:[%s171_s22 + $0x10] sm:$0xff] %v711_v63  ;;  %600 = vst [vmem:[%s171_s22 + $0x18] sm:$0xff] %v712_v0 }
 0x238 PF: > { %s12_s11 = sadd.s32 1, %s766_s11   ;;  %s885_s9 = smov %s762_s10 }
 0x239   : > { %p9_p5 = scmp.ge.s32.totalorder %s12_s11, 4   ;;  %s886_s10 = smov %s888_s12 }
 0x23b   :  { %11 = sbr.rel (!%p9_p5) target bundleno = 2 (0x2), region = 67 }

// kernel: feature_network_forward.14
= control target key start
LH: loop header
LB: loop body
LE: loop exit
PB: predicated region body
PF: predicated region fallthrough
CT: control target
= control target key end

     0   :  { %s944_s9 = smov 0   ;;  %s946_s10 = smov 0   ;;  %s1068_s0 = inlined_call_operand.vmem [shape: bf16[8,72], index: 0, kind: input, shape index: {}]   ;;  %s1069_s1 = inlined_call_operand.vmem [shape: bf16[2,72,1024], index: 1, kind: input, shape index: {}]   ;;  %s1070_s2 = inlined_call_operand.vmem [shape: bf16[2,8,1024], index: 2, kind: output, shape index: {}]  }
   0x1   :  { %s948_s11 = smov 0  }
   0x2 LB: > { %s24_s12 = sadd.s32 1, %s921_s10  ;;  %p801_p0 = scmp.ge.s32.totalorder %s925_s11, 1  ;;  %s925_s11 = sphi %s948_s11, %s12_s11   ;;  %s921_s10 = sphi %s946_s10, %s1072_s10   ;;  %s917_s9 = sphi %s944_s9, %s1071_s9  }
   0x3   : > { %p26_p1 = scmp.ge.s32.totalorder %s24_s12, 2  ;;  %p131_p2 = scmp.lt.s32.totalorder %s925_s11, 3 }
   0x5   : > { %s1074_s12 = smov (%p26_p1, %s24_s12), 0  ;;  %p132_p3 = pnand %p801_p0, %p131_p2 }
   0x6   : > { %p158_p4 = scmp.lt.s32.totalorder (!%p132_p3), %s917_s9, 1  ;;  %v927_v0 = vmov (!%p132_p3), 0   ;;  %vm401_vm0 = vcmask (!%p132_p3), 1043456   ;;  %v180_v51 = vld [vmem:[%s1068_s0] sm:$0xf] (!%p132_p3)  ;;  %vm397_vm1 = vcmask (!%p132_p3), 588800  }
   0x7   : > { %135 = sbr.rel (%p132_p3) target bundleno = 593 (0x251), region = 28  ;;  %458 = vmatprep.mubr.bf16.mxu0 (!%p132_p3), %v927_v0  ;;  %499 = vmatprep.mubr.bf16.mxu1 (!%p132_p3), %v927_v0  ;;  %vm177_vm2 = vcmask (!%p132_p3), 7168  }
   0x8   : > { %891 = vset.pattern.permute.xlu1 (!%p132_p3), %v927_v0  ;;  %892 = vset.pattern.permute.xlu0 (!%p132_p3), %v927_v0 }
   0xe   : > { %s1076_s9 = smov (!%p158_p4, %s917_s9), 1 }
   0xf   : > { %s864_s13 = smul.u32 288, %s1076_s9  ;;  %s859_s19 = sshll.u32 %s1076_s9, 5 }
  0x10   : > { %s171_s22 = scalar_lea.vmem %s1070_s2, %s859_s19 }
  0x11   : > { %s972_s16 = scalar_lea.vmem %s1069_s1, %s864_s13 }
  0x12   : > { %v181_v1 = vld [vmem:[%s972_s16] sm:$0xff]  ;;  %v182_v3 = vld [vmem:[%s972_s16 + $0x8] sm:$0xff]  ;;  %v183_v39 = vld [vmem:[%s972_s16 + $0x10] sm:$0xff] }
  0x13   : > { %v185_v2 = vld [vmem:[%s972_s16 + $0x20] sm:$0xff]  ;;  %v186_v6 = vld [vmem:[%s972_s16 + $0x28] sm:$0xff]  ;;  %v187_v40 = vld [vmem:[%s972_s16 + $0x30] sm:$0xff] }
  0x14   : > { %v806_v4 = vcombine.high %v181_v1, %v185_v2  ;;  %v805_v5 = vcombine.low %v181_v1, %v185_v2  ;;  %v189_v7 = vld [vmem:[%s972_s16 + $0x40] sm:$0xff]  ;;  %v808_v9 = vcombine.high %v182_v3, %v186_v6  ;;  %v807_v10 = vcombine.low %v182_v3, %v186_v6  ;;  %v190_v12 = vld [vmem:[%s972_s16 + $0x48] sm:$0xff]  ;;  %v184_v41 = vld [vmem:[%s972_s16 + $0x18] sm:$0xff] }
  0x15   : > { %v193_v8 = vld [vmem:[%s972_s16 + $0x60] sm:$0xff]  ;;  %v194_v13 = vld [vmem:[%s972_s16 + $0x68] sm:$0xff]  ;;  %v188_v42 = vld [vmem:[%s972_s16 + $0x38] sm:$0xff]  ;;  %v810_v44 = vcombine.high %v183_v39, %v187_v40  ;;  %v809_v52 = vcombine.low %v183_v39, %v187_v40 }
  0x16   : > { %v814_v11 = vcombine.high %v189_v7, %v193_v8  ;;  %v197_v14 = vld [vmem:[%s972_s16 + $0x80] sm:$0xff]  ;;  %426 = vmatprep.subr.bf16.mxu0 %v806_v4  ;;  %v816_v15 = vcombine.high %v190_v12, %v194_v13  ;;  %v198_v17 = vld [vmem:[%s972_s16 + $0x88] sm:$0xff]  ;;  %467 = vmatprep.subr.bf16.mxu1 %v808_v9  ;;  %v813_v19 = vcombine.low %v189_v7, %v193_v8  ;;  %v191_v47 = vld [vmem:[%s972_s16 + $0x50] sm:$0xff] }
  0x17   : > { %v201_v16 = vld [vmem:[%s972_s16 + $0xa0] sm:$0xff]  ;;  %v202_v18 = vld [vmem:[%s972_s16 + $0xa8] sm:$0xff]  ;;  %427 = vmatpush1.bf16.msra.mxu0 %v805_v5  ;;  %468 = vmatpush1.bf16.msra.mxu1 %v807_v10  ;;  %v815_v20 = vcombine.low %v190_v12, %v194_v13  ;;  %v812_v46 = vcombine.high %v184_v41, %v188_v42  ;;  %v195_v48 = vld [vmem:[%s972_s16 + $0x70] sm:$0xff]  ;;  %v811_v53 = vcombine.low %v184_v41, %v188_v42 }
  0x18   : > { %428 = vmatprep.subr.bf16.mxu0 %v814_v11  ;;  %v822_v21 = vcombine.high %v197_v14, %v201_v16  ;;  %469 = vmatprep.subr.bf16.mxu1 %v816_v15  ;;  %v824_v22 = vcombine.high %v198_v17, %v202_v18  ;;  %v205_v23 = vld [vmem:[%s972_s16 + $0xc0] sm:$0xff]  ;;  %v206_v25 = vld [vmem:[%s972_s16 + $0xc8] sm:$0xff]  ;;  %v821_v27 = vcombine.low %v197_v14, %v201_v16  ;;  %v192_v49 = vld [vmem:[%s972_s16 + $0x58] sm:$0xff] }
  0x19   : > { %v209_v24 = vld [vmem:[%s972_s16 + $0xe0] sm:$0xff]  ;;  %v210_v26 = vld [vmem:[%s972_s16 + $0xe8] sm:$0xff]  ;;  %v823_v28 = vcombine.low %v198_v17, %v202_v18  ;;  %v196_v50 = vld [vmem:[%s972_s16 + $0x78] sm:$0xff]  ;;  %v818_v54 = vcombine.high %v191_v47, %v195_v48  ;;  %v817_v60 = vcombine.low %v191_v47, %v195_v48  ;;  %v928_v18 = vmov 0.0  }
  0x1a   : > { %v830_v29 = vcombine.high %v205_v23, %v209_v24  ;;  %v832_v30 = vcombine.high %v206_v25, %v210_v26  ;;  %v213_v31 = vld [vmem:[%s972_s16 + $0x100] sm:$0xff]  ;;  %v214_v32 = vld [vmem:[%s972_s16 + $0x108] sm:$0xff]  ;;  %v829_v33 = vcombine.low %v205_v23, %v209_v24  ;;  %v831_v34 = vcombine.low %v206_v25, %v210_v26  ;;  %v199_v56 = vld [vmem:[%s972_s16 + $0x90] sm:$0xff]  ;;  %178 = vst.msk [vmem:[#allocation3] sm:$0xff] %vm177_vm2, %v928_v18 }
  0x1b   : > { %429 = vmatpush1.bf16.msra.mxu0 %v813_v19  ;;  %470 = vmatpush1.bf16.msra.mxu1 %v815_v20  ;;  %v838_v35 = vcombine.high %v213_v31, %v213_v31  ;;  %v837_v36 = vcombine.low %v213_v31, %v213_v31  ;;  %v840_v37 = vcombine.high %v214_v32, %v214_v32  ;;  %v203_v57 = vld [vmem:[%s972_s16 + $0xb0] sm:$0xff]  ;;  %v200_v58 = vld [vmem:[%s972_s16 + $0x98] sm:$0xff] }
  0x1c   : > { %430 = vmatprep.subr.bf16.mxu0 %v822_v21  ;;  %471 = vmatprep.subr.bf16.mxu1 %v824_v22  ;;  %v839_v38 = vcombine.low %v214_v32, %v214_v32  ;;  %v820_v55 = vcombine.high %v192_v49, %v196_v50  ;;  %v204_v59 = vld [vmem:[%s972_s16 + $0xb8] sm:$0xff]  ;;  %v819_v61 = vcombine.low %v192_v49, %v196_v50  ;;  %v207_v1 = vld [vmem:[%s972_s16 + $0xd0] sm:$0xff] }
  0x1d   : > { %v403_v43 = vsel %vm401_vm0, %v837_v36, 0  ;;  %v826_v62 = vcombine.high %v199_v56, %v203_v57  ;;  %v828_v63 = vcombine.high %v200_v58, %v204_v59  ;;  %v211_v2 = vld [vmem:[%s972_s16 + $0xf0] sm:$0xff]  ;;  %v208_v3 = vld [vmem:[%s972_s16 + $0xd8] sm:$0xff]  ;;  %v825_v5 = vcombine.low %v199_v56, %v203_v57  ;;  %179 = vst.msk [vmem:[#allocation4] sm:$0xff] %vm177_vm2, %v928_v18 }
  0x1e   : > { %v409_v45 = vsel %vm401_vm0, %v839_v38, 0  ;;  %v212_v4 = vld [vmem:[%s972_s16 + $0xf8] sm:$0xff]  ;;  %v827_v6 = vcombine.low %v200_v58, %v204_v59  ;;  %v834_v7 = vcombine.high %v207_v1, %v211_v2  ;;  %v215_v9 = vld [vmem:[%s972_s16 + $0x110] sm:$0xff]  ;;  %v833_v11 = vcombine.low %v207_v1, %v211_v2 }
  0x1f   : > { %431 = vmatpush1.bf16.msra.mxu0 %v821_v27  ;;  %472 = vmatpush1.bf16.msra.mxu1 %v823_v28  ;;  %v836_v8 = vcombine.high %v208_v3, %v212_v4  ;;  %v216_v10 = vld [vmem:[%s972_s16 + $0x118] sm:$0xff]  ;;  %v835_v12 = vcombine.low %v208_v3, %v212_v4  ;;  %v842_v13 = vcombine.high %v215_v9, %v215_v9 }
  0x20   : > { %432 = vmatprep.subr.bf16.mxu0 %v830_v29  ;;  %473 = vmatprep.subr.bf16.mxu1 %v832_v30  ;;  %v841_v14 = vcombine.low %v215_v9, %v215_v9  ;;  %v844_v15 = vcombine.high %v216_v10, %v216_v10 }
  0x21   : > { %v603_v57 = vld [vmem:[#allocation3] sm:$0xff] }
  0x22   : > { %v415_v16 = vsel %vm401_vm0, %v841_v14, 0 }
  0x23   : > { %433 = vmatpush1.bf16.msra.mxu0 %v829_v33  ;;  %474 = vmatpush1.bf16.msra.mxu1 %v831_v34 }
  0x24   : > { %845 = vmatprep.subr.msk.bf16.mxu0 %vm401_vm0, %v838_v35  ;;  %847 = vmatprep.subr.msk.bf16.mxu1 %vm401_vm0, %v840_v37 }
  0x27   : > { %435 = vmatpush1.bf16.msra.mxu0 %v403_v43  ;;  %476 = vmatpush1.bf16.msra.mxu1 %v409_v45 }
  0x28   : > { %508 = vmatprep.subr.bf16.mxu0 %v810_v44  ;;  %549 = vmatprep.subr.bf16.mxu1 %v812_v46 }
  0x2a   : > { %846 = vmatmul.mubr.msk.bf16.vlgmr.msra.gmra.mrb[0].mxu0 %vm397_vm1, %v180_v51  ;;  %848 = vmatmul.mubr.msk.bf16.vlgmr.msra.gmra.mrb[0].mxu1 %vm397_vm1, %v180_v51 }
  0x2b   : > { %509 = vmatpush1.bf16.msra.mxu0 %v809_v52  ;;  %550 = vmatpush1.bf16.msra.mxu1 %v811_v53 }
  0x2c   : > { %510 = vmatprep.subr.bf16.mxu0 %v818_v54  ;;  %551 = vmatprep.subr.bf16.mxu1 %v820_v55 }
  0x2d   : > { %540 = vmatprep.mubr.bf16.mxu0 %v927_v0  ;;  %581 = vmatprep.mubr.bf16.mxu1 %v927_v0  ;;  %v843_v0 = vcombine.low %v216_v10, %v216_v10 }
  0x2f   : > { %511 = vmatpush1.bf16.msra.mxu0 %v817_v60  ;;  %552 = vmatpush1.bf16.msra.mxu1 %v819_v61  ;;  %v421_v17 = vsel %vm401_vm0, %v843_v0, 0  ;;  %v616_v60 = vld [vmem:[#allocation4] sm:$0xff] }
  0x30   : > { %512 = vmatprep.subr.bf16.mxu0 %v826_v62  ;;  %553 = vmatprep.subr.bf16.mxu1 %v828_v63 }
  0x33   : > { %513 = vmatpush1.bf16.msra.mxu0 %v825_v5  ;;  %554 = vmatpush1.bf16.msra.mxu1 %v827_v6 }
  0x34   : > { %514 = vmatprep.subr.bf16.mxu0 %v834_v7  ;;  %555 = vmatprep.subr.bf16.mxu1 %v836_v8 }
  0x37   : > { %515 = vmatpush1.bf16.msra.mxu0 %v833_v11  ;;  %556 = vmatpush1.bf16.msra.mxu1 %v835_v12 }
  0x38   : > { %849 = vmatprep.subr.msk.bf16.mxu0 %vm401_vm0, %v842_v13  ;;  %851 = vmatprep.subr.msk.bf16.mxu1 %vm401_vm0, %v844_v15 }
  0x3b   : > { %517 = vmatpush1.bf16.msra.mxu0 %v415_v16  ;;  %558 = vmatpush1.bf16.msra.mxu1 %v421_v17 }
  0x3e   : > { %850 = vmatmul.mubr.msk.bf16.vlgmr.msra.gmra.mrb[4].mxu0 %vm397_vm1, %v180_v51  ;;  %852 = vmatmul.mubr.msk.bf16.vlgmr.msra.gmra.mrb[4].mxu1 %vm397_vm1, %v180_v51 }
  0xfd   : > { %v1029_v19 = vpop.f32.mrb[0].mxu0  ;;  %v1035_v22 = vpop.f32.mrb[0].mxu1 }
  0xfe   : > { %v617_v20 = vmul.f32 %v1029_v19, %v1029_v19  ;;  %v1033_v21 = vpop.f32.mrb[1].mxu0  ;;  %v619_v26 = vmul.f32 %v1035_v22, %v1035_v22  ;;  %v1043_v27 = vpop.f32.mrb[1].mxu1 }
  0xff   : > { %v604_v23 = vadd.f32 %v1033_v21, %v1029_v19  ;;  %v618_v24 = vmul.f32 %v1033_v21, %v1033_v21  ;;  %v464_v25 = vpop.f32.mrb[2].mxu0  ;;  %v505_v29 = vpop.f32.mrb[2].mxu1  ;;  %v620_v32 = vmul.f32 %v1043_v27, %v1043_v27 }
 0x100   : > { %v465_v28 = vpop.f32.mrb[3].mxu0  ;;  %v506_v33 = vpop.f32.mrb[3].mxu1 }
 0x101   : > { %v625_v30 = vadd.f32 %v618_v24, %v617_v20  ;;  %v605_v31 = vadd.f32 %v604_v23, %v1035_v22 }
 0x103   : > { %v626_v34 = vadd.f32 %v625_v30, %v619_v26  ;;  %v606_v35 = vadd.f32 %v605_v31, %v1043_v27 }
 0x105   : > { %v627_v36 = vadd.f32 %v626_v34, %v620_v32 }
 0x111   : > { %v542_v37 = vpop.f32.mrb[4].mxu0  ;;  %v583_v41 = vpop.f32.mrb[4].mxu1 }
 0x112   : > { %v607_v38 = vadd.f32 %v606_v35, %v542_v37  ;;  %v621_v39 = vmul.f32 %v542_v37, %v542_v37  ;;  %v544_v40 = vpop.f32.mrb[5].mxu0  ;;  %v585_v44 = vpop.f32.mrb[5].mxu1  ;;  %v623_v47 = vmul.f32 %v583_v41, %v583_v41 }
 0x113   : > { %v622_v42 = vmul.f32 %v544_v40, %v544_v40  ;;  %v546_v43 = vpop.f32.mrb[6].mxu0  ;;  %v587_v49 = vpop.f32.mrb[6].mxu1  ;;  %v624_v54 = vmul.f32 %v585_v44, %v585_v44 }
 0x114   : > { %v628_v45 = vadd.f32 %v627_v36, %v621_v39  ;;  %v608_v46 = vadd.f32 %v607_v38, %v544_v40  ;;  %v547_v48 = vpop.f32.mrb[7].mxu0  ;;  %v588_v50 = vpop.f32.mrb[7].mxu1 }
 0x116   : > { %v609_v51 = vadd.f32 %v608_v46, %v583_v41  ;;  %v629_v52 = vadd.f32 %v628_v45, %v622_v42 }
 0x118   : > { %v610_v53 = vadd.f32 %v609_v51, %v585_v44  ;;  %v630_v55 = vadd.f32 %v629_v52, %v623_v47 }
 0x11a   : > { %611 = vadd.xlane.f32.xlu0 %v610_v53  ;;  %v631_v56 = vadd.f32 %v630_v55, %v624_v54 }
 0x11e   : > { %632 = vadd.xlane.f32.xlu0 %v631_v56 }
 0x1a7   : > { %v612_v58 = vpop.xlane.xlu0 %611 }
 0x1a8   : > { %v613_v59 = vadd.f32 %v612_v58, %v603_v57 }
 0x1aa   : > { %615 = vst.msk [vmem:[#allocation3] sm:$0xff] %vm177_vm2, %v613_v59 }
 0x1ab   : > { %v633_v61 = vpop.xlane.xlu0 %632 }
 0x1ac   : > { %v634_v62 = vadd.f32 %v633_v61, %v616_v60 }
 0x1ae   : > { %635 = vst.msk [vmem:[#allocation4] sm:$0xff] %vm177_vm2, %v634_v62 }
 0x1b1   : > { %v639_v63 = vld [vmem:[#allocation3] sm:$0xff] }
 0x1b2   : > { %v640_v1 = vmul.f32 0.0009765625, %v639_v63 }
 0x1b4   : > { %656 = vperm.xlu1 %891, %v640_v1   ;;  %v643_v4 = vmul.f32 %v640_v1, %v640_v1 }
 0x1b5   : > { %v641_v2 = vld [vmem:[#allocation4] sm:$0xff] }
 0x1b6   : > { %v642_v3 = vmul.f32 0.0009765625, %v641_v2 }
 0x1b8   : > { %v644_v5 = vsub.f32 %v642_v3, %v643_v4 }
 0x1ba   : > { %v645_v6 = vmax.f32 %v644_v5, 0.0 }
 0x1bc   : > { %v667_v7 = vadd.f32 1e-05, %v645_v6 }
 0x1be   : > { %901 = vrsqrt.f32 %v667_v7 }
 0x1c8   : > { %v902_v8 = vpop.eup %901 }
 0x1c9   : > { %671 = vperm.xlu1 %891, %v902_v8  }
 0x233   : > { %v657_v9 = vpop.permute.xlu1 %656 }
 0x234   : > { %v659_v10 = vsub.f32 %v1029_v19, %v657_v9  ;;  %v660_v11 = vsub.f32 %v1033_v21, %v657_v9  ;;  %v661_v12 = vsub.f32 %v1035_v22, %v657_v9  ;;  %v662_v13 = vsub.f32 %v1043_v27, %v657_v9 }
 0x235   : > { %v663_v14 = vsub.f32 %v542_v37, %v657_v9  ;;  %v664_v15 = vsub.f32 %v544_v40, %v657_v9  ;;  %v665_v0 = vsub.f32 %v583_v41, %v657_v9  ;;  %v666_v16 = vsub.f32 %v585_v44, %v657_v9 }
 0x248   : > { %v672_v17 = vpop.permute.xlu1 %671 }
 0x249   : > { %v674_v18 = vmul.f32 %v672_v17, %v659_v10  ;;  %v675_v20 = vmul.f32 %v672_v17, %v660_v11  ;;  %v676_v23 = vmul.f32 %v672_v17, %v661_v12  ;;  %v677_v24 = vmul.f32 %v672_v17, %v662_v13 }
 0x24a   : > { %v678_v25 = vmul.f32 %v672_v17, %v663_v14  ;;  %v679_v26 = vmul.f32 %v672_v17, %v664_v15  ;;  %v680_v28 = vmul.f32 %v672_v17, %v665_v0  ;;  %v681_v19 = vmul.f32 %v672_v17, %v666_v16 }
 0x24b   : > { %v682_v29 = vmax.f32 %v674_v18, 0.0  ;;  %v683_v21 = vmax.f32 %v675_v20, 0.0  ;;  %v684_v30 = vmax.f32 %v676_v23, 0.0  ;;  %v685_v22 = vmax.f32 %v677_v24, 0.0 }
 0x24c   : > { %v686_v27 = vmax.f32 %v678_v25, 0.0  ;;  %v687_v31 = vmax.f32 %v679_v26, 0.0  ;;  %v688_v32 = vmax.f32 %v680_v28, 0.0  ;;  %v689_v33 = vmax.f32 %v681_v19, 0.0 }
 0x24d   : > { %v860_v34 = vpack.c.bf16 %v683_v21, %v682_v29  ;;  %v861_v35 = vpack.c.bf16 %v685_v22, %v684_v30 }
 0x24e   : > { %v862_v36 = vpack.c.bf16 %v687_v31, %v686_v27  ;;  %v863_v37 = vpack.c.bf16 %v689_v33, %v688_v32 }
 0x24f   : > { %722 = vst [vmem:[%s171_s22] sm:$0xff] %v860_v34  ;;  %723 = vst [vmem:[%s171_s22 + $0x8] sm:$0xff] %v861_v35 }
 0x250   : > { %724 = vst [vmem:[%s171_s22 + $0x10] sm:$0xff] %v862_v36  ;;  %725 = vst [vmem:[%s171_s22 + $0x18] sm:$0xff] %v863_v37 }
 0x251 PF: > { %s12_s11 = sadd.s32 1, %s925_s11   ;;  %s1071_s9 = smov %s921_s10 }
 0x252   : > { %p9_p5 = scmp.ge.s32.totalorder %s12_s11, 4   ;;  %s1072_s10 = smov %s1074_s12 }
 0x254   :  { %11 = sbr.rel (!%p9_p5) target bundleno = 2 (0x2), region = 67 }

// kernel: feature_network_forward.15
= control target key start
LH: loop header
LB: loop body
LE: loop exit
PB: predicated region body
PF: predicated region fallthrough
CT: control target
= control target key end

     0   :  { %s737_s9 = smov 0   ;;  %s739_s10 = smov 0   ;;  %s839_s0 = inlined_call_operand.vmem [shape: bf16[16,200], index: 0, kind: input, shape index: {}]   ;;  %s840_s1 = inlined_call_operand.vmem [shape: bf16[2,200,256], index: 1, kind: input, shape index: {}]   ;;  %s841_s2 = inlined_call_operand.vmem [shape: bf16[2,16,256], index: 2, kind: output, shape index: {}]  }
   0x1   :  { %s741_s11 = smov 0  }
   0x2 LB: > { %s24_s12 = sadd.s32 1, %s714_s10  ;;  %p581_p0 = scmp.ge.s32.totalorder %s718_s11, 1  ;;  %s718_s11 = sphi %s741_s11, %s12_s11   ;;  %s714_s10 = sphi %s739_s10, %s843_s10   ;;  %s710_s9 = sphi %s737_s9, %s842_s9  }
   0x3   : > { %p26_p1 = scmp.ge.s32.totalorder %s24_s12, 2  ;;  %p131_p2 = scmp.lt.s32.totalorder %s718_s11, 3 }
   0x5   : > { %s845_s12 = smov (%p26_p1, %s24_s12), 0  ;;  %p132_p3 = pnand %p581_p0, %p131_p2 }
   0x6   : > { %p158_p4 = scmp.lt.s32.totalorder (!%p132_p3), %s710_s9, 1  ;;  %v691_v0 = vld [vmem:[%s839_s0 + $0x4] ss:$8 sps:$4 sm:$0xff] (!%p132_p3)   ;;  %vm343_vm0 = vcmask (!%p132_p3), 588800   ;;  %vm347_vm1 = vcmask (!%p132_p3), 1043456   ;;  %vm177_vm2 = vcmask (!%p132_p3), 7168  }
   0x7   : > { %135 = sbr.rel (%p132_p3) target bundleno = 598 (0x256), region = 28  ;;  %614 = vmatprep.mubr.msk.bf16.mxu0 (!%p132_p3), %vm343_vm0, %v691_v0  ;;  %v689_v29 = vld [vmem:[%s839_s0] ss:$8 sps:$4 sm:$0xff] (!%p132_p3)   ;;  %v720_v30 = vmov (!%p132_p3), 0.0   ;;  %v721_v43 = vmov (!%p132_p3), 0  }
   0x8   : > { %178 = vst.msk [vmem:[#allocation3] sm:$0xff] (!%p132_p3), %vm177_vm2, %v720_v30  ;;  %179 = vst.msk [vmem:[#allocation3 + $0x8] sm:$0xff] (!%p132_p3), %vm177_vm2, %v720_v30  ;;  %649 = vset.pattern.permute.xlu0 (!%p132_p3), %v721_v43  ;;  %650 = vset.pattern.permute.xlu1 (!%p132_p3), %v721_v43 }
   0x9   : > { %180 = vst.msk [vmem:[#allocation4] sm:$0xff] (!%p132_p3), %vm177_vm2, %v720_v30  ;;  %181 = vst.msk [vmem:[#allocation4 + $0x8] sm:$0xff] (!%p132_p3), %vm177_vm2, %v720_v30 }
   0xe   : > { %s847_s9 = smov (!%p158_p4, %s710_s9), 1 }
   0xf   : > { %s622_s15 = smul.u32 200, %s847_s9  ;;  %v406_v44 = vld [vmem:[#allocation3] sm:$0xff]  ;;  %v407_v49 = vld [vmem:[#allocation3 + $0x8] sm:$0xff]  ;;  %s619_s21 = sshll.u32 %s847_s9, 4 }
  0x10   : > { %v419_v46 = vld [vmem:[#allocation4] sm:$0xff]  ;;  %v420_v52 = vld [vmem:[#allocation4 + $0x8] sm:$0xff]  ;;  %s171_s24 = scalar_lea.vmem %s841_s2, %s619_s21 }
  0x11   : > { %s764_s18 = scalar_lea.vmem %s840_s1, %s622_s15 }
  0x12   : > { %v651_v1 = vld [vmem:[%s764_s18 + $0x4] ss:$8 sps:$4 sm:$0xff]   ;;  %v653_v2 = vld [vmem:[%s764_s18] ss:$8 sps:$4 sm:$0xff]   ;;  %v654_v3 = vld [vmem:[%s764_s18 + $0x14] ss:$8 sps:$4 sm:$0xff]  }
  0x13   : > { %354 = vmatprep.subr.bf16.mxu0 %v651_v1  ;;  %v656_v4 = vld [vmem:[%s764_s18 + $0x10] ss:$8 sps:$4 sm:$0xff]   ;;  %v657_v5 = vld [vmem:[%s764_s18 + $0x24] ss:$8 sps:$4 sm:$0xff]   ;;  %v659_v6 = vld [vmem:[%s764_s18 + $0x20] ss:$8 sps:$4 sm:$0xff]  }
  0x14   : > { %355 = vmatpush1.bf16.msra.mxu0 %v653_v2  ;;  %v660_v7 = vld [vmem:[%s764_s18 + $0x34] ss:$8 sps:$4 sm:$0xff]   ;;  %v662_v8 = vld [vmem:[%s764_s18 + $0x30] ss:$8 sps:$4 sm:$0xff]   ;;  %v663_v9 = vld [vmem:[%s764_s18 + $0x44] ss:$8 sps:$4 sm:$0xff]  }
  0x15   : > { %356 = vmatprep.subr.bf16.mxu0 %v654_v3  ;;  %v665_v10 = vld [vmem:[%s764_s18 + $0x40] ss:$8 sps:$4 sm:$0xff]   ;;  %v666_v11 = vld [vmem:[%s764_s18 + $0x54] ss:$8 sps:$4 sm:$0xff]   ;;  %v668_v12 = vld [vmem:[%s764_s18 + $0x50] ss:$8 sps:$4 sm:$0xff]  }
  0x16   : > { %v669_v13 = vld [vmem:[%s764_s18 + $0x64] ss:$8 sps:$4 sm:$0xff]   ;;  %v671_v14 = vld [vmem:[%s764_s18 + $0x60] ss:$8 sps:$4 sm:$0xff]   ;;  %v672_v15 = vld [vmem:[%s764_s18 + $0x74] ss:$8 sps:$4 sm:$0xff]  }
  0x17   : > { %v674_v16 = vld [vmem:[%s764_s18 + $0x70] ss:$8 sps:$4 sm:$0xff]   ;;  %v675_v17 = vld [vmem:[%s764_s18 + $0x84] ss:$8 sps:$4 sm:$0xff]   ;;  %v677_v18 = vld [vmem:[%s764_s18 + $0x80] ss:$8 sps:$4 sm:$0xff]  }
  0x18   : > { %357 = vmatpush1.bf16.msra.mxu0 %v656_v4  ;;  %v678_v19 = vld [vmem:[%s764_s18 + $0x94] ss:$8 sps:$4 sm:$0xff]   ;;  %v680_v20 = vld [vmem:[%s764_s18 + $0x90] ss:$8 sps:$4 sm:$0xff]   ;;  %v681_v21 = vld [vmem:[%s764_s18 + $0xa4] ss:$8 sps:$4 sm:$0xff]  }
  0x19   : > { %358 = vmatprep.subr.bf16.mxu0 %v657_v5  ;;  %v683_v22 = vld [vmem:[%s764_s18 + $0xa0] ss:$8 sps:$4 sm:$0xff]   ;;  %v684_v23 = vld [vmem:[%s764_s18 + $0xb4] ss:$8 sps:$4 sm:$0xff]   ;;  %v686_v25 = vld [vmem:[%s764_s18 + $0xb0] ss:$8 sps:$4 sm:$0xff]  }
  0x1a   : > { %v208_v24 = vld [vmem:[%s764_s18 + $0xc0] sm:$0xff] }
  0x1b   : > { %v612_v26 = vcombine.high %v208_v24, %v208_v24  ;;  %v611_v27 = vcombine.low %v208_v24, %v208_v24 }
  0x1c   : > { %359 = vmatpush1.bf16.msra.mxu0 %v659_v6 }
  0x1d   : > { %360 = vmatprep.subr.bf16.mxu0 %v660_v7  ;;  %v349_v28 = vsel %vm347_vm1, %v611_v27, 0 }
  0x20   : > { %361 = vmatpush1.bf16.msra.mxu0 %v662_v8 }
  0x21   : > { %362 = vmatprep.subr.bf16.mxu0 %v663_v9 }
  0x24   : > { %363 = vmatpush1.bf16.msra.mxu0 %v665_v10 }
  0x25   : > { %364 = vmatprep.subr.bf16.mxu0 %v666_v11 }
  0x28   : > { %365 = vmatpush1.bf16.msra.mxu0 %v668_v12 }
  0x29   : > { %366 = vmatprep.subr.bf16.mxu0 %v669_v13 }
  0x2c   : > { %367 = vmatpush1.bf16.msra.mxu0 %v671_v14 }
  0x2d   : > { %368 = vmatprep.subr.bf16.mxu0 %v672_v15 }
  0x30   : > { %369 = vmatpush1.bf16.msra.mxu0 %v674_v16 }
  0x31   : > { %370 = vmatprep.subr.bf16.mxu0 %v675_v17 }
  0x34   : > { %371 = vmatpush1.bf16.msra.mxu0 %v677_v18 }
  0x35   : > { %372 = vmatprep.subr.bf16.mxu0 %v678_v19 }
  0x38   : > { %373 = vmatpush1.bf16.msra.mxu0 %v680_v20 }
  0x39   : > { %374 = vmatprep.subr.bf16.mxu0 %v681_v21 }
  0x3c   : > { %375 = vmatpush1.bf16.msra.mxu0 %v683_v22 }
  0x3d   : > { %376 = vmatprep.subr.bf16.mxu0 %v684_v23 }
  0x40   : > { %377 = vmatpush1.bf16.msra.mxu0 %v686_v25 }
  0x41   : > { %613 = vmatprep.subr.msk.bf16.mxu0 %vm347_vm1, %v612_v26 }
  0x44   : > { %379 = vmatpush1.bf16.msra.mxu0 %v349_v28 }
  0x47   : > { %387 = vmatmul.mubr.bf16.vlgmr.msra.gmra.mrb[0].mxu0 %v689_v29 }
 0x11a   : > { %v798_v31 = vpop.f32.mrb[0].mxu0 }
 0x11b   : > { %v800_v32 = vpop.f32.mrb[1].mxu0  ;;  %v421_v33 = vmul.f32 %v798_v31, %v798_v31 }
 0x11c   : > { %v804_v34 = vpop.f32.mrb[2].mxu0  ;;  %v408_v35 = vadd.f32 %v800_v32, %v798_v31  ;;  %v422_v36 = vmul.f32 %v800_v32, %v800_v32 }
 0x11d   : > { %v810_v37 = vpop.f32.mrb[3].mxu0  ;;  %v423_v38 = vmul.f32 %v804_v34, %v804_v34 }
 0x11e   : > { %v424_v39 = vmul.f32 %v810_v37, %v810_v37  ;;  %409 = vadd.xlane.f32.xlu0 %v408_v35  ;;  %v425_v40 = vadd.f32 %v422_v36, %v421_v33  ;;  %v411_v41 = vadd.f32 %v810_v37, %v804_v34 }
 0x120   : > { %426 = vadd.xlane.f32.xlu1 %v425_v40  ;;  %v428_v42 = vadd.f32 %v424_v39, %v423_v38 }
 0x122   : > { %412 = vadd.xlane.f32.xlu0 %v411_v41 }
 0x124   : > { %429 = vadd.xlane.f32.xlu1 %v428_v42 }
 0x1ab   : > { %v410_v45 = vpop.xlane.xlu0 %409 }
 0x1ac   : > { %v414_v47 = vadd.f32 %v410_v45, %v406_v44 }
 0x1ad   : > { %v427_v48 = vpop.xlane.xlu1 %426 }
 0x1ae   : > { %417 = vst.msk [vmem:[#allocation3] sm:$0xff] %vm177_vm2, %v414_v47  ;;  %v431_v50 = vadd.f32 %v427_v48, %v419_v46 }
 0x1af   : > { %v413_v51 = vpop.xlane.xlu0 %412 }
 0x1b0   : > { %433 = vst.msk [vmem:[#allocation4] sm:$0xff] %vm177_vm2, %v431_v50  ;;  %v415_v53 = vadd.f32 %v413_v51, %v407_v49 }
 0x1b1   : > { %v430_v54 = vpop.xlane.xlu1 %429 }
 0x1b2   : > { %418 = vst.msk [vmem:[#allocation3 + $0x8] sm:$0xff] %vm177_vm2, %v415_v53  ;;  %v432_v55 = vadd.f32 %v430_v54, %v420_v52 }
 0x1b4   : > { %434 = vst.msk [vmem:[#allocation4 + $0x8] sm:$0xff] %vm177_vm2, %v432_v55 }
 0x1b5   : > { %v438_v56 = vld [vmem:[#allocation3] sm:$0xff] }
 0x1b6   : > { %v440_v57 = vmul.f32 0.00390625, %v438_v56 }
 0x1b7   : > { %v442_v58 = vld [vmem:[#allocation4] sm:$0xff] }
 0x1b8   : > { %v444_v59 = vmul.f32 0.00390625, %v442_v58  ;;  %v446_v60 = vmul.f32 %v440_v57, %v440_v57  ;;  %458 = vperm.xlu0 %649, %v440_v57  }
 0x1b9   : > { %v439_v61 = vld [vmem:[#allocation3 + $0x8] sm:$0xff] }
 0x1ba   : > { %v448_v62 = vsub.f32 %v444_v59, %v446_v60  ;;  %v441_v63 = vmul.f32 0.00390625, %v439_v61 }
 0x1bb   : > { %v443_v0 = vld [vmem:[#allocation4 + $0x8] sm:$0xff] }
 0x1bc   : > { %v450_v1 = vmax.f32 %v448_v62, 0.0  ;;  %v445_v2 = vmul.f32 0.00390625, %v443_v0  ;;  %463 = vperm.xlu1 %650, %v441_v63   ;;  %v447_v3 = vmul.f32 %v441_v63, %v441_v63 }
 0x1be   : > { %v470_v4 = vadd.f32 1e-05, %v450_v1  ;;  %v449_v5 = vsub.f32 %v445_v2, %v447_v3 }
 0x1c0   : > { %692 = vrsqrt.f32 %v470_v4  ;;  %v451_v6 = vmax.f32 %v449_v5, 0.0 }
 0x1c2   : > { %v471_v7 = vadd.f32 1e-05, %v451_v6 }
 0x1c4   : > { %694 = vrsqrt.f32 %v471_v7 }
 0x1ca   : > { %v693_v8 = vpop.eup %692 }
 0x1cb   : > { %476 = vperm.xlu1 %650, %v693_v8  }
 0x1ce   : > { %v695_v9 = vpop.eup %694 }
 0x1cf   : > { %481 = vperm.xlu1 %650, %v695_v9  }
 0x237   : > { %v459_v10 = vpop.permute.xlu0 %458 }
 0x238   : > { %v466_v12 = vsub.f32 %v798_v31, %v459_v10  ;;  %v467_v13 = vsub.f32 %v800_v32, %v459_v10 }
 0x23b   : > { %v464_v11 = vpop.permute.xlu1 %463 }
 0x23c   : > { %v468_v17 = vsub.f32 %v804_v34, %v464_v11  ;;  %v469_v18 = vsub.f32 %v810_v37, %v464_v11 }
 0x24a   : > { %v477_v14 = vpop.permute.xlu1 %476 }
 0x24b   : > { %v484_v15 = vmul.f32 %v477_v14, %v466_v12  ;;  %v485_v16 = vmul.f32 %v477_v14, %v467_v13 }
 0x24d   : > { %v488_v19 = vmax.f32 %v484_v15, 0.0  ;;  %v489_v20 = vmax.f32 %v485_v16, 0.0 }
 0x24e   : > { %v482_v21 = vpop.permute.xlu1 %481 }
 0x24f   : > { %v620_v22 = vpack.c.bf16 %v489_v20, %v488_v19  ;;  %v486_v23 = vmul.f32 %v482_v21, %v468_v17  ;;  %v487_v24 = vmul.f32 %v482_v21, %v469_v18 }
 0x251   : > { %v490_v25 = vmax.f32 %v486_v23, 0.0  ;;  %v491_v26 = vmax.f32 %v487_v24, 0.0  ;;  %504 = vst [vmem:[%s171_s24] sm:$0xff] %v620_v22 }
 0x253   : > { %v621_v27 = vpack.c.bf16 %v491_v26, %v490_v25 }
 0x255   : > { %505 = vst [vmem:[%s171_s24 + $0x8] sm:$0xff] %v621_v27 }
 0x256 PF: > { %s12_s11 = sadd.s32 1, %s718_s11   ;;  %s842_s9 = smov %s714_s10 }
 0x257   : > { %p9_p5 = scmp.ge.s32.totalorder %s12_s11, 4   ;;  %s843_s10 = smov %s845_s12 }
 0x259   :  { %11 = sbr.rel (!%p9_p5) target bundleno = 2 (0x2), region = 67 }

// kernel: feature_network_forward.16
= control target key start
LH: loop header
LB: loop body
LE: loop exit
PB: predicated region body
PF: predicated region fallthrough
CT: control target
= control target key end

     0   :  { %s668_s9 = smov 0   ;;  %s670_s10 = smov 0   ;;  %s763_s0 = inlined_call_operand.vmem [shape: bf16[16,144], index: 0, kind: input, shape index: {}]   ;;  %s764_s1 = inlined_call_operand.vmem [shape: bf16[2,144,256], index: 1, kind: input, shape index: {}]   ;;  %s765_s2 = inlined_call_operand.vmem [shape: bf16[2,16,256], index: 2, kind: output, shape index: {}]  }
   0x1   :  { %s672_s11 = smov 0  }
   0x2 LB: > { %s24_s12 = sadd.s32 1, %s645_s10  ;;  %p532_p0 = scmp.ge.s32.totalorder %s649_s11, 1  ;;  %s649_s11 = sphi %s672_s11, %s12_s11   ;;  %s645_s10 = sphi %s670_s10, %s767_s10   ;;  %s641_s9 = sphi %s668_s9, %s766_s9  }
   0x3   : > { %p26_p1 = scmp.ge.s32.totalorder %s24_s12, 2  ;;  %p131_p2 = scmp.lt.s32.totalorder %s649_s11, 3 }
   0x5   : > { %s769_s12 = smov (%p26_p1, %s24_s12), 0  ;;  %p132_p3 = pnand %p532_p0, %p131_p2 }
   0x6   : > { %p158_p4 = scmp.lt.s32.totalorder (!%p132_p3), %s641_s9, 1  ;;  %vm301_vm0 = vcmask (!%p132_p3), 130048   ;;  %v622_v0 = vld [vmem:[%s763_s0 + $0x4] ss:$8 sps:$4 sm:$0xff] (!%p132_p3)   ;;  %v620_v19 = vld [vmem:[%s763_s0] ss:$8 sps:$4 sm:$0xff] (!%p132_p3)  }
   0x7   : > { %135 = sbr.rel (%p132_p3) target bundleno = 582 (0x246), region = 28  ;;  %556 = vmatprep.mubr.msk.bf16.mxu0 (!%p132_p3), %vm301_vm0, %v622_v0  ;;  %vm177_vm1 = vcmask (!%p132_p3), 7168   ;;  %v651_v20 = vmov (!%p132_p3), 0.0   ;;  %v652_v33 = vmov (!%p132_p3), 0  }
   0x8   : > { %178 = vst.msk [vmem:[#allocation3] sm:$0xff] (!%p132_p3), %vm177_vm1, %v651_v20  ;;  %179 = vst.msk [vmem:[#allocation3 + $0x8] sm:$0xff] (!%p132_p3), %vm177_vm1, %v651_v20  ;;  %591 = vset.pattern.permute.xlu0 (!%p132_p3), %v652_v33  ;;  %592 = vset.pattern.permute.xlu1 (!%p132_p3), %v652_v33 }
   0x9   : > { %180 = vst.msk [vmem:[#allocation4] sm:$0xff] (!%p132_p3), %vm177_vm1, %v651_v20  ;;  %181 = vst.msk [vmem:[#allocation4 + $0x8] sm:$0xff] (!%p132_p3), %vm177_vm1, %v651_v20 }
   0xe   : > { %s771_s9 = smov (!%p158_p4, %s641_s9), 1 }
   0xf   : > { %s564_s15 = smul.u32 144, %s771_s9  ;;  %v357_v34 = vld [vmem:[#allocation3] sm:$0xff]  ;;  %v358_v39 = vld [vmem:[#allocation3 + $0x8] sm:$0xff]  ;;  %s561_s21 = sshll.u32 %s771_s9, 4 }
  0x10   : > { %v370_v36 = vld [vmem:[#allocation4] sm:$0xff]  ;;  %v371_v42 = vld [vmem:[#allocation4 + $0x8] sm:$0xff]  ;;  %s171_s24 = scalar_lea.vmem %s765_s2, %s561_s21 }
  0x11   : > { %s695_s18 = scalar_lea.vmem %s764_s1, %s564_s15 }
  0x12   : > { %v593_v1 = vld [vmem:[%s695_s18 + $0x4] ss:$8 sps:$4 sm:$0xff]   ;;  %v595_v2 = vld [vmem:[%s695_s18] ss:$8 sps:$4 sm:$0xff]   ;;  %v596_v3 = vld [vmem:[%s695_s18 + $0x14] ss:$8 sps:$4 sm:$0xff]  }
  0x13   : > { %305 = vmatprep.subr.bf16.mxu0 %v593_v1  ;;  %v598_v4 = vld [vmem:[%s695_s18 + $0x10] ss:$8 sps:$4 sm:$0xff]   ;;  %v599_v5 = vld [vmem:[%s695_s18 + $0x24] ss:$8 sps:$4 sm:$0xff]   ;;  %v601_v6 = vld [vmem:[%s695_s18 + $0x20] ss:$8 sps:$4 sm:$0xff]  }
  0x14   : > { %306 = vmatpush1.bf16.msra.mxu0 %v595_v2  ;;  %v602_v7 = vld [vmem:[%s695_s18 + $0x34] ss:$8 sps:$4 sm:$0xff]   ;;  %v604_v8 = vld [vmem:[%s695_s18 + $0x30] ss:$8 sps:$4 sm:$0xff]   ;;  %v605_v9 = vld [vmem:[%s695_s18 + $0x44] ss:$8 sps:$4 sm:$0xff]  }
  0x15   : > { %307 = vmatprep.subr.bf16.mxu0 %v596_v3  ;;  %v607_v10 = vld [vmem:[%s695_s18 + $0x40] ss:$8 sps:$4 sm:$0xff]   ;;  %v608_v11 = vld [vmem:[%s695_s18 + $0x54] ss:$8 sps:$4 sm:$0xff]   ;;  %v610_v12 = vld [vmem:[%s695_s18 + $0x50] ss:$8 sps:$4 sm:$0xff]  }
  0x16   : > { %v611_v13 = vld [vmem:[%s695_s18 + $0x64] ss:$8 sps:$4 sm:$0xff]   ;;  %v613_v14 = vld [vmem:[%s695_s18 + $0x60] ss:$8 sps:$4 sm:$0xff]   ;;  %v614_v15 = vld [vmem:[%s695_s18 + $0x74] ss:$8 sps:$4 sm:$0xff]  }
  0x17   : > { %v616_v16 = vld [vmem:[%s695_s18 + $0x70] ss:$8 sps:$4 sm:$0xff]   ;;  %v617_v17 = vld [vmem:[%s695_s18 + $0x84] ss:$8 sps:$4 sm:$0xff]   ;;  %v619_v18 = vld [vmem:[%s695_s18 + $0x80] ss:$8 sps:$4 sm:$0xff]  }
  0x18   : > { %308 = vmatpush1.bf16.msra.mxu0 %v598_v4 }
  0x19   : > { %309 = vmatprep.subr.bf16.mxu0 %v599_v5 }
  0x1c   : > { %310 = vmatpush1.bf16.msra.mxu0 %v601_v6 }
  0x1d   : > { %311 = vmatprep.subr.bf16.mxu0 %v602_v7 }
  0x20   : > { %312 = vmatpush1.bf16.msra.mxu0 %v604_v8 }
  0x21   : > { %313 = vmatprep.subr.bf16.mxu0 %v605_v9 }
  0x24   : > { %314 = vmatpush1.bf16.msra.mxu0 %v607_v10 }
  0x25   : > { %315 = vmatprep.subr.bf16.mxu0 %v608_v11 }
  0x28   : > { %316 = vmatpush1.bf16.msra.mxu0 %v610_v12 }
  0x29   : > { %317 = vmatprep.subr.bf16.mxu0 %v611_v13 }
  0x2c   : > { %318 = vmatpush1.bf16.msra.mxu0 %v613_v14 }
  0x2d   : > { %319 = vmatprep.subr.bf16.mxu0 %v614_v15 }
  0x30   : > { %320 = vmatpush1.bf16.msra.mxu0 %v616_v16 }
  0x31   : > { %321 = vmatprep.subr.bf16.mxu0 %v617_v17 }
  0x34   : > { %322 = vmatpush1.bf16.msra.mxu0 %v619_v18 }
  0x37   : > { %338 = vmatmul.mubr.bf16.vlgmr.msra.gmra.mrb[0].mxu0 %v620_v19 }
 0x10a   : > { %v722_v21 = vpop.f32.mrb[0].mxu0 }
 0x10b   : > { %v724_v22 = vpop.f32.mrb[1].mxu0  ;;  %v372_v23 = vmul.f32 %v722_v21, %v722_v21 }
 0x10c   : > { %v728_v24 = vpop.f32.mrb[2].mxu0  ;;  %v359_v25 = vadd.f32 %v724_v22, %v722_v21  ;;  %v373_v26 = vmul.f32 %v724_v22, %v724_v22 }
 0x10d   : > { %v734_v27 = vpop.f32.mrb[3].mxu0  ;;  %v374_v28 = vmul.f32 %v728_v24, %v728_v24 }
 0x10e   : > { %v375_v29 = vmul.f32 %v734_v27, %v734_v27  ;;  %360 = vadd.xlane.f32.xlu0 %v359_v25  ;;  %v376_v30 = vadd.f32 %v373_v26, %v372_v23  ;;  %v362_v31 = vadd.f32 %v734_v27, %v728_v24 }
 0x110   : > { %377 = vadd.xlane.f32.xlu1 %v376_v30  ;;  %v379_v32 = vadd.f32 %v375_v29, %v374_v28 }
 0x112   : > { %363 = vadd.xlane.f32.xlu0 %v362_v31 }
 0x114   : > { %380 = vadd.xlane.f32.xlu1 %v379_v32 }
 0x19b   : > { %v361_v35 = vpop.xlane.xlu0 %360 }
 0x19c   : > { %v365_v37 = vadd.f32 %v361_v35, %v357_v34 }
 0x19d   : > { %v378_v38 = vpop.xlane.xlu1 %377 }
 0x19e   : > { %368 = vst.msk [vmem:[#allocation3] sm:$0xff] %vm177_vm1, %v365_v37  ;;  %v382_v40 = vadd.f32 %v378_v38, %v370_v36 }
 0x19f   : > { %v364_v41 = vpop.xlane.xlu0 %363 }
 0x1a0   : > { %384 = vst.msk [vmem:[#allocation4] sm:$0xff] %vm177_vm1, %v382_v40  ;;  %v366_v43 = vadd.f32 %v364_v41, %v358_v39 }
 0x1a1   : > { %v381_v44 = vpop.xlane.xlu1 %380 }
 0x1a2   : > { %369 = vst.msk [vmem:[#allocation3 + $0x8] sm:$0xff] %vm177_vm1, %v366_v43  ;;  %v383_v45 = vadd.f32 %v381_v44, %v371_v42 }
 0x1a4   : > { %385 = vst.msk [vmem:[#allocation4 + $0x8] sm:$0xff] %vm177_vm1, %v383_v45 }
 0x1a5   : > { %v389_v46 = vld [vmem:[#allocation3] sm:$0xff] }
 0x1a6   : > { %v391_v47 = vmul.f32 0.00390625, %v389_v46 }
 0x1a7   : > { %v393_v48 = vld [vmem:[#allocation4] sm:$0xff] }
 0x1a8   : > { %v395_v49 = vmul.f32 0.00390625, %v393_v48  ;;  %v397_v50 = vmul.f32 %v391_v47, %v391_v47  ;;  %409 = vperm.xlu0 %591, %v391_v47  }
 0x1a9   : > { %v390_v51 = vld [vmem:[#allocation3 + $0x8] sm:$0xff] }
 0x1aa   : > { %v399_v52 = vsub.f32 %v395_v49, %v397_v50  ;;  %v392_v53 = vmul.f32 0.00390625, %v390_v51 }
 0x1ab   : > { %v394_v54 = vld [vmem:[#allocation4 + $0x8] sm:$0xff] }
 0x1ac   : > { %v401_v55 = vmax.f32 %v399_v52, 0.0  ;;  %v396_v56 = vmul.f32 0.00390625, %v394_v54  ;;  %414 = vperm.xlu1 %592, %v392_v53   ;;  %v398_v57 = vmul.f32 %v392_v53, %v392_v53 }
 0x1ae   : > { %v421_v58 = vadd.f32 1e-05, %v401_v55  ;;  %v400_v59 = vsub.f32 %v396_v56, %v398_v57 }
 0x1b0   : > { %623 = vrsqrt.f32 %v421_v58  ;;  %v402_v60 = vmax.f32 %v400_v59, 0.0 }
 0x1b2   : > { %v422_v61 = vadd.f32 1e-05, %v402_v60 }
 0x1b4   : > { %625 = vrsqrt.f32 %v422_v61 }
 0x1ba   : > { %v624_v62 = vpop.eup %623 }
 0x1bb   : > { %427 = vperm.xlu1 %592, %v624_v62  }
 0x1be   : > { %v626_v63 = vpop.eup %625 }
 0x1bf   : > { %432 = vperm.xlu1 %592, %v626_v63  }
 0x227   : > { %v410_v0 = vpop.permute.xlu0 %409 }
 0x228   : > { %v417_v2 = vsub.f32 %v722_v21, %v410_v0  ;;  %v418_v3 = vsub.f32 %v724_v22, %v410_v0 }
 0x22b   : > { %v415_v1 = vpop.permute.xlu1 %414 }
 0x22c   : > { %v419_v7 = vsub.f32 %v728_v24, %v415_v1  ;;  %v420_v8 = vsub.f32 %v734_v27, %v415_v1 }
 0x23a   : > { %v428_v4 = vpop.permute.xlu1 %427 }
 0x23b   : > { %v435_v5 = vmul.f32 %v428_v4, %v417_v2  ;;  %v436_v6 = vmul.f32 %v428_v4, %v418_v3 }
 0x23d   : > { %v439_v9 = vmax.f32 %v435_v5, 0.0  ;;  %v440_v10 = vmax.f32 %v436_v6, 0.0 }
 0x23e   : > { %v433_v11 = vpop.permute.xlu1 %432 }
 0x23f   : > { %v562_v12 = vpack.c.bf16 %v440_v10, %v439_v9  ;;  %v437_v13 = vmul.f32 %v433_v11, %v419_v7  ;;  %v438_v14 = vmul.f32 %v433_v11, %v420_v8 }
 0x241   : > { %v441_v15 = vmax.f32 %v437_v13, 0.0  ;;  %v442_v16 = vmax.f32 %v438_v14, 0.0  ;;  %455 = vst [vmem:[%s171_s24] sm:$0xff] %v562_v12 }
 0x243   : > { %v563_v17 = vpack.c.bf16 %v442_v16, %v441_v15 }
 0x245   : > { %456 = vst [vmem:[%s171_s24 + $0x8] sm:$0xff] %v563_v17 }
 0x246 PF: > { %s12_s11 = sadd.s32 1, %s649_s11   ;;  %s766_s9 = smov %s645_s10 }
 0x247   : > { %p9_p5 = scmp.ge.s32.totalorder %s12_s11, 4   ;;  %s767_s10 = smov %s769_s12 }
 0x249   :  { %11 = sbr.rel (!%p9_p5) target bundleno = 2 (0x2), region = 67 }

// kernel: feature_network_forward.24
= control target key start
LH: loop header
LB: loop body
LE: loop exit
PB: predicated region body
PF: predicated region fallthrough
CT: control target
= control target key end

     0   :  { %s918_s9 = smov 0   ;;  %s920_s10 = smov 0   ;;  %s1063_s0 = inlined_call_operand.vmem [shape: bf16[32,72], index: 0, kind: input, shape index: {}]   ;;  %s1064_s1 = inlined_call_operand.vmem [shape: bf16[2,72,1024], index: 1, kind: input, shape index: {}]   ;;  %s1065_s2 = inlined_call_operand.vmem [shape: f32[2,32,1024], index: 2, kind: output, shape index: {}]  }
   0x1   :  { %s922_s11 = smov 0  }
   0x2 LB: > { %s24_s12 = sadd.s32 1, %s896_s10  ;;  %p781_p0 = scmp.ge.s32.totalorder %s900_s11, 1  ;;  %s900_s11 = sphi %s922_s11, %s12_s11   ;;  %s896_s10 = sphi %s920_s10, %s1067_s10   ;;  %s892_s9 = sphi %s918_s9, %s1066_s9  }
   0x3   : > { %p26_p1 = scmp.ge.s32.totalorder %s24_s12, 2  ;;  %p133_p2 = scmp.lt.s32.totalorder %s900_s11, 3 }
   0x5   : > { %s1069_s12 = smov (%p26_p1, %s24_s12), 0  ;;  %p134_p3 = pnand %p781_p0, %p133_p2 }
   0x6   : > { %p164_p4 = scmp.lt.s32.totalorder (!%p134_p3), %s892_s9, 1  ;;  %v902_v0 = vmov (!%p134_p3), 0   ;;  %vm421_vm0 = vcmask (!%p134_p3), 1043456   ;;  %v977_v49 = vld [vmem:[%s1063_s0] sm:$0xff] (!%p134_p3)   ;;  %vm414_vm1 = vcmask (!%p134_p3), 588800  }
   0x7   : > { %137 = sbr.rel (%p134_p3) target bundleno = 286 (0x11e), region = 28  ;;  %478 = vmatprep.mubr.bf16.mxu0 (!%p134_p3), %v902_v0  ;;  %531 = vmatprep.mubr.bf16.mxu1 (!%p134_p3), %v902_v0 }
   0xe   : > { %s1071_s9 = smov (!%p164_p4, %s892_s9), 1 }
   0xf   : > { %s842_s13 = smul.u32 288, %s1071_s9  ;;  %s841_s21 = sshll.u32 %s1071_s9, 8 }
  0x10   : > { %s1020_s24 = scalar_lea.vmem %s1065_s2, %s841_s21 }
  0x11   : > { %s944_s16 = scalar_lea.vmem %s1064_s1, %s842_s13 }
  0x12   : > { %v188_v1 = vld [vmem:[%s944_s16] sm:$0xff]  ;;  %v189_v3 = vld [vmem:[%s944_s16 + $0x8] sm:$0xff]  ;;  %v190_v39 = vld [vmem:[%s944_s16 + $0x10] sm:$0xff] }
  0x13   : > { %v192_v2 = vld [vmem:[%s944_s16 + $0x20] sm:$0xff]  ;;  %v193_v5 = vld [vmem:[%s944_s16 + $0x28] sm:$0xff]  ;;  %v194_v40 = vld [vmem:[%s944_s16 + $0x30] sm:$0xff] }
  0x14   : > { %v788_v4 = vcombine.high %v188_v1, %v192_v2  ;;  %v787_v6 = vcombine.low %v188_v1, %v192_v2  ;;  %v196_v7 = vld [vmem:[%s944_s16 + $0x40] sm:$0xff]  ;;  %v790_v9 = vcombine.high %v189_v3, %v193_v5  ;;  %v789_v10 = vcombine.low %v189_v3, %v193_v5  ;;  %v197_v12 = vld [vmem:[%s944_s16 + $0x48] sm:$0xff]  ;;  %v191_v41 = vld [vmem:[%s944_s16 + $0x18] sm:$0xff] }
  0x15   : > { %v200_v8 = vld [vmem:[%s944_s16 + $0x60] sm:$0xff]  ;;  %v201_v13 = vld [vmem:[%s944_s16 + $0x68] sm:$0xff]  ;;  %v195_v42 = vld [vmem:[%s944_s16 + $0x38] sm:$0xff]  ;;  %v792_v44 = vcombine.high %v190_v39, %v194_v40  ;;  %v791_v52 = vcombine.low %v190_v39, %v194_v40 }
  0x16   : > { %v796_v11 = vcombine.high %v196_v7, %v200_v8  ;;  %v204_v14 = vld [vmem:[%s944_s16 + $0x80] sm:$0xff]  ;;  %446 = vmatprep.subr.bf16.mxu0 %v788_v4  ;;  %v798_v15 = vcombine.high %v197_v12, %v201_v13  ;;  %v205_v17 = vld [vmem:[%s944_s16 + $0x88] sm:$0xff]  ;;  %499 = vmatprep.subr.bf16.mxu1 %v790_v9  ;;  %v795_v19 = vcombine.low %v196_v7, %v200_v8  ;;  %v198_v47 = vld [vmem:[%s944_s16 + $0x50] sm:$0xff] }
  0x17   : > { %v208_v16 = vld [vmem:[%s944_s16 + $0xa0] sm:$0xff]  ;;  %v209_v18 = vld [vmem:[%s944_s16 + $0xa8] sm:$0xff]  ;;  %447 = vmatpush1.bf16.msra.mxu0 %v787_v6  ;;  %500 = vmatpush1.bf16.msra.mxu1 %v789_v10  ;;  %v797_v20 = vcombine.low %v197_v12, %v201_v13  ;;  %v794_v46 = vcombine.high %v191_v41, %v195_v42  ;;  %v202_v48 = vld [vmem:[%s944_s16 + $0x70] sm:$0xff]  ;;  %v793_v53 = vcombine.low %v191_v41, %v195_v42 }
  0x18   : > { %448 = vmatprep.subr.bf16.mxu0 %v796_v11  ;;  %v804_v21 = vcombine.high %v204_v14, %v208_v16  ;;  %501 = vmatprep.subr.bf16.mxu1 %v798_v15  ;;  %v806_v22 = vcombine.high %v205_v17, %v209_v18  ;;  %v212_v23 = vld [vmem:[%s944_s16 + $0xc0] sm:$0xff]  ;;  %v213_v25 = vld [vmem:[%s944_s16 + $0xc8] sm:$0xff]  ;;  %v803_v27 = vcombine.low %v204_v14, %v208_v16  ;;  %v199_v50 = vld [vmem:[%s944_s16 + $0x58] sm:$0xff] }
  0x19   : > { %v216_v24 = vld [vmem:[%s944_s16 + $0xe0] sm:$0xff]  ;;  %v217_v26 = vld [vmem:[%s944_s16 + $0xe8] sm:$0xff]  ;;  %v805_v28 = vcombine.low %v205_v17, %v209_v18  ;;  %v203_v51 = vld [vmem:[%s944_s16 + $0x78] sm:$0xff]  ;;  %v800_v54 = vcombine.high %v198_v47, %v202_v48  ;;  %v799_v60 = vcombine.low %v198_v47, %v202_v48 }
  0x1a   : > { %v812_v29 = vcombine.high %v212_v23, %v216_v24  ;;  %v814_v30 = vcombine.high %v213_v25, %v217_v26  ;;  %v220_v31 = vld [vmem:[%s944_s16 + $0x100] sm:$0xff]  ;;  %v221_v32 = vld [vmem:[%s944_s16 + $0x108] sm:$0xff]  ;;  %v811_v33 = vcombine.low %v212_v23, %v216_v24  ;;  %v813_v34 = vcombine.low %v213_v25, %v217_v26  ;;  %v206_v56 = vld [vmem:[%s944_s16 + $0x90] sm:$0xff] }
  0x1b   : > { %449 = vmatpush1.bf16.msra.mxu0 %v795_v19  ;;  %502 = vmatpush1.bf16.msra.mxu1 %v797_v20  ;;  %v820_v35 = vcombine.high %v220_v31, %v220_v31  ;;  %v819_v36 = vcombine.low %v220_v31, %v220_v31  ;;  %v822_v37 = vcombine.high %v221_v32, %v221_v32  ;;  %v210_v57 = vld [vmem:[%s944_s16 + $0xb0] sm:$0xff]  ;;  %v207_v58 = vld [vmem:[%s944_s16 + $0x98] sm:$0xff]  ;;  %v873_v3 = vld [vmem:[%s1063_s0 + $0x8] sm:$0xff]  }
  0x1c   : > { %450 = vmatprep.subr.bf16.mxu0 %v804_v21  ;;  %503 = vmatprep.subr.bf16.mxu1 %v806_v22  ;;  %v821_v38 = vcombine.low %v221_v32, %v221_v32  ;;  %v802_v55 = vcombine.high %v199_v50, %v203_v51  ;;  %v211_v59 = vld [vmem:[%s944_s16 + $0xb8] sm:$0xff]  ;;  %v801_v61 = vcombine.low %v199_v50, %v203_v51  ;;  %v214_v1 = vld [vmem:[%s944_s16 + $0xd0] sm:$0xff] }
  0x1d   : > { %v423_v43 = vsel %vm421_vm0, %v819_v36, 0  ;;  %v808_v62 = vcombine.high %v206_v56, %v210_v57  ;;  %v810_v63 = vcombine.high %v207_v58, %v211_v59  ;;  %v218_v2 = vld [vmem:[%s944_s16 + $0xf0] sm:$0xff]  ;;  %v215_v4 = vld [vmem:[%s944_s16 + $0xd8] sm:$0xff]  ;;  %v807_v6 = vcombine.low %v206_v56, %v210_v57 }
  0x1e   : > { %v429_v45 = vsel %vm421_vm0, %v821_v38, 0  ;;  %v219_v5 = vld [vmem:[%s944_s16 + $0xf8] sm:$0xff]  ;;  %v809_v7 = vcombine.low %v207_v58, %v211_v59  ;;  %v816_v8 = vcombine.high %v214_v1, %v218_v2  ;;  %v222_v10 = vld [vmem:[%s944_s16 + $0x110] sm:$0xff]  ;;  %v815_v12 = vcombine.low %v214_v1, %v218_v2 }
  0x1f   : > { %451 = vmatpush1.bf16.msra.mxu0 %v803_v27  ;;  %504 = vmatpush1.bf16.msra.mxu1 %v805_v28  ;;  %v818_v9 = vcombine.high %v215_v4, %v219_v5  ;;  %v223_v11 = vld [vmem:[%s944_s16 + $0x118] sm:$0xff]  ;;  %v817_v13 = vcombine.low %v215_v4, %v219_v5  ;;  %v824_v14 = vcombine.high %v222_v10, %v222_v10 }
  0x20   : > { %452 = vmatprep.subr.bf16.mxu0 %v812_v29  ;;  %505 = vmatprep.subr.bf16.mxu1 %v814_v30  ;;  %v823_v15 = vcombine.low %v222_v10, %v222_v10  ;;  %v826_v16 = vcombine.high %v223_v11, %v223_v11  ;;  %v825_v17 = vcombine.low %v223_v11, %v223_v11 }
  0x22   : > { %v435_v18 = vsel %vm421_vm0, %v823_v15, 0  ;;  %v441_v19 = vsel %vm421_vm0, %v825_v17, 0 }
  0x23   : > { %453 = vmatpush1.bf16.msra.mxu0 %v811_v33  ;;  %506 = vmatpush1.bf16.msra.mxu1 %v813_v34 }
  0x24   : > { %827 = vmatprep.subr.msk.bf16.mxu0 %vm421_vm0, %v820_v35  ;;  %830 = vmatprep.subr.msk.bf16.mxu1 %vm421_vm0, %v822_v37 }
  0x27   : > { %455 = vmatpush1.bf16.msra.mxu0 %v423_v43  ;;  %508 = vmatpush1.bf16.msra.mxu1 %v429_v45 }
  0x28   : > { %552 = vmatprep.subr.bf16.mxu0 %v792_v44  ;;  %605 = vmatprep.subr.bf16.mxu1 %v794_v46 }
  0x2a   : > { %828 = vmatmul.mubr.msk.bf16.vlgmr.msra.gmra.mrb[0].mxu0 %vm414_vm1, %v977_v49  ;;  %831 = vmatmul.mubr.msk.bf16.vlgmr.msra.gmra.mrb[0].mxu1 %vm414_vm1, %v977_v49 }
  0x2b   : > { %553 = vmatpush1.bf16.msra.mxu0 %v791_v52  ;;  %606 = vmatpush1.bf16.msra.mxu1 %v793_v53 }
  0x2c   : > { %554 = vmatprep.subr.bf16.mxu0 %v800_v54  ;;  %607 = vmatprep.subr.bf16.mxu1 %v802_v55 }
  0x2d   : > { %488 = vmatprep.mubr.bf16.mxu0 %v902_v0  ;;  %541 = vmatprep.mubr.bf16.mxu1 %v902_v0 }
  0x2f   : > { %555 = vmatpush1.bf16.msra.mxu0 %v799_v60  ;;  %608 = vmatpush1.bf16.msra.mxu1 %v801_v61 }
  0x30   : > { %556 = vmatprep.subr.bf16.mxu0 %v808_v62  ;;  %609 = vmatprep.subr.bf16.mxu1 %v810_v63 }
  0x32   : > { %829 = vmatmul.mubr.msk.bf16.gmra.mrb[4].mxu0 %vm414_vm1, %v873_v3  ;;  %832 = vmatmul.mubr.msk.bf16.gmra.mrb[4].mxu1 %vm414_vm1, %v873_v3 }
  0x33   : > { %557 = vmatpush1.bf16.msra.mxu0 %v807_v6  ;;  %610 = vmatpush1.bf16.msra.mxu1 %v809_v7 }
  0x34   : > { %558 = vmatprep.subr.bf16.mxu0 %v816_v8  ;;  %611 = vmatprep.subr.bf16.mxu1 %v818_v9 }
  0x35   : > { %584 = vmatprep.mubr.bf16.mxu0 %v902_v0  ;;  %637 = vmatprep.mubr.bf16.mxu1 %v902_v0 }
  0x37   : > { %559 = vmatpush1.bf16.msra.mxu0 %v815_v12  ;;  %612 = vmatpush1.bf16.msra.mxu1 %v817_v13 }
  0x38   : > { %833 = vmatprep.subr.msk.bf16.mxu0 %vm421_vm0, %v824_v14  ;;  %836 = vmatprep.subr.msk.bf16.mxu1 %vm421_vm0, %v826_v16 }
  0x3b   : > { %561 = vmatpush1.bf16.msra.mxu0 %v435_v18  ;;  %614 = vmatpush1.bf16.msra.mxu1 %v441_v19 }
  0x3e   : > { %834 = vmatmul.mubr.msk.bf16.vlgmr.msra.gmra.mrb[8].mxu0 %vm414_vm1, %v977_v49  ;;  %837 = vmatmul.mubr.msk.bf16.vlgmr.msra.gmra.mrb[8].mxu1 %vm414_vm1, %v977_v49 }
  0x3f   : > { %594 = vmatprep.mubr.bf16.mxu0 %v902_v0  ;;  %647 = vmatprep.mubr.bf16.mxu1 %v902_v0 }
  0x46   : > { %835 = vmatmul.mubr.msk.bf16.gmra.mrb[12].mxu0 %vm414_vm1, %v873_v3  ;;  %838 = vmatmul.mubr.msk.bf16.gmra.mrb[12].mxu1 %vm414_vm1, %v873_v3 }
  0xfd   : > { %v480_v20 = vpop.f32.mrb[0].mxu0  ;;  %v533_v0 = vpop.f32.mrb[0].mxu1 }
  0xfe   : > { %658 = vst [vmem:[%s1020_s24] sm:$0xff] %v480_v20  ;;  %v482_v21 = vpop.f32.mrb[1].mxu0  ;;  %660 = vst [vmem:[%s1020_s24 + $0x10] sm:$0xff] %v533_v0  ;;  %v535_v22 = vpop.f32.mrb[1].mxu1 }
  0xff   : > { %659 = vst [vmem:[%s1020_s24 + $0x8] sm:$0xff] %v482_v21  ;;  %v484_v23 = vpop.f32.mrb[2].mxu0  ;;  %661 = vst [vmem:[%s1020_s24 + $0x18] sm:$0xff] %v535_v22  ;;  %v537_v24 = vpop.f32.mrb[2].mxu1 }
 0x100   : > { %666 = vst [vmem:[%s1020_s24 + $0x40] sm:$0xff] %v484_v23  ;;  %v486_v25 = vpop.f32.mrb[3].mxu0  ;;  %668 = vst [vmem:[%s1020_s24 + $0x50] sm:$0xff] %v537_v24  ;;  %v539_v26 = vpop.f32.mrb[3].mxu1 }
 0x101   : > { %667 = vst [vmem:[%s1020_s24 + $0x48] sm:$0xff] %v486_v25  ;;  %669 = vst [vmem:[%s1020_s24 + $0x58] sm:$0xff] %v539_v26 }
 0x105   : > { %v490_v27 = vpop.f32.mrb[4].mxu0  ;;  %v543_v28 = vpop.f32.mrb[4].mxu1 }
 0x106   : > { %674 = vst [vmem:[%s1020_s24 + $0x80] sm:$0xff] %v490_v27  ;;  %v492_v29 = vpop.f32.mrb[5].mxu0  ;;  %676 = vst [vmem:[%s1020_s24 + $0x90] sm:$0xff] %v543_v28  ;;  %v545_v30 = vpop.f32.mrb[5].mxu1 }
 0x107   : > { %675 = vst [vmem:[%s1020_s24 + $0x88] sm:$0xff] %v492_v29  ;;  %v494_v31 = vpop.f32.mrb[6].mxu0  ;;  %677 = vst [vmem:[%s1020_s24 + $0x98] sm:$0xff] %v545_v30  ;;  %v547_v32 = vpop.f32.mrb[6].mxu1 }
 0x108   : > { %682 = vst [vmem:[%s1020_s24 + $0xc0] sm:$0xff] %v494_v31  ;;  %v496_v33 = vpop.f32.mrb[7].mxu0  ;;  %684 = vst [vmem:[%s1020_s24 + $0xd0] sm:$0xff] %v547_v32  ;;  %v549_v34 = vpop.f32.mrb[7].mxu1 }
 0x109   : > { %683 = vst [vmem:[%s1020_s24 + $0xc8] sm:$0xff] %v496_v33  ;;  %685 = vst [vmem:[%s1020_s24 + $0xd8] sm:$0xff] %v549_v34 }
 0x111   : > { %v586_v35 = vpop.f32.mrb[8].mxu0  ;;  %v639_v36 = vpop.f32.mrb[8].mxu1 }
 0x112   : > { %662 = vst [vmem:[%s1020_s24 + $0x20] sm:$0xff] %v586_v35  ;;  %v588_v37 = vpop.f32.mrb[9].mxu0  ;;  %664 = vst [vmem:[%s1020_s24 + $0x30] sm:$0xff] %v639_v36  ;;  %v641_v38 = vpop.f32.mrb[9].mxu1 }
 0x113   : > { %663 = vst [vmem:[%s1020_s24 + $0x28] sm:$0xff] %v588_v37  ;;  %v590_v39 = vpop.f32.mrb[10].mxu0  ;;  %665 = vst [vmem:[%s1020_s24 + $0x38] sm:$0xff] %v641_v38  ;;  %v643_v40 = vpop.f32.mrb[10].mxu1 }
 0x114   : > { %670 = vst [vmem:[%s1020_s24 + $0x60] sm:$0xff] %v590_v39  ;;  %v592_v41 = vpop.f32.mrb[11].mxu0  ;;  %672 = vst [vmem:[%s1020_s24 + $0x70] sm:$0xff] %v643_v40  ;;  %v645_v42 = vpop.f32.mrb[11].mxu1 }
 0x115   : > { %671 = vst [vmem:[%s1020_s24 + $0x68] sm:$0xff] %v592_v41  ;;  %673 = vst [vmem:[%s1020_s24 + $0x78] sm:$0xff] %v645_v42 }
 0x119   : > { %v596_v43 = vpop.f32.mrb[12].mxu0  ;;  %v649_v44 = vpop.f32.mrb[12].mxu1 }
 0x11a   : > { %678 = vst [vmem:[%s1020_s24 + $0xa0] sm:$0xff] %v596_v43  ;;  %v598_v45 = vpop.f32.mrb[13].mxu0  ;;  %680 = vst [vmem:[%s1020_s24 + $0xb0] sm:$0xff] %v649_v44  ;;  %v651_v46 = vpop.f32.mrb[13].mxu1 }
 0x11b   : > { %679 = vst [vmem:[%s1020_s24 + $0xa8] sm:$0xff] %v598_v45  ;;  %v600_v47 = vpop.f32.mrb[14].mxu0  ;;  %681 = vst [vmem:[%s1020_s24 + $0xb8] sm:$0xff] %v651_v46  ;;  %v653_v48 = vpop.f32.mrb[14].mxu1 }
 0x11c   : > { %686 = vst [vmem:[%s1020_s24 + $0xe0] sm:$0xff] %v600_v47  ;;  %v602_v49 = vpop.f32.mrb[15].mxu0  ;;  %688 = vst [vmem:[%s1020_s24 + $0xf0] sm:$0xff] %v653_v48  ;;  %v655_v50 = vpop.f32.mrb[15].mxu1 }
 0x11d   : > { %687 = vst [vmem:[%s1020_s24 + $0xe8] sm:$0xff] %v602_v49  ;;  %689 = vst [vmem:[%s1020_s24 + $0xf8] sm:$0xff] %v655_v50 }
 0x11e PF: > { %s12_s11 = sadd.s32 1, %s900_s11   ;;  %s1066_s9 = smov %s896_s10 }
 0x11f   : > { %p9_p5 = scmp.ge.s32.totalorder %s12_s11, 4   ;;  %s1067_s10 = smov %s1069_s12 }
 0x121   :  { %11 = sbr.rel (!%p9_p5) target bundleno = 2 (0x2), region = 58 }

// kernel: feature_network_forward.22
= control target key start
LH: loop header
LB: loop body
LE: loop exit
PB: predicated region body
PF: predicated region fallthrough
CT: control target
= control target key end

     0   :  { %s619_s9 = smov 0   ;;  %s621_s10 = smov 0   ;;  %s688_s0 = inlined_call_operand.vmem [shape: bf16[32,144], index: 0, kind: input, shape index: {}]   ;;  %s689_s1 = inlined_call_operand.vmem [shape: bf16[2,144,256], index: 1, kind: input, shape index: {}]   ;;  %s690_s2 = inlined_call_operand.vmem [shape: f32[2,32,256], index: 2, kind: output, shape index: {}]  }
   0x1   :  { %s623_s11 = smov 0  }
   0x2 LB: > { %s24_s12 = sadd.s32 1, %s598_s10  ;;  %p473_p0 = scmp.ge.s32.totalorder %s602_s11, 1  ;;  %s602_s11 = sphi %s623_s11, %s12_s11   ;;  %s598_s10 = sphi %s621_s10, %s692_s10   ;;  %s594_s9 = sphi %s619_s9, %s691_s9  }
   0x3   : > { %p26_p1 = scmp.ge.s32.totalorder %s24_s12, 2  ;;  %p133_p2 = scmp.lt.s32.totalorder %s602_s11, 3 }
   0x5   : > { %s694_s12 = smov (%p26_p1, %s24_s12), 0  ;;  %p134_p3 = pnand %p473_p0, %p133_p2 }
   0x6   : > { %p164_p4 = scmp.lt.s32.totalorder (!%p134_p3), %s594_s9, 1  ;;  %vm314_vm0 = vcmask (!%p134_p3), 130048   ;;  %v576_v0 = vld [vmem:[%s688_s0 + $0x4] ss:$8 sps:$4 sm:$0xff] (!%p134_p3)   ;;  %v579_v1 = vld [vmem:[%s688_s0 + $0x14] ss:$8 sps:$4 sm:$0xff] (!%p134_p3)  }
   0x7   : > { %137 = sbr.rel (%p134_p3) target bundleno = 271 (0x10f), region = 28  ;;  %499 = vmatprep.mubr.msk.bf16.mxu0 (!%p134_p3), %vm314_vm0, %v576_v0  ;;  %500 = vmatprep.mubr.msk.bf16.mxu1 (!%p134_p3), %vm314_vm0, %v579_v1  ;;  %v574_v20 = vld [vmem:[%s688_s0] ss:$8 sps:$4 sm:$0xff] (!%p134_p3)   ;;  %v577_v21 = vld [vmem:[%s688_s0 + $0x10] ss:$8 sps:$4 sm:$0xff] (!%p134_p3)  }
   0xe   : > { %s696_s9 = smov (!%p164_p4, %s594_s9), 1 }
   0xf   : > { %s522_s17 = smul.u32 144, %s696_s9  ;;  %s503_s25 = sshll.u32 %s696_s9, 6 }
  0x10   : > { %s181_s28 = scalar_lea.vmem %s690_s2, %s503_s25 }
  0x11   : > { %s649_s20 = scalar_lea.vmem %s689_s1, %s522_s17 }
  0x12   : > { %v547_v2 = vld [vmem:[%s649_s20 + $0x4] ss:$8 sps:$4 sm:$0xff]   ;;  %v549_v3 = vld [vmem:[%s649_s20] ss:$8 sps:$4 sm:$0xff]   ;;  %v550_v4 = vld [vmem:[%s649_s20 + $0x14] ss:$8 sps:$4 sm:$0xff]  }
  0x13   : > { %321 = vmatprep.subr.bf16.mxu0 %v547_v2  ;;  %504 = vmatprep.subr.bf16.mxu1 %v547_v2  ;;  %v552_v5 = vld [vmem:[%s649_s20 + $0x10] ss:$8 sps:$4 sm:$0xff]   ;;  %v553_v6 = vld [vmem:[%s649_s20 + $0x24] ss:$8 sps:$4 sm:$0xff]   ;;  %v555_v7 = vld [vmem:[%s649_s20 + $0x20] ss:$8 sps:$4 sm:$0xff]  }
  0x14   : > { %322 = vmatpush1.bf16.msra.mxu0 %v549_v3  ;;  %513 = vmatpush1.bf16.msra.mxu1 %v549_v3  ;;  %v556_v8 = vld [vmem:[%s649_s20 + $0x34] ss:$8 sps:$4 sm:$0xff]   ;;  %v558_v9 = vld [vmem:[%s649_s20 + $0x30] ss:$8 sps:$4 sm:$0xff]   ;;  %v559_v10 = vld [vmem:[%s649_s20 + $0x44] ss:$8 sps:$4 sm:$0xff]  }
  0x15   : > { %323 = vmatprep.subr.bf16.mxu0 %v550_v4  ;;  %505 = vmatprep.subr.bf16.mxu1 %v550_v4  ;;  %v561_v11 = vld [vmem:[%s649_s20 + $0x40] ss:$8 sps:$4 sm:$0xff]   ;;  %v562_v12 = vld [vmem:[%s649_s20 + $0x54] ss:$8 sps:$4 sm:$0xff]   ;;  %v564_v13 = vld [vmem:[%s649_s20 + $0x50] ss:$8 sps:$4 sm:$0xff]  }
  0x16   : > { %v565_v14 = vld [vmem:[%s649_s20 + $0x64] ss:$8 sps:$4 sm:$0xff]   ;;  %v567_v15 = vld [vmem:[%s649_s20 + $0x60] ss:$8 sps:$4 sm:$0xff]   ;;  %v568_v16 = vld [vmem:[%s649_s20 + $0x74] ss:$8 sps:$4 sm:$0xff]  }
  0x17   : > { %v570_v17 = vld [vmem:[%s649_s20 + $0x70] ss:$8 sps:$4 sm:$0xff]   ;;  %v571_v18 = vld [vmem:[%s649_s20 + $0x84] ss:$8 sps:$4 sm:$0xff]   ;;  %v573_v19 = vld [vmem:[%s649_s20 + $0x80] ss:$8 sps:$4 sm:$0xff]  }
  0x18   : > { %324 = vmatpush1.bf16.msra.mxu0 %v552_v5  ;;  %514 = vmatpush1.bf16.msra.mxu1 %v552_v5 }
  0x19   : > { %325 = vmatprep.subr.bf16.mxu0 %v553_v6  ;;  %506 = vmatprep.subr.bf16.mxu1 %v553_v6 }
  0x1c   : > { %326 = vmatpush1.bf16.msra.mxu0 %v555_v7  ;;  %515 = vmatpush1.bf16.msra.mxu1 %v555_v7 }
  0x1d   : > { %327 = vmatprep.subr.bf16.mxu0 %v556_v8  ;;  %507 = vmatprep.subr.bf16.mxu1 %v556_v8 }
  0x20   : > { %328 = vmatpush1.bf16.msra.mxu0 %v558_v9  ;;  %516 = vmatpush1.bf16.msra.mxu1 %v558_v9 }
  0x21   : > { %329 = vmatprep.subr.bf16.mxu0 %v559_v10  ;;  %508 = vmatprep.subr.bf16.mxu1 %v559_v10 }
  0x24   : > { %330 = vmatpush1.bf16.msra.mxu0 %v561_v11  ;;  %517 = vmatpush1.bf16.msra.mxu1 %v561_v11 }
  0x25   : > { %331 = vmatprep.subr.bf16.mxu0 %v562_v12  ;;  %509 = vmatprep.subr.bf16.mxu1 %v562_v12 }
  0x28   : > { %332 = vmatpush1.bf16.msra.mxu0 %v564_v13  ;;  %518 = vmatpush1.bf16.msra.mxu1 %v564_v13 }
  0x29   : > { %333 = vmatprep.subr.bf16.mxu0 %v565_v14  ;;  %510 = vmatprep.subr.bf16.mxu1 %v565_v14 }
  0x2c   : > { %334 = vmatpush1.bf16.msra.mxu0 %v567_v15  ;;  %519 = vmatpush1.bf16.msra.mxu1 %v567_v15 }
  0x2d   : > { %335 = vmatprep.subr.bf16.mxu0 %v568_v16  ;;  %511 = vmatprep.subr.bf16.mxu1 %v568_v16 }
  0x30   : > { %336 = vmatpush1.bf16.msra.mxu0 %v570_v17  ;;  %520 = vmatpush1.bf16.msra.mxu1 %v570_v17 }
  0x31   : > { %337 = vmatprep.subr.bf16.mxu0 %v571_v18  ;;  %512 = vmatprep.subr.bf16.mxu1 %v571_v18 }
  0x34   : > { %338 = vmatpush1.bf16.msra.mxu0 %v573_v19  ;;  %521 = vmatpush1.bf16.msra.mxu1 %v573_v19 }
  0x37   : > { %354 = vmatmul.mubr.bf16.vlgmr.msra.gmra.mrb[0].mxu0 %v574_v20  ;;  %364 = vmatmul.mubr.bf16.vlgmr.msra.gmra.mrb[0].mxu1 %v577_v21 }
 0x10a   : > { %v355_v22 = vpop.f32.mrb[0].mxu0  ;;  %v365_v23 = vpop.f32.mrb[0].mxu1 }
 0x10b   : > { %374 = vst [vmem:[%s181_s28] sm:$0xff] %v355_v22  ;;  %378 = vst [vmem:[%s181_s28 + $0x20] sm:$0xff] %v365_v23  ;;  %v357_v24 = vpop.f32.mrb[1].mxu0  ;;  %v367_v25 = vpop.f32.mrb[1].mxu1 }
 0x10c   : > { %375 = vst [vmem:[%s181_s28 + $0x8] sm:$0xff] %v357_v24  ;;  %379 = vst [vmem:[%s181_s28 + $0x28] sm:$0xff] %v367_v25  ;;  %v359_v26 = vpop.f32.mrb[2].mxu0  ;;  %v369_v27 = vpop.f32.mrb[2].mxu1 }
 0x10d   : > { %376 = vst [vmem:[%s181_s28 + $0x10] sm:$0xff] %v359_v26  ;;  %380 = vst [vmem:[%s181_s28 + $0x30] sm:$0xff] %v369_v27  ;;  %v361_v28 = vpop.f32.mrb[3].mxu0  ;;  %v371_v29 = vpop.f32.mrb[3].mxu1 }
 0x10e   : > { %377 = vst [vmem:[%s181_s28 + $0x18] sm:$0xff] %v361_v28  ;;  %381 = vst [vmem:[%s181_s28 + $0x38] sm:$0xff] %v371_v29 }
 0x10f PF: > { %s12_s11 = sadd.s32 1, %s602_s11   ;;  %s691_s9 = smov %s598_s10 }
 0x110   : > { %p9_p5 = scmp.ge.s32.totalorder %s12_s11, 4   ;;  %s692_s10 = smov %s694_s12 }
 0x112   :  { %11 = sbr.rel (!%p9_p5) target bundleno = 2 (0x2), region = 58 }

// kernel: feature_network_forward.18
= control target key start
LH: loop header
LB: loop body
LE: loop exit
PB: predicated region body
PF: predicated region fallthrough
CT: control target
= control target key end

     0   :  { %s978_s9 = smov 0   ;;  %s980_s10 = smov 0   ;;  %s1119_s0 = inlined_call_operand.vmem [shape: bf16[32,400], index: 0, kind: input, shape index: {}]   ;;  %s1120_s1 = inlined_call_operand.vmem [shape: bf16[2,400,128], index: 1, kind: input, shape index: {}]   ;;  %s1121_s2 = inlined_call_operand.vmem [shape: bf16[2,32,128], index: 2, kind: output, shape index: {}]  }
   0x1   :  { %s982_s11 = smov 0  }
   0x2 LB: > { %s24_s12 = sadd.s32 1, %s955_s10  ;;  %p774_p0 = scmp.ge.s32.totalorder %s959_s11, 1  ;;  %s959_s11 = sphi %s982_s11, %s12_s11   ;;  %s955_s10 = sphi %s980_s10, %s1123_s10   ;;  %s951_s9 = sphi %s978_s9, %s1122_s9  }
   0x3   : > { %p26_p1 = scmp.ge.s32.totalorder %s24_s12, 2  ;;  %p129_p2 = scmp.lt.s32.totalorder %s959_s11, 3 }
   0x5   : > { %s1125_s12 = smov (%p26_p1, %s24_s12), 0  ;;  %p130_p3 = pnand %p774_p0, %p129_p2 }
   0x6   : > { %p154_p4 = scmp.lt.s32.totalorder (!%p130_p3), %s951_s9, 1  ;;  %v961_v0 = vmov (!%p130_p3), 0   ;;  %v918_v1 = vld [vmem:[%s1119_s0 + $0x4] ss:$16 sps:$4 sm:$0xff] (!%p130_p3)   ;;  %vm427_vm0 = vcmask (!%p130_p3), 130048   ;;  %vm172_vm1 = vcmask (!%p130_p3), 7168  }
   0x7   : > { %133 = sbr.rel (%p130_p3) target bundleno = 595 (0x253), region = 28  ;;  %483 = vmatprep.subr.bf16.mxu1 (!%p130_p3), %v961_v0  ;;  %890 = vset.pattern.permute.xlu0 (!%p130_p3), %v961_v0  ;;  %v922_v2 = vld [vmem:[%s1119_s0 + $0xc] ss:$16 sps:$4 sm:$0xff] (!%p130_p3)   ;;  %v916_v27 = vld [vmem:[%s1119_s0] ss:$16 sps:$4 sm:$0xff] (!%p130_p3)   ;;  %v962_v34 = vmov (!%p130_p3), 0.0  }
   0x8   : > { %891 = vset.pattern.permute.xlu1 (!%p130_p3), %v961_v0  ;;  %466 = vmatprep.mubr.bf16.mxu0 (!%p130_p3), %v918_v1  ;;  %v923_v29 = vld [vmem:[%s1119_s0 + $0x24] ss:$16 sps:$4 sm:$0xff] (!%p130_p3)   ;;  %v920_v30 = vld [vmem:[%s1119_s0 + $0x8] ss:$16 sps:$4 sm:$0xff] (!%p130_p3)   ;;  %v926_v31 = vld [vmem:[%s1119_s0 + $0x2c] ss:$16 sps:$4 sm:$0xff] (!%p130_p3)  }
   0x9   : > { %811 = vmatprep.mubr.msk.bf16.mxu1 (!%p130_p3), %vm427_vm0, %v922_v2  ;;  %v925_v32 = vld [vmem:[%s1119_s0 + $0x20] ss:$16 sps:$4 sm:$0xff] (!%p130_p3)   ;;  %v928_v33 = vld [vmem:[%s1119_s0 + $0x28] ss:$16 sps:$4 sm:$0xff] (!%p130_p3)   ;;  %173 = vst.msk [vmem:[#allocation3] sm:$0xff] (!%p130_p3), %vm172_vm1, %v962_v34  ;;  %174 = vst.msk [vmem:[#allocation3 + $0x8] sm:$0xff] (!%p130_p3), %vm172_vm1, %v962_v34 }
   0xa   : > { %175 = vst.msk [vmem:[#allocation3 + $0x10] sm:$0xff] (!%p130_p3), %vm172_vm1, %v962_v34  ;;  %176 = vst.msk [vmem:[#allocation3 + $0x18] sm:$0xff] (!%p130_p3), %vm172_vm1, %v962_v34 }
   0xb   : > { %177 = vst.msk [vmem:[#allocation4] sm:$0xff] (!%p130_p3), %vm172_vm1, %v962_v34  ;;  %178 = vst.msk [vmem:[#allocation4 + $0x8] sm:$0xff] (!%p130_p3), %vm172_vm1, %v962_v34 }
   0xc   : > { %179 = vst.msk [vmem:[#allocation4 + $0x10] sm:$0xff] (!%p130_p3), %vm172_vm1, %v962_v34  ;;  %180 = vst.msk [vmem:[#allocation4 + $0x18] sm:$0xff] (!%p130_p3), %vm172_vm1, %v962_v34 }
   0xe   : > { %s1127_s9 = smov (!%p154_p4, %s951_s9), 1 }
   0xf   : > { %s863_s17 = smul.u32 200, %s1127_s9  ;;  %s819_s5 = sshll.u32 %s1127_s9, 4 }
  0x10   : > { %v540_v63 = vld [vmem:[#allocation3] sm:$0xff]  ;;  %s166_s8 = scalar_lea.vmem %s1121_s2, %s819_s5 }
  0x11   : > { %s1012_s20 = scalar_lea.vmem %s1120_s1, %s863_s17 }
  0x12   : > { %v892_v3 = vld [vmem:[%s1012_s20 + $0x40] sm:$0xff]   ;;  %v895_v6 = vld [vmem:[%s1012_s20 + $0x48] sm:$0xff]   ;;  %v898_v9 = vld [vmem:[%s1012_s20 + $0x50] sm:$0xff]  }
  0x13   : > { %v893_v4 = vld [vmem:[%s1012_s20 + $0x80] sm:$0xff]   ;;  %835 = vmatprep.subr.bf16.mxu0 %v892_v3  ;;  %v896_v7 = vld [vmem:[%s1012_s20 + $0x88] sm:$0xff]   ;;  %v899_v10 = vld [vmem:[%s1012_s20 + $0x90] sm:$0xff]  }
  0x14   : > { %v894_v5 = vld [vmem:[%s1012_s20] sm:$0xff]   ;;  %484 = vmatpush1.bf16.msra.mxu1 %v893_v4  ;;  %v897_v8 = vld [vmem:[%s1012_s20 + $0x8] sm:$0xff]   ;;  %v900_v11 = vld [vmem:[%s1012_s20 + $0x10] sm:$0xff]  }
  0x15   : > { %836 = vmatpush3.bf16.msra.mxu0 %v894_v5  ;;  %485 = vmatprep.subr.bf16.mxu1 %v961_v0  ;;  %v901_v12 = vld [vmem:[%s1012_s20 + $0x58] sm:$0xff]   ;;  %v904_v15 = vld [vmem:[%s1012_s20 + $0x60] sm:$0xff]   ;;  %v907_v18 = vld [vmem:[%s1012_s20 + $0x68] sm:$0xff]  }
  0x16   : > { %837 = vmatprep.subr.bf16.mxu0 %v895_v6  ;;  %v902_v13 = vld [vmem:[%s1012_s20 + $0x98] sm:$0xff]   ;;  %v905_v16 = vld [vmem:[%s1012_s20 + $0xa0] sm:$0xff]   ;;  %v908_v19 = vld [vmem:[%s1012_s20 + $0xa8] sm:$0xff]  }
  0x17   : > { %v903_v14 = vld [vmem:[%s1012_s20 + $0x18] sm:$0xff]   ;;  %v906_v17 = vld [vmem:[%s1012_s20 + $0x20] sm:$0xff]   ;;  %v909_v20 = vld [vmem:[%s1012_s20 + $0x28] sm:$0xff]  }
  0x18   : > { %486 = vmatpush1.bf16.msra.mxu1 %v896_v7  ;;  %v910_v21 = vld [vmem:[%s1012_s20 + $0x70] sm:$0xff]   ;;  %v913_v24 = vld [vmem:[%s1012_s20 + $0x78] sm:$0xff]   ;;  %v919_v28 = vld [vmem:[%s1012_s20 + $0xc0] sm:$0xff]  }
  0x19   : > { %838 = vmatpush3.bf16.msra.mxu0 %v897_v8  ;;  %487 = vmatprep.subr.bf16.mxu1 %v961_v0  ;;  %v911_v22 = vld [vmem:[%s1012_s20 + $0xb0] sm:$0xff]   ;;  %v914_v25 = vld [vmem:[%s1012_s20 + $0xb8] sm:$0xff]   ;;  %v562_v2 = vld [vmem:[#allocation4 + $0x8] sm:$0xff] }
  0x1a   : > { %839 = vmatprep.subr.bf16.mxu0 %v898_v9  ;;  %v912_v23 = vld [vmem:[%s1012_s20 + $0x30] sm:$0xff]   ;;  %v915_v26 = vld [vmem:[%s1012_s20 + $0x38] sm:$0xff]   ;;  %v541_v3 = vld [vmem:[#allocation3 + $0x8] sm:$0xff] }
  0x1b   : > { %v542_v8 = vld [vmem:[#allocation3 + $0x10] sm:$0xff]  ;;  %v561_v9 = vld [vmem:[#allocation4] sm:$0xff] }
  0x1c   : > { %488 = vmatpush1.bf16.msra.mxu1 %v899_v10 }
  0x1d   : > { %840 = vmatpush3.bf16.msra.mxu0 %v900_v11  ;;  %489 = vmatprep.subr.bf16.mxu1 %v961_v0 }
  0x1e   : > { %841 = vmatprep.subr.bf16.mxu0 %v901_v12 }
  0x20   : > { %490 = vmatpush1.bf16.msra.mxu1 %v902_v13 }
  0x21   : > { %842 = vmatpush3.bf16.msra.mxu0 %v903_v14  ;;  %491 = vmatprep.subr.bf16.mxu1 %v961_v0  ;;  %v543_v14 = vld [vmem:[#allocation3 + $0x18] sm:$0xff] }
  0x22   : > { %843 = vmatprep.subr.bf16.mxu0 %v904_v15 }
  0x24   : > { %492 = vmatpush1.bf16.msra.mxu1 %v905_v16  ;;  %v563_v16 = vld [vmem:[#allocation4 + $0x10] sm:$0xff] }
  0x25   : > { %844 = vmatpush3.bf16.msra.mxu0 %v906_v17  ;;  %493 = vmatprep.subr.bf16.mxu1 %v961_v0 }
  0x26   : > { %845 = vmatprep.subr.bf16.mxu0 %v907_v18 }
  0x28   : > { %494 = vmatpush1.bf16.msra.mxu1 %v908_v19 }
  0x29   : > { %846 = vmatpush3.bf16.msra.mxu0 %v909_v20  ;;  %495 = vmatprep.subr.bf16.mxu1 %v961_v0 }
  0x2a   : > { %847 = vmatprep.subr.bf16.mxu0 %v910_v21 }
  0x2c   : > { %496 = vmatpush1.bf16.msra.mxu1 %v911_v22  ;;  %v564_v22 = vld [vmem:[#allocation4 + $0x18] sm:$0xff] }
  0x2d   : > { %848 = vmatpush3.bf16.msra.mxu0 %v912_v23  ;;  %497 = vmatprep.subr.bf16.mxu1 %v961_v0 }
  0x2e   : > { %849 = vmatprep.subr.bf16.mxu0 %v913_v24 }
  0x30   : > { %498 = vmatpush1.bf16.msra.mxu1 %v914_v25 }
  0x31   : > { %850 = vmatpush3.bf16.msra.mxu0 %v915_v26  ;;  %499 = vmatprep.subr.bf16.mxu1 %v961_v0 }
  0x34   : > { %467 = vmatmul.mubr.bf16.vlgmr.msra.gmra.mrb[0].mxu0 %v916_v27  ;;  %500 = vmatpush1.bf16.msra.mxu1 %v919_v28 }
  0x35   : > { %474 = vmatprep.mubr.bf16.mxu0 %v923_v29 }
  0x37   : > { %516 = vmatmul.mubr.bf16.vlgmr.msra.gmra.mrb[0].mxu1 %v920_v30 }
  0x38   : > { %812 = vmatprep.mubr.msk.bf16.mxu1 %vm427_vm0, %v926_v31 }
  0x3c   : > { %475 = vmatmul.mubr.bf16.gmra.mrb[4].mxu0 %v925_v32 }
  0x3f   : > { %524 = vmatmul.mubr.bf16.gmra.mrb[4].mxu1 %v928_v33 }
 0x107   : > { %v851_v35 = vpop.f32.mrb[0].mxu0 }
 0x108   : > { %v852_v36 = vpop.f32.mrb[1].mxu0 }
 0x109   : > { %v853_v37 = vadd.f32 %v852_v36, %v851_v35  ;;  %v854_v38 = vpop.f32.mrb[2].mxu0 }
 0x10a   : > { %v855_v39 = vpop.f32.mrb[3].mxu0  ;;  %v517_v40 = vpop.f32.mrb[0].mxu1 }
 0x10b   : > { %v856_v41 = vadd.f32 %v855_v39, %v854_v38  ;;  %v1074_v42 = vadd.f32 %v853_v37, %v517_v40  ;;  %v519_v43 = vpop.f32.mrb[1].mxu1 }
 0x10c   : > { %v520_v44 = vpop.f32.mrb[2].mxu1 }
 0x10d   : > { %v1076_v45 = vadd.f32 %v856_v41, %v520_v44  ;;  %v522_v46 = vpop.f32.mrb[3].mxu1  ;;  %544 = vadd.xlane.f32.xlu0 %v1074_v42  ;;  %v565_v57 = vmul.f32 %v1074_v42, %v1074_v42 }
 0x10f   : > { %v857_v47 = vpop.f32.mrb[4].mxu0  ;;  %v566_v48 = vmul.f32 %v1076_v45, %v1076_v45 }
 0x110   : > { %v858_v49 = vpop.f32.mrb[5].mxu0 }
 0x111   : > { %v859_v50 = vadd.f32 %v858_v49, %v857_v47  ;;  %571 = vadd.xlane.f32.xlu1 %v566_v48  ;;  %546 = vadd.xlane.f32.xlu0 %v1076_v45  ;;  %v860_v51 = vpop.f32.mrb[6].mxu0 }
 0x112   : > { %v525_v52 = vpop.f32.mrb[4].mxu1  ;;  %v861_v53 = vpop.f32.mrb[7].mxu0 }
 0x113   : > { %v1082_v54 = vadd.f32 %v859_v50, %v525_v52  ;;  %v862_v55 = vadd.f32 %v861_v53, %v860_v51  ;;  %v527_v56 = vpop.f32.mrb[5].mxu1 }
 0x114   : > { %v528_v58 = vpop.f32.mrb[6].mxu1 }
 0x115   : > { %v1086_v59 = vadd.f32 %v862_v55, %v528_v58  ;;  %548 = vadd.xlane.f32.xlu1 %v1082_v54  ;;  %569 = vadd.xlane.f32.xlu0 %v565_v57  ;;  %v530_v60 = vpop.f32.mrb[7].mxu1  ;;  %v567_v61 = vmul.f32 %v1082_v54, %v1082_v54 }
 0x117   : > { %v568_v62 = vmul.f32 %v1086_v59, %v1086_v59 }
 0x119   : > { %550 = vadd.xlane.f32.xlu1 %v1086_v59  ;;  %573 = vadd.xlane.f32.xlu0 %v567_v61 }
 0x11d   : > { %575 = vadd.xlane.f32.xlu1 %v568_v62 }
 0x19a   : > { %v545_v0 = vpop.xlane.xlu0 %544 }
 0x19b   : > { %v552_v1 = vadd.f32 %v545_v0, %v540_v63 }
 0x19d   : > { %557 = vst.msk [vmem:[#allocation3] sm:$0xff] %vm172_vm1, %v552_v1 }
 0x19e   : > { %v572_v4 = vpop.xlane.xlu1 %571  ;;  %v547_v5 = vpop.xlane.xlu0 %546 }
 0x19f   : > { %v578_v6 = vadd.f32 %v572_v4, %v562_v2  ;;  %v553_v7 = vadd.f32 %v547_v5, %v541_v3 }
 0x1a1   : > { %582 = vst.msk [vmem:[#allocation4 + $0x8] sm:$0xff] %vm172_vm1, %v578_v6  ;;  %558 = vst.msk [vmem:[#allocation3 + $0x8] sm:$0xff] %vm172_vm1, %v553_v7 }
 0x1a2   : > { %v549_v10 = vpop.xlane.xlu1 %548  ;;  %v570_v11 = vpop.xlane.xlu0 %569 }
 0x1a3   : > { %v554_v12 = vadd.f32 %v549_v10, %v542_v8  ;;  %v577_v13 = vadd.f32 %v570_v11, %v561_v9 }
 0x1a4   : > { %v588_v15 = vld [vmem:[#allocation3] sm:$0xff] }
 0x1a5   : > { %559 = vst.msk [vmem:[#allocation3 + $0x10] sm:$0xff] %vm172_vm1, %v554_v12  ;;  %581 = vst.msk [vmem:[#allocation4] sm:$0xff] %vm172_vm1, %v577_v13  ;;  %v592_v17 = vmul.f32 0.015625, %v588_v15 }
 0x1a6   : > { %v551_v18 = vpop.xlane.xlu1 %550  ;;  %v574_v19 = vpop.xlane.xlu0 %573 }
 0x1a7   : > { %v555_v20 = vadd.f32 %v551_v18, %v543_v14  ;;  %622 = vperm.xlu0 %890, %v592_v17   ;;  %v579_v21 = vadd.f32 %v574_v19, %v563_v16  ;;  %v604_v32 = vmul.f32 %v592_v17, %v592_v17 }
 0x1a8   : > { %v589_v23 = vld [vmem:[#allocation3 + $0x8] sm:$0xff] }
 0x1a9   : > { %v597_v24 = vld [vmem:[#allocation4 + $0x8] sm:$0xff]  ;;  %560 = vst.msk [vmem:[#allocation3 + $0x18] sm:$0xff] %vm172_vm1, %v555_v20  ;;  %583 = vst.msk [vmem:[#allocation4 + $0x10] sm:$0xff] %vm172_vm1, %v579_v21  ;;  %v593_v25 = vmul.f32 0.015625, %v589_v23 }
 0x1aa   : > { %v576_v26 = vpop.xlane.xlu1 %575  ;;  %v601_v28 = vmul.f32 0.015625, %v597_v24 }
 0x1ab   : > { %v580_v27 = vadd.f32 %v576_v26, %v564_v22  ;;  %627 = vperm.xlu1 %891, %v593_v25   ;;  %v605_v29 = vmul.f32 %v593_v25, %v593_v25 }
 0x1ac   : > { %v596_v30 = vld [vmem:[#allocation4] sm:$0xff]  ;;  %v590_v31 = vld [vmem:[#allocation3 + $0x10] sm:$0xff] }
 0x1ad   : > { %v600_v33 = vmul.f32 0.015625, %v596_v30  ;;  %584 = vst.msk [vmem:[#allocation4 + $0x18] sm:$0xff] %vm172_vm1, %v580_v27  ;;  %v609_v34 = vsub.f32 %v601_v28, %v605_v29  ;;  %v594_v35 = vmul.f32 0.015625, %v590_v31 }
 0x1af   : > { %v608_v36 = vsub.f32 %v600_v33, %v604_v32  ;;  %v606_v37 = vmul.f32 %v594_v35, %v594_v35  ;;  %632 = vperm.xlu1 %891, %v594_v35   ;;  %v613_v38 = vmax.f32 %v609_v34, 0.0 }
 0x1b0   : > { %v598_v39 = vld [vmem:[#allocation4 + $0x10] sm:$0xff]  ;;  %v591_v40 = vld [vmem:[#allocation3 + $0x18] sm:$0xff] }
 0x1b1   : > { %v612_v41 = vmax.f32 %v608_v36, 0.0  ;;  %v602_v43 = vmul.f32 0.015625, %v598_v39  ;;  %v595_v44 = vmul.f32 0.015625, %v591_v40  ;;  %v645_v48 = vadd.f32 1e-05, %v613_v38 }
 0x1b3   : > { %v644_v46 = vadd.f32 1e-05, %v612_v41  ;;  %v610_v47 = vsub.f32 %v602_v43, %v606_v37  ;;  %637 = vperm.xlu1 %891, %v595_v44   ;;  %v607_v52 = vmul.f32 %v595_v44, %v595_v44 }
 0x1b4   : > { %v599_v49 = vld [vmem:[#allocation4 + $0x18] sm:$0xff] }
 0x1b5   : > { %929 = vrsqrt.f32 %v644_v46  ;;  %v614_v50 = vmax.f32 %v610_v47, 0.0  ;;  %v603_v51 = vmul.f32 0.015625, %v599_v49 }
 0x1b6   : > { %931 = vrsqrt.f32 %v645_v48 }
 0x1b7   : > { %v611_v53 = vsub.f32 %v603_v51, %v607_v52  ;;  %v646_v55 = vadd.f32 1e-05, %v614_v50 }
 0x1b9   : > { %v615_v56 = vmax.f32 %v611_v53, 0.0  ;;  %933 = vrsqrt.f32 %v646_v55 }
 0x1bb   : > { %v647_v57 = vadd.f32 1e-05, %v615_v56 }
 0x1bd   : > { %935 = vrsqrt.f32 %v647_v57 }
 0x1bf   : > { %v930_v58 = vpop.eup %929 }
 0x1c0   : > { %654 = vperm.xlu1 %891, %v930_v58   ;;  %v932_v60 = vpop.eup %931 }
 0x1c3   : > { %v934_v61 = vpop.eup %933 }
 0x1c4   : > { %659 = vperm.xlu1 %891, %v932_v60  }
 0x1c7   : > { %v936_v62 = vpop.eup %935 }
 0x1c8   : > { %664 = vperm.xlu1 %891, %v934_v61  }
 0x1cc   : > { %669 = vperm.xlu1 %891, %v936_v62  }
 0x226   : > { %v623_v2 = vpop.permute.xlu0 %622 }
 0x227   : > { %v640_v4 = vsub.f32 %v1074_v42, %v623_v2 }
 0x22a   : > { %v628_v63 = vpop.permute.xlu1 %627 }
 0x22b   : > { %v641_v5 = vsub.f32 %v1076_v45, %v628_v63 }
 0x22e   : > { %v633_v0 = vpop.permute.xlu1 %632 }
 0x22f   : > { %v642_v12 = vsub.f32 %v1082_v54, %v633_v0 }
 0x232   : > { %v638_v1 = vpop.permute.xlu1 %637 }
 0x233   : > { %v643_v14 = vsub.f32 %v1086_v59, %v638_v1 }
 0x23f   : > { %v655_v3 = vpop.permute.xlu1 %654 }
 0x240   : > { %v672_v6 = vmul.f32 %v655_v3, %v640_v4 }
 0x242   : > { %v676_v9 = vmax.f32 %v672_v6, 0.0 }
 0x243   : > { %v660_v7 = vpop.permute.xlu1 %659 }
 0x244   : > { %v673_v8 = vmul.f32 %v660_v7, %v641_v5 }
 0x246   : > { %v677_v10 = vmax.f32 %v673_v8, 0.0 }
 0x247   : > { %v665_v11 = vpop.permute.xlu1 %664 }
 0x248   : > { %v827_v13 = vpack.c.bf16 %v677_v10, %v676_v9  ;;  %v674_v42 = vmul.f32 %v665_v11, %v642_v12 }
 0x24a   : > { %828 = vst [vmem:[%s166_s8] sm:$0xff] %v827_v13   ;;  %v678_v16 = vmax.f32 %v674_v42, 0.0 }
 0x24b   : > { %v670_v15 = vpop.permute.xlu1 %669 }
 0x24c   : > { %v675_v45 = vmul.f32 %v670_v15, %v643_v14 }
 0x24e   : > { %v679_v17 = vmax.f32 %v675_v45, 0.0 }
 0x250   : > { %v832_v18 = vpack.c.bf16 %v679_v17, %v678_v16 }
 0x252   : > { %834 = vst [vmem:[%s166_s8 + $0x8] sm:$0xff] %v832_v18  }
 0x253 PF: > { %s12_s11 = sadd.s32 1, %s959_s11   ;;  %s1122_s9 = smov %s955_s10 }
 0x254   : > { %p9_p5 = scmp.ge.s32.totalorder %s12_s11, 4   ;;  %s1123_s10 = smov %s1125_s12 }
 0x256   :  { %11 = sbr.rel (!%p9_p5) target bundleno = 2 (0x2), region = 67 }

// kernel: feature_network_forward.19
= control target key start
LH: loop header
LB: loop body
LE: loop exit
PB: predicated region body
PF: predicated region fallthrough
CT: control target
= control target key end

     0   :  { %s906_s9 = smov 0   ;;  %s908_s10 = smov 0   ;;  %s1023_s0 = inlined_call_operand.vmem [shape: bf16[32,288], index: 0, kind: input, shape index: {}]   ;;  %s1024_s1 = inlined_call_operand.vmem [shape: bf16[2,288,128], index: 1, kind: input, shape index: {}]   ;;  %s1025_s2 = inlined_call_operand.vmem [shape: bf16[2,32,128], index: 2, kind: output, shape index: {}]  }
   0x1   :  { %s910_s11 = smov 0  }
   0x2 LB: > { %s24_s12 = sadd.s32 1, %s883_s10  ;;  %p710_p0 = scmp.ge.s32.totalorder %s887_s11, 1  ;;  %s887_s11 = sphi %s910_s11, %s12_s11   ;;  %s883_s10 = sphi %s908_s10, %s1027_s10   ;;  %s879_s9 = sphi %s906_s9, %s1026_s9  }
   0x3   : > { %p26_p1 = scmp.ge.s32.totalorder %s24_s12, 2  ;;  %p129_p2 = scmp.lt.s32.totalorder %s887_s11, 3 }
   0x5   : > { %s1029_s12 = smov (%p26_p1, %s24_s12), 0  ;;  %p130_p3 = pnand %p710_p0, %p129_p2 }
   0x6   : > { %p154_p4 = scmp.lt.s32.totalorder (!%p130_p3), %s879_s9, 1  ;;  %vm363_vm0 = vcmask (!%p130_p3), 261120   ;;  %v849_v0 = vld [vmem:[%s1023_s0 + $0x8] ss:$12 sps:$4 sm:$0xff] (!%p130_p3)   ;;  %v852_v1 = vld [vmem:[%s1023_s0 + $0x4] ss:$12 sps:$4 sm:$0xff] (!%p130_p3)  }
   0x7   : > { %133 = sbr.rel (%p130_p3) target bundleno = 594 (0x252), region = 28  ;;  %798 = vmatprep.mubr.msk.bf16.mxu1 (!%p130_p3), %vm363_vm0, %v849_v0  ;;  %402 = vmatprep.mubr.bf16.mxu0 (!%p130_p3), %v852_v1  ;;  %v853_v15 = vld [vmem:[%s1023_s0 + $0x20] ss:$12 sps:$4 sm:$0xff] (!%p130_p3)   ;;  %v854_v22 = vld [vmem:[%s1023_s0 + $0x1c] ss:$12 sps:$4 sm:$0xff] (!%p130_p3)   ;;  %vm172_vm1 = vcmask (!%p130_p3), 7168  }
   0x8   : > { %v850_v21 = vld [vmem:[%s1023_s0] ss:$12 sps:$4 sm:$0xff] (!%p130_p3)   ;;  %v856_v23 = vld [vmem:[%s1023_s0 + $0x18] ss:$12 sps:$4 sm:$0xff] (!%p130_p3)   ;;  %v889_v24 = vmov (!%p130_p3), 0.0   ;;  %v890_v49 = vmov (!%p130_p3), 0  }
   0x9   : > { %173 = vst.msk [vmem:[#allocation3] sm:$0xff] (!%p130_p3), %vm172_vm1, %v889_v24  ;;  %174 = vst.msk [vmem:[#allocation3 + $0x8] sm:$0xff] (!%p130_p3), %vm172_vm1, %v889_v24  ;;  %829 = vset.pattern.permute.xlu0 (!%p130_p3), %v890_v49  ;;  %830 = vset.pattern.permute.xlu1 (!%p130_p3), %v890_v49 }
   0xa   : > { %175 = vst.msk [vmem:[#allocation3 + $0x10] sm:$0xff] (!%p130_p3), %vm172_vm1, %v889_v24  ;;  %176 = vst.msk [vmem:[#allocation3 + $0x18] sm:$0xff] (!%p130_p3), %vm172_vm1, %v889_v24 }
   0xb   : > { %177 = vst.msk [vmem:[#allocation4] sm:$0xff] (!%p130_p3), %vm172_vm1, %v889_v24  ;;  %178 = vst.msk [vmem:[#allocation4 + $0x8] sm:$0xff] (!%p130_p3), %vm172_vm1, %v889_v24 }
   0xc   : > { %179 = vst.msk [vmem:[#allocation4 + $0x10] sm:$0xff] (!%p130_p3), %vm172_vm1, %v889_v24  ;;  %180 = vst.msk [vmem:[#allocation4 + $0x18] sm:$0xff] (!%p130_p3), %vm172_vm1, %v889_v24 }
   0xe   : > { %s1031_s9 = smov (!%p154_p4, %s879_s9), 1 }
   0xf   : > { %s802_s17 = smul.u32 144, %s1031_s9  ;;  %s746_s29 = sshll.u32 %s1031_s9, 4 }
  0x10   : > { %v476_v50 = vld [vmem:[#allocation3] sm:$0xff]  ;;  %v477_v54 = vld [vmem:[#allocation3 + $0x8] sm:$0xff]  ;;  %s166_s4 = scalar_lea.vmem %s1025_s2, %s746_s29 }
  0x11   : > { %s937_s20 = scalar_lea.vmem %s1024_s1, %s802_s17  ;;  %v478_v59 = vld [vmem:[#allocation3 + $0x10] sm:$0xff]  ;;  %v479_v1 = vld [vmem:[#allocation3 + $0x18] sm:$0xff] }
  0x12   : > { %v831_v2 = vld [vmem:[%s937_s20 + $0x40] sm:$0xff]   ;;  %v833_v4 = vld [vmem:[%s937_s20 + $0x48] sm:$0xff]   ;;  %v835_v6 = vld [vmem:[%s937_s20 + $0x50] sm:$0xff]  }
  0x13   : > { %v832_v3 = vld [vmem:[%s937_s20] sm:$0xff]   ;;  %762 = vmatprep.subr.bf16.mxu0 %v831_v2  ;;  %v834_v5 = vld [vmem:[%s937_s20 + $0x8] sm:$0xff]   ;;  %v836_v7 = vld [vmem:[%s937_s20 + $0x10] sm:$0xff]  }
  0x14   : > { %763 = vmatpush3.bf16.msra.mxu0 %v832_v3  ;;  %v837_v8 = vld [vmem:[%s937_s20 + $0x58] sm:$0xff]   ;;  %v839_v10 = vld [vmem:[%s937_s20 + $0x60] sm:$0xff]   ;;  %v846_v13 = vld [vmem:[%s937_s20 + $0x88] sm:$0xff]  }
  0x15   : > { %764 = vmatprep.subr.bf16.mxu0 %v833_v4  ;;  %v838_v9 = vld [vmem:[%s937_s20 + $0x18] sm:$0xff]   ;;  %v843_v11 = vld [vmem:[%s937_s20 + $0x80] sm:$0xff]   ;;  %v841_v14 = vld [vmem:[%s937_s20 + $0x68] sm:$0xff]  }
  0x16   : > { %v840_v12 = vld [vmem:[%s937_s20 + $0x20] sm:$0xff]   ;;  %794 = vmatprep.subr.bf16.mxu1 %v843_v11  ;;  %v842_v16 = vld [vmem:[%s937_s20 + $0x28] sm:$0xff]   ;;  %v844_v17 = vld [vmem:[%s937_s20 + $0x70] sm:$0xff]  }
  0x17   : > { %795 = vmatpush3.bf16.msra.mxu1 %v843_v11  ;;  %v845_v18 = vld [vmem:[%s937_s20 + $0x30] sm:$0xff]   ;;  %v847_v19 = vld [vmem:[%s937_s20 + $0x78] sm:$0xff]   ;;  %v498_v53 = vld [vmem:[#allocation4 + $0x8] sm:$0xff] }
  0x18   : > { %765 = vmatpush3.bf16.msra.mxu0 %v834_v5  ;;  %796 = vmatprep.subr.bf16.mxu1 %v846_v13  ;;  %v848_v20 = vld [vmem:[%s937_s20 + $0x38] sm:$0xff]   ;;  %v497_v60 = vld [vmem:[#allocation4] sm:$0xff]  ;;  %v499_v2 = vld [vmem:[#allocation4 + $0x10] sm:$0xff] }
  0x19   : > { %766 = vmatprep.subr.bf16.mxu0 %v835_v6 }
  0x1b   : > { %797 = vmatpush3.bf16.msra.mxu1 %v846_v13 }
  0x1c   : > { %767 = vmatpush3.bf16.msra.mxu0 %v836_v7 }
  0x1d   : > { %768 = vmatprep.subr.bf16.mxu0 %v837_v8 }
  0x1e   : > { %799 = vmatmul.mubr.msk.bf16.vlgmr.msra.gmra.mrb[0].mxu1 %vm363_vm0, %v853_v15 }
  0x20   : > { %769 = vmatpush3.bf16.msra.mxu0 %v838_v9  ;;  %v500_v9 = vld [vmem:[#allocation4 + $0x18] sm:$0xff] }
  0x21   : > { %770 = vmatprep.subr.bf16.mxu0 %v839_v10 }
  0x24   : > { %771 = vmatpush3.bf16.msra.mxu0 %v840_v12 }
  0x25   : > { %772 = vmatprep.subr.bf16.mxu0 %v841_v14 }
  0x28   : > { %773 = vmatpush3.bf16.msra.mxu0 %v842_v16 }
  0x29   : > { %774 = vmatprep.subr.bf16.mxu0 %v844_v17 }
  0x2c   : > { %775 = vmatpush3.bf16.msra.mxu0 %v845_v18 }
  0x2d   : > { %776 = vmatprep.subr.bf16.mxu0 %v847_v19 }
  0x30   : > { %777 = vmatpush3.bf16.msra.mxu0 %v848_v20 }
  0x33   : > { %403 = vmatmul.mubr.bf16.vlgmr.msra.gmra.mrb[0].mxu0 %v850_v21 }
  0x34   : > { %410 = vmatprep.mubr.bf16.mxu0 %v854_v22 }
  0x3b   : > { %411 = vmatmul.mubr.bf16.gmra.mrb[4].mxu0 %v856_v23 }
  0xf1   : > { %v800_v25 = vpop.f32.mrb[0].mxu1 }
  0xf2   : > { %v453_v26 = vpop.f32.mrb[1].mxu1 }
  0xf3   : > { %v801_v27 = vpop.f32.mrb[2].mxu1 }
  0xf4   : > { %v456_v28 = vpop.f32.mrb[3].mxu1 }
 0x106   : > { %v778_v29 = vpop.f32.mrb[0].mxu0 }
 0x107   : > { %v779_v30 = vpop.f32.mrb[1].mxu0 }
 0x108   : > { %v780_v31 = vadd.f32 %v779_v30, %v778_v29  ;;  %v781_v32 = vpop.f32.mrb[2].mxu0 }
 0x109   : > { %v782_v33 = vpop.f32.mrb[3].mxu0 }
 0x10a   : > { %v978_v34 = vadd.f32 %v780_v31, %v453_v26  ;;  %v783_v35 = vadd.f32 %v782_v33, %v781_v32 }
 0x10c   : > { %v980_v36 = vadd.f32 %v783_v35, %v456_v28  ;;  %480 = vadd.xlane.f32.xlu0 %v978_v34  ;;  %v501_v45 = vmul.f32 %v978_v34, %v978_v34 }
 0x10e   : > { %v784_v37 = vpop.f32.mrb[4].mxu0  ;;  %v502_v38 = vmul.f32 %v980_v36, %v980_v36 }
 0x10f   : > { %v785_v39 = vpop.f32.mrb[5].mxu0 }
 0x110   : > { %v786_v40 = vadd.f32 %v785_v39, %v784_v37  ;;  %v787_v41 = vpop.f32.mrb[6].mxu0  ;;  %507 = vadd.xlane.f32.xlu1 %v502_v38  ;;  %482 = vadd.xlane.f32.xlu0 %v980_v36 }
 0x111   : > { %v788_v42 = vpop.f32.mrb[7].mxu0 }
 0x112   : > { %v986_v43 = vadd.f32 %v800_v25, %v786_v40  ;;  %v789_v44 = vadd.f32 %v788_v42, %v787_v41 }
 0x114   : > { %v990_v46 = vadd.f32 %v801_v27, %v789_v44  ;;  %484 = vadd.xlane.f32.xlu1 %v986_v43  ;;  %505 = vadd.xlane.f32.xlu0 %v501_v45  ;;  %v503_v47 = vmul.f32 %v986_v43, %v986_v43 }
 0x116   : > { %v504_v48 = vmul.f32 %v990_v46, %v990_v46 }
 0x118   : > { %486 = vadd.xlane.f32.xlu1 %v990_v46  ;;  %509 = vadd.xlane.f32.xlu0 %v503_v47 }
 0x11c   : > { %511 = vadd.xlane.f32.xlu1 %v504_v48 }
 0x199   : > { %v481_v51 = vpop.xlane.xlu0 %480 }
 0x19a   : > { %v488_v52 = vadd.f32 %v481_v51, %v476_v50 }
 0x19c   : > { %493 = vst.msk [vmem:[#allocation3] sm:$0xff] %vm172_vm1, %v488_v52 }
 0x19d   : > { %v508_v55 = vpop.xlane.xlu1 %507  ;;  %v483_v56 = vpop.xlane.xlu0 %482 }
 0x19e   : > { %v514_v57 = vadd.f32 %v508_v55, %v498_v53  ;;  %v489_v58 = vadd.f32 %v483_v56, %v477_v54 }
 0x1a0   : > { %518 = vst.msk [vmem:[#allocation4 + $0x8] sm:$0xff] %vm172_vm1, %v514_v57  ;;  %494 = vst.msk [vmem:[#allocation3 + $0x8] sm:$0xff] %vm172_vm1, %v489_v58 }
 0x1a1   : > { %v485_v61 = vpop.xlane.xlu1 %484  ;;  %v506_v62 = vpop.xlane.xlu0 %505 }
 0x1a2   : > { %v490_v63 = vadd.f32 %v485_v61, %v478_v59  ;;  %v513_v0 = vadd.f32 %v506_v62, %v497_v60 }
 0x1a3   : > { %v524_v3 = vld [vmem:[#allocation3] sm:$0xff] }
 0x1a4   : > { %495 = vst.msk [vmem:[#allocation3 + $0x10] sm:$0xff] %vm172_vm1, %v490_v63  ;;  %517 = vst.msk [vmem:[#allocation4] sm:$0xff] %vm172_vm1, %v513_v0  ;;  %v528_v4 = vmul.f32 0.015625, %v524_v3 }
 0x1a5   : > { %v487_v5 = vpop.xlane.xlu1 %486  ;;  %v510_v6 = vpop.xlane.xlu0 %509 }
 0x1a6   : > { %v491_v7 = vadd.f32 %v487_v5, %v479_v1  ;;  %v515_v8 = vadd.f32 %v510_v6, %v499_v2  ;;  %558 = vperm.xlu0 %829, %v528_v4   ;;  %v540_v19 = vmul.f32 %v528_v4, %v528_v4 }
 0x1a7   : > { %v525_v10 = vld [vmem:[#allocation3 + $0x8] sm:$0xff] }
 0x1a8   : > { %v533_v11 = vld [vmem:[#allocation4 + $0x8] sm:$0xff]  ;;  %496 = vst.msk [vmem:[#allocation3 + $0x18] sm:$0xff] %vm172_vm1, %v491_v7  ;;  %519 = vst.msk [vmem:[#allocation4 + $0x10] sm:$0xff] %vm172_vm1, %v515_v8  ;;  %v529_v12 = vmul.f32 0.015625, %v525_v10 }
 0x1a9   : > { %v512_v13 = vpop.xlane.xlu1 %511  ;;  %v537_v15 = vmul.f32 0.015625, %v533_v11 }
 0x1aa   : > { %v516_v14 = vadd.f32 %v512_v13, %v500_v9  ;;  %563 = vperm.xlu1 %830, %v529_v12   ;;  %v541_v16 = vmul.f32 %v529_v12, %v529_v12 }
 0x1ab   : > { %v532_v17 = vld [vmem:[#allocation4] sm:$0xff]  ;;  %v526_v18 = vld [vmem:[#allocation3 + $0x10] sm:$0xff] }
 0x1ac   : > { %v536_v20 = vmul.f32 0.015625, %v532_v17  ;;  %520 = vst.msk [vmem:[#allocation4 + $0x18] sm:$0xff] %vm172_vm1, %v516_v14  ;;  %v545_v21 = vsub.f32 %v537_v15, %v541_v16  ;;  %v530_v22 = vmul.f32 0.015625, %v526_v18 }
 0x1ae   : > { %v544_v23 = vsub.f32 %v536_v20, %v540_v19  ;;  %568 = vperm.xlu1 %830, %v530_v22   ;;  %v549_v24 = vmax.f32 %v545_v21, 0.0  ;;  %v542_v28 = vmul.f32 %v530_v22, %v530_v22 }
 0x1af   : > { %v534_v25 = vld [vmem:[#allocation4 + $0x10] sm:$0xff]  ;;  %v527_v26 = vld [vmem:[#allocation3 + $0x18] sm:$0xff] }
 0x1b0   : > { %v548_v27 = vmax.f32 %v544_v23, 0.0  ;;  %v538_v29 = vmul.f32 0.015625, %v534_v25  ;;  %v531_v30 = vmul.f32 0.015625, %v527_v26  ;;  %v581_v33 = vadd.f32 1e-05, %v549_v24 }
 0x1b2   : > { %v580_v31 = vadd.f32 1e-05, %v548_v27  ;;  %v546_v32 = vsub.f32 %v538_v29, %v542_v28  ;;  %573 = vperm.xlu1 %830, %v531_v30   ;;  %v543_v39 = vmul.f32 %v531_v30, %v531_v30 }
 0x1b3   : > { %v535_v35 = vld [vmem:[#allocation4 + $0x18] sm:$0xff] }
 0x1b4   : > { %857 = vrsqrt.f32 %v580_v31  ;;  %v550_v37 = vmax.f32 %v546_v32, 0.0  ;;  %v539_v38 = vmul.f32 0.015625, %v535_v35 }
 0x1b5   : > { %859 = vrsqrt.f32 %v581_v33 }
 0x1b6   : > { %v547_v40 = vsub.f32 %v539_v38, %v543_v39  ;;  %v582_v41 = vadd.f32 1e-05, %v550_v37 }
 0x1b8   : > { %v551_v42 = vmax.f32 %v547_v40, 0.0  ;;  %861 = vrsqrt.f32 %v582_v41 }
 0x1ba   : > { %v583_v44 = vadd.f32 1e-05, %v551_v42 }
 0x1bc   : > { %863 = vrsqrt.f32 %v583_v44 }
 0x1be   : > { %v858_v45 = vpop.eup %857 }
 0x1bf   : > { %590 = vperm.xlu1 %830, %v858_v45   ;;  %v860_v47 = vpop.eup %859 }
 0x1c2   : > { %v862_v48 = vpop.eup %861 }
 0x1c3   : > { %595 = vperm.xlu1 %830, %v860_v47  }
 0x1c6   : > { %v864_v49 = vpop.eup %863 }
 0x1c7   : > { %600 = vperm.xlu1 %830, %v862_v48  }
 0x1cb   : > { %605 = vperm.xlu1 %830, %v864_v49  }
 0x225   : > { %v559_v53 = vpop.permute.xlu0 %558 }
 0x226   : > { %v576_v55 = vsub.f32 %v978_v34, %v559_v53 }
 0x229   : > { %v564_v50 = vpop.permute.xlu1 %563 }
 0x22a   : > { %v577_v56 = vsub.f32 %v980_v36, %v564_v50 }
 0x22d   : > { %v569_v51 = vpop.permute.xlu1 %568 }
 0x22e   : > { %v578_v63 = vsub.f32 %v986_v43, %v569_v51 }
 0x231   : > { %v574_v52 = vpop.permute.xlu1 %573 }
 0x232   : > { %v579_v1 = vsub.f32 %v990_v46, %v574_v52 }
 0x23e   : > { %v591_v54 = vpop.permute.xlu1 %590 }
 0x23f   : > { %v608_v57 = vmul.f32 %v591_v54, %v576_v55 }
 0x241   : > { %v612_v60 = vmax.f32 %v608_v57, 0.0 }
 0x242   : > { %v596_v58 = vpop.permute.xlu1 %595 }
 0x243   : > { %v609_v59 = vmul.f32 %v596_v58, %v577_v56 }
 0x245   : > { %v613_v61 = vmax.f32 %v609_v59, 0.0 }
 0x246   : > { %v601_v62 = vpop.permute.xlu1 %600 }
 0x247   : > { %v754_v0 = vpack.c.bf16 %v613_v61, %v612_v60  ;;  %v610_v34 = vmul.f32 %v601_v62, %v578_v63 }
 0x249   : > { %755 = vst [vmem:[%s166_s4] sm:$0xff] %v754_v0   ;;  %v614_v3 = vmax.f32 %v610_v34, 0.0 }
 0x24a   : > { %v606_v2 = vpop.permute.xlu1 %605 }
 0x24b   : > { %v611_v36 = vmul.f32 %v606_v2, %v579_v1 }
 0x24d   : > { %v615_v4 = vmax.f32 %v611_v36, 0.0 }
 0x24f   : > { %v759_v5 = vpack.c.bf16 %v615_v4, %v614_v3 }
 0x251   : > { %761 = vst [vmem:[%s166_s4 + $0x8] sm:$0xff] %v759_v5  }
 0x252 PF: > { %s12_s11 = sadd.s32 1, %s887_s11   ;;  %s1026_s9 = smov %s883_s10 }
 0x253   : > { %p9_p5 = scmp.ge.s32.totalorder %s12_s11, 4   ;;  %s1027_s10 = smov %s1029_s12 }
 0x255   :  { %11 = sbr.rel (!%p9_p5) target bundleno = 2 (0x2), region = 67 }

// kernel: feature_network_forward.21
= control target key start
LH: loop header
LB: loop body
LE: loop exit
PB: predicated region body
PF: predicated region fallthrough
CT: control target
= control target key end

     0   :  { %v335_v1 = vmov 0.0   ;;  %vm336_vm0 = vmmov 0   ;;  %vm168_vm1 = vcmask 261120   ;;  %s415_s1 = inlined_call_operand.vmem [shape: bf16[1,288,128], index: 1, kind: input, shape index: {}]   ;;  %s416_s0 = inlined_call_operand.vmem [shape: bf16[8,288], index: 0, kind: input, shape index: {}]   ;;  %s417_s2 = inlined_call_operand.vmem [shape: f32[1,8,128], index: 2, kind: output, shape index: {}]  }
   0x1   :  { %v314_v0 = vld [vmem:[%s415_s1 + $0x40] sm:$0xff]   ;;  %304 = vmatprep.subr.bf16.mxu1 %v335_v1  ;;  %308 = vmatprep.mubr.msk.bf16.mxu1 %vm336_vm0, %v335_v1  ;;  %v316_v3 = vld [vmem:[%s415_s1 + $0x48] sm:$0xff]   ;;  %v318_v5 = vld [vmem:[%s415_s1 + $0x50] sm:$0xff]  }
   0x2   :  { %v315_v2 = vld [vmem:[%s415_s1] sm:$0xff]   ;;  %279 = vmatprep.subr.bf16.mxu0 %v314_v0  ;;  %v317_v4 = vld [vmem:[%s415_s1 + $0x8] sm:$0xff]   ;;  %v319_v6 = vld [vmem:[%s415_s1 + $0x10] sm:$0xff]  }
   0x3   :  { %280 = vmatpush3.bf16.msra.mxu0 %v315_v2  ;;  %v320_v7 = vld [vmem:[%s415_s1 + $0x58] sm:$0xff]   ;;  %v322_v9 = vld [vmem:[%s415_s1 + $0x60] sm:$0xff]   ;;  %v324_v12 = vld [vmem:[%s415_s1 + $0x68] sm:$0xff]  }
   0x4   :  { %281 = vmatprep.subr.bf16.mxu0 %v316_v3  ;;  %v321_v8 = vld [vmem:[%s415_s1 + $0x18] sm:$0xff]   ;;  %v328_v10 = vld [vmem:[%s415_s1 + $0x80] sm:$0xff]   ;;  %v331_v13 = vld [vmem:[%s415_s1 + $0x88] sm:$0xff]  }
   0x5   :  { %v323_v11 = vld [vmem:[%s415_s1 + $0x20] sm:$0xff]   ;;  %305 = vmatpush3.bf16.msra.mxu1 %v328_v10  ;;  %v325_v15 = vld [vmem:[%s415_s1 + $0x28] sm:$0xff]   ;;  %v326_v18 = vld [vmem:[%s415_s1 + $0x70] sm:$0xff]  }
   0x6   :  { %306 = vmatprep.subr.bf16.mxu1 %v335_v1  ;;  %v12_v14 = vld [vmem:[%s416_s0] sm:$0xff]  ;;  %v334_v17 = vld [vmem:[%s416_s0 + $0x8] ss:$0 sps:$4 sm:$0xff]   ;;  %v327_v19 = vld [vmem:[%s415_s1 + $0x30] sm:$0xff]  }
   0x7   :  { %282 = vmatpush3.bf16.msra.mxu0 %v317_v4  ;;  %v258_v16 = vcombine.high %v12_v14, %v12_v14  ;;  %v329_v20 = vld [vmem:[%s415_s1 + $0x78] sm:$0xff]   ;;  %v257_v22 = vcombine.low %v12_v14, %v12_v14 }
   0x8   :  { %283 = vmatprep.subr.bf16.mxu0 %v318_v5  ;;  %v330_v21 = vld [vmem:[%s415_s1 + $0x38] sm:$0xff]  }
   0x9   :  { %307 = vmatpush3.bf16.msra.mxu1 %v331_v13  ;;  %204 = vmatprep.mubr.bf16.mxu0 %v258_v16 }
   0xb   :  { %284 = vmatpush3.bf16.msra.mxu0 %v319_v6 }
   0xc   :  { %285 = vmatprep.subr.bf16.mxu0 %v320_v7  ;;  %309 = vmatmul.mubr.msk.bf16.vlgmr.msra.gmra.mrb[0].mxu1 %vm168_vm1, %v334_v17 }
   0xf   :  { %286 = vmatpush3.bf16.msra.mxu0 %v321_v8 }
  0x10   :  { %287 = vmatprep.subr.bf16.mxu0 %v322_v9 }
  0x13   :  { %288 = vmatpush3.bf16.msra.mxu0 %v323_v11 }
  0x14   :  { %289 = vmatprep.subr.bf16.mxu0 %v324_v12 }
  0x17   :  { %290 = vmatpush3.bf16.msra.mxu0 %v325_v15 }
  0x18   :  { %291 = vmatprep.subr.bf16.mxu0 %v326_v18 }
  0x1b   :  { %292 = vmatpush3.bf16.msra.mxu0 %v327_v19 }
  0x1c   :  { %293 = vmatprep.subr.bf16.mxu0 %v329_v20 }
  0x1f   :  { %294 = vmatpush3.bf16.msra.mxu0 %v330_v21 }
  0x22   :  { %205 = vmatmul.mubr.bf16.vlgmr.msra.gmra.mrb[0].mxu0 %v257_v22 }
  0xdf   :  { %v246_v23 = vpop.f32.mrb[0].mxu1 }
  0xe0   :  { %v310_v24 = vpop.f32.mrb[1].mxu1 }
  0xe1   :  { %v249_v25 = vpop.f32.mrb[2].mxu1 }
  0xe2   :  { %v311_v26 = vpop.f32.mrb[3].mxu1 }
  0xf5   :  { %v295_v27 = vpop.f32.mrb[0].mxu0 }
  0xf6   :  { %v296_v28 = vpop.f32.mrb[1].mxu0 }
  0xf7   :  { %v297_v29 = vadd.f32 %v296_v28, %v295_v27  ;;  %v298_v30 = vpop.f32.mrb[2].mxu0 }
  0xf8   :  { %v299_v31 = vpop.f32.mrb[3].mxu0 }
  0xf9   :  { %v247_v32 = vadd.f32 %v297_v29, %v246_v23 }
  0xfb   :  { %252 = vst [vmem:[%s417_s2] sm:$0xff] %v247_v32 }

// kernel: squeeze.1
= control target key start
LH: loop header
LB: loop body
LE: loop exit
PB: predicated region body
PF: predicated region fallthrough
CT: control target
= control target key end

     0   :  { %vm3_vm0 = vcmask 523264   ;;  %s113_s0 = inlined_call_operand.vmem [shape: f32[1,8,128], index: 0, kind: input, shape index: {}]   ;;  %s114_s1 = inlined_call_operand.vmem [shape: f32[8,2,64], index: 1, kind: output, shape index: {}]  }
   0x1   :  { %v6_v0 = vld [vmem:[%s113_s0] sm:$0xff]   ;;  %s75_s0 = smov 64  }
   0x2   :  { %7 = vrot.lane.b32.xlu0 %v6_v0, %s75_s0  ;;  %4 = vst.msk [vmem:[#allocation0] ss:$8 sm:$0xf] %vm3_vm0, %v6_v0   ;;  %5 = vst.msk [vmem:[#allocation0] ss:$8 sm:$0xf0] %vm3_vm0, %v6_v0  }
  0x74   :  { %v8_v1 = vpop.permute.xlu0 %7  }
  0x75   :  { %11 = vst.msk [vmem:[#allocation0 + $0x1] ss:$8 sm:$0xf] %vm3_vm0, %v8_v1   ;;  %13 = vst.msk [vmem:[#allocation0 + $0x1] ss:$8 sm:$0xf0] %vm3_vm0, %v8_v1  }
  0x7c   :  { %v17_v2 = vld [vmem:[#allocation0] sm:$0x3]  ;;  %v21_v3 = vld [vmem:[#allocation0 + $0x8] sm:$0x3]  ;;  %v26_v4 = vld [vmem:[#allocation0 + $0x10] sm:$0x3] }
  0x7d   :  { %19 = vst [vmem:[%s114_s1] sm:$0x3] %v17_v2  ;;  %67 = vst [vmem:[%s114_s1 + $0x2] sm:$0x3] %v21_v3  ;;  %v32_v5 = vld [vmem:[#allocation0 + $0x18] sm:$0x3] }
  0x7e   :  { %68 = vst [vmem:[%s114_s1 + $0x4] sm:$0x3] %v26_v4  ;;  %v38_v6 = vld [vmem:[#allocation0 + $0x20] sm:$0x3]  ;;  %v44_v7 = vld [vmem:[#allocation0 + $0x28] sm:$0x3] }
  0x7f   :  { %69 = vst [vmem:[%s114_s1 + $0x6] sm:$0x3] %v32_v5  ;;  %70 = vst [vmem:[%s114_s1 + $0x8] sm:$0x3] %v38_v6  ;;  %v50_v8 = vld [vmem:[#allocation0 + $0x30] sm:$0x3] }
  0x80   :  { %71 = vst [vmem:[%s114_s1 + $0xa] sm:$0x3] %v44_v7  ;;  %v56_v9 = vld [vmem:[#allocation0 + $0x38] sm:$0x3]  ;;  %72 = vst [vmem:[%s114_s1 + $0xc] sm:$0x3] %v50_v8 }
  0x81   :  { %73 = vst [vmem:[%s114_s1 + $0xe] sm:$0x3] %v56_v9 }

// kernel: feature_network_forward.25
= control target key start
LH: loop header
LB: loop body
LE: loop exit
PB: predicated region body
PF: predicated region fallthrough
CT: control target
= control target key end

     0   :  { %s1734_s9 = smov 0   ;;  %s1736_s10 = smov 0   ;;  %s1955_s0 = inlined_call_operand.vmem [shape: bf16[8,288], index: 0, kind: input, shape index: {}]   ;;  %s1956_s1 = inlined_call_operand.vmem [shape: bf16[2,288,1024], index: 1, kind: input, shape index: {}]   ;;  %s1957_s2 = inlined_call_operand.vmem [shape: f32[2,8,1024], index: 2, kind: output, shape index: {}]  }
   0x1   :  { %s1738_s11 = smov 0  }
   0x2 LB: > { %s24_s12 = sadd.s32 1, %s1712_s10  ;;  %p1491_p0 = scmp.ge.s32.totalorder %s1716_s11, 1  ;;  %s1716_s11 = sphi %s1738_s11, %s12_s11   ;;  %s1712_s10 = sphi %s1736_s10, %s1959_s10   ;;  %s1708_s9 = sphi %s1734_s9, %s1958_s9  }
   0x3   : > { %p26_p1 = scmp.ge.s32.totalorder %s24_s12, 2  ;;  %p133_p2 = scmp.lt.s32.totalorder %s1716_s11, 3 }
   0x5   : > { %s1961_s12 = smov (%p26_p1, %s24_s12), 0  ;;  %p134_p3 = pnand %p1491_p0, %p133_p2 }
   0x6   : > { %p164_p4 = scmp.lt.s32.totalorder (!%p134_p3), %s1708_s9, 1  ;;  %v1755_v0 = vld [vmem:[%s1955_s0] sm:$0xff] (!%p134_p3)  ;;  %vm1060_vm0 = vcmask (!%p134_p3), 261120  }
   0x7   : > { %137 = sbr.rel (%p134_p3) target bundleno = 389 (0x185), region = 28  ;;  %v1759_v1 = vcombine.high (!%p134_p3), %v1755_v0, %v1755_v0 }
   0x9   : > { %1096 = vmatprep.mubr.bf16.mxu0 (!%p134_p3), %v1759_v1  ;;  %1178 = vmatprep.mubr.bf16.mxu1 (!%p134_p3), %v1759_v1 }
   0xe   : > { %s1963_s9 = smov (!%p164_p4, %s1708_s9), 1 }
   0xf   : > { %s1665_s15 = smul.u32 1152, %s1963_s9  ;;  %s1648_s21 = sshll.u32 %s1963_s9, 6 }
  0x10   : > { %s181_s24 = scalar_lea.vmem %s1957_s2, %s1648_s21 }
  0x11   : > { %s1769_s18 = scalar_lea.vmem %s1956_s1, %s1665_s15 }
  0x12   : > { %v186_v2 = vld [vmem:[%s1769_s18] sm:$0xff]  ;;  %v187_v4 = vld [vmem:[%s1769_s18 + $0x8] sm:$0xff] }
  0x13   : > { %v190_v3 = vld [vmem:[%s1769_s18 + $0x20] sm:$0xff]  ;;  %v191_v6 = vld [vmem:[%s1769_s18 + $0x28] sm:$0xff] }
  0x14   : > { %v1499_v5 = vcombine.high %v186_v2, %v190_v3  ;;  %v1498_v7 = vcombine.low %v186_v2, %v190_v3  ;;  %v194_v8 = vld [vmem:[%s1769_s18 + $0x40] sm:$0xff]  ;;  %v1501_v10 = vcombine.high %v187_v4, %v191_v6  ;;  %v1500_v11 = vcombine.low %v187_v4, %v191_v6  ;;  %v195_v13 = vld [vmem:[%s1769_s18 + $0x48] sm:$0xff] }
  0x15   : > { %v198_v9 = vld [vmem:[%s1769_s18 + $0x60] sm:$0xff]  ;;  %v199_v14 = vld [vmem:[%s1769_s18 + $0x68] sm:$0xff] }
  0x16   : > { %v1507_v12 = vcombine.high %v194_v8, %v198_v9  ;;  %v202_v15 = vld [vmem:[%s1769_s18 + $0x80] sm:$0xff]  ;;  %1064 = vmatprep.subr.bf16.mxu0 %v1499_v5  ;;  %v1509_v16 = vcombine.high %v195_v13, %v199_v14  ;;  %v203_v18 = vld [vmem:[%s1769_s18 + $0x88] sm:$0xff]  ;;  %1146 = vmatprep.subr.bf16.mxu1 %v1501_v10  ;;  %v1506_v20 = vcombine.low %v194_v8, %v198_v9 }
  0x17   : > { %v206_v17 = vld [vmem:[%s1769_s18 + $0xa0] sm:$0xff]  ;;  %v207_v19 = vld [vmem:[%s1769_s18 + $0xa8] sm:$0xff]  ;;  %1065 = vmatpush1.bf16.msra.mxu0 %v1498_v7  ;;  %1147 = vmatpush1.bf16.msra.mxu1 %v1500_v11  ;;  %v1508_v21 = vcombine.low %v195_v13, %v199_v14 }
  0x18   : > { %1066 = vmatprep.subr.bf16.mxu0 %v1507_v12  ;;  %v1515_v22 = vcombine.high %v202_v15, %v206_v17  ;;  %1148 = vmatprep.subr.bf16.mxu1 %v1509_v16  ;;  %v1517_v23 = vcombine.high %v203_v18, %v207_v19  ;;  %v210_v24 = vld [vmem:[%s1769_s18 + $0xc0] sm:$0xff]  ;;  %v211_v26 = vld [vmem:[%s1769_s18 + $0xc8] sm:$0xff]  ;;  %v1514_v28 = vcombine.low %v202_v15, %v206_v17 }
  0x19   : > { %v214_v25 = vld [vmem:[%s1769_s18 + $0xe0] sm:$0xff]  ;;  %v215_v27 = vld [vmem:[%s1769_s18 + $0xe8] sm:$0xff]  ;;  %v1516_v29 = vcombine.low %v203_v18, %v207_v19 }
  0x1a   : > { %v1523_v30 = vcombine.high %v210_v24, %v214_v25  ;;  %v1525_v31 = vcombine.high %v211_v26, %v215_v27  ;;  %v218_v32 = vld [vmem:[%s1769_s18 + $0x100] sm:$0xff]  ;;  %v219_v34 = vld [vmem:[%s1769_s18 + $0x108] sm:$0xff]  ;;  %v1522_v36 = vcombine.low %v210_v24, %v214_v25  ;;  %v1524_v37 = vcombine.low %v211_v26, %v215_v27 }
  0x1b   : > { %1067 = vmatpush1.bf16.msra.mxu0 %v1506_v20  ;;  %1149 = vmatpush1.bf16.msra.mxu1 %v1508_v21  ;;  %v222_v33 = vld [vmem:[%s1769_s18 + $0x120] sm:$0xff]  ;;  %v223_v35 = vld [vmem:[%s1769_s18 + $0x128] sm:$0xff] }
  0x1c   : > { %1068 = vmatprep.subr.bf16.mxu0 %v1515_v22  ;;  %1150 = vmatprep.subr.bf16.mxu1 %v1517_v23  ;;  %v1531_v38 = vcombine.high %v218_v32, %v222_v33  ;;  %v1533_v39 = vcombine.high %v219_v34, %v223_v35  ;;  %v226_v40 = vld [vmem:[%s1769_s18 + $0x140] sm:$0xff]  ;;  %v227_v42 = vld [vmem:[%s1769_s18 + $0x148] sm:$0xff]  ;;  %v1530_v44 = vcombine.low %v218_v32, %v222_v33 }
  0x1d   : > { %v230_v41 = vld [vmem:[%s1769_s18 + $0x160] sm:$0xff]  ;;  %v231_v43 = vld [vmem:[%s1769_s18 + $0x168] sm:$0xff]  ;;  %v1532_v45 = vcombine.low %v219_v34, %v223_v35 }
  0x1e   : > { %v1539_v46 = vcombine.high %v226_v40, %v230_v41  ;;  %v1541_v47 = vcombine.high %v227_v42, %v231_v43  ;;  %v234_v48 = vld [vmem:[%s1769_s18 + $0x180] sm:$0xff]  ;;  %v235_v50 = vld [vmem:[%s1769_s18 + $0x188] sm:$0xff]  ;;  %v1538_v52 = vcombine.low %v226_v40, %v230_v41  ;;  %v1540_v53 = vcombine.low %v227_v42, %v231_v43 }
  0x1f   : > { %1069 = vmatpush1.bf16.msra.mxu0 %v1514_v28  ;;  %1151 = vmatpush1.bf16.msra.mxu1 %v1516_v29  ;;  %v238_v49 = vld [vmem:[%s1769_s18 + $0x1a0] sm:$0xff]  ;;  %v239_v51 = vld [vmem:[%s1769_s18 + $0x1a8] sm:$0xff] }
  0x20   : > { %1070 = vmatprep.subr.bf16.mxu0 %v1523_v30  ;;  %1152 = vmatprep.subr.bf16.mxu1 %v1525_v31  ;;  %v1547_v54 = vcombine.high %v234_v48, %v238_v49  ;;  %v1549_v55 = vcombine.high %v235_v50, %v239_v51  ;;  %v242_v56 = vld [vmem:[%s1769_s18 + $0x1c0] sm:$0xff]  ;;  %v243_v58 = vld [vmem:[%s1769_s18 + $0x1c8] sm:$0xff]  ;;  %v1546_v60 = vcombine.low %v234_v48, %v238_v49 }
  0x21   : > { %v246_v57 = vld [vmem:[%s1769_s18 + $0x1e0] sm:$0xff]  ;;  %v247_v59 = vld [vmem:[%s1769_s18 + $0x1e8] sm:$0xff]  ;;  %v1548_v61 = vcombine.low %v235_v50, %v239_v51 }
  0x22   : > { %v1555_v62 = vcombine.high %v242_v56, %v246_v57  ;;  %v1557_v63 = vcombine.high %v243_v58, %v247_v59  ;;  %v250_v2 = vld [vmem:[%s1769_s18 + $0x200] sm:$0xff]  ;;  %v251_v4 = vld [vmem:[%s1769_s18 + $0x208] sm:$0xff]  ;;  %v1554_v6 = vcombine.low %v242_v56, %v246_v57  ;;  %v1556_v7 = vcombine.low %v243_v58, %v247_v59 }
  0x23   : > { %1071 = vmatpush1.bf16.msra.mxu0 %v1522_v36  ;;  %1153 = vmatpush1.bf16.msra.mxu1 %v1524_v37  ;;  %v254_v3 = vld [vmem:[%s1769_s18 + $0x220] sm:$0xff]  ;;  %v255_v5 = vld [vmem:[%s1769_s18 + $0x228] sm:$0xff] }
  0x24   : > { %1072 = vmatprep.subr.bf16.mxu0 %v1531_v38  ;;  %1154 = vmatprep.subr.bf16.mxu1 %v1533_v39  ;;  %v1563_v8 = vcombine.high %v250_v2, %v254_v3  ;;  %v1565_v9 = vcombine.high %v251_v4, %v255_v5  ;;  %v258_v10 = vld [vmem:[%s1769_s18 + $0x240] sm:$0xff]  ;;  %v259_v12 = vld [vmem:[%s1769_s18 + $0x248] sm:$0xff]  ;;  %v1562_v14 = vcombine.low %v250_v2, %v254_v3 }
  0x25   : > { %v262_v11 = vld [vmem:[%s1769_s18 + $0x260] sm:$0xff]  ;;  %v263_v13 = vld [vmem:[%s1769_s18 + $0x268] sm:$0xff]  ;;  %v1564_v15 = vcombine.low %v251_v4, %v255_v5 }
  0x26   : > { %v1571_v16 = vcombine.high %v258_v10, %v262_v11  ;;  %v1573_v17 = vcombine.high %v259_v12, %v263_v13  ;;  %v266_v18 = vld [vmem:[%s1769_s18 + $0x280] sm:$0xff]  ;;  %v267_v20 = vld [vmem:[%s1769_s18 + $0x288] sm:$0xff]  ;;  %v1570_v22 = vcombine.low %v258_v10, %v262_v11  ;;  %v1572_v23 = vcombine.low %v259_v12, %v263_v13 }
  0x27   : > { %1073 = vmatpush1.bf16.msra.mxu0 %v1530_v44  ;;  %1155 = vmatpush1.bf16.msra.mxu1 %v1532_v45  ;;  %v270_v19 = vld [vmem:[%s1769_s18 + $0x2a0] sm:$0xff]  ;;  %v271_v21 = vld [vmem:[%s1769_s18 + $0x2a8] sm:$0xff] }
  0x28   : > { %1074 = vmatprep.subr.bf16.mxu0 %v1539_v46  ;;  %1156 = vmatprep.subr.bf16.mxu1 %v1541_v47  ;;  %v1579_v24 = vcombine.high %v266_v18, %v270_v19  ;;  %v1581_v25 = vcombine.high %v267_v20, %v271_v21  ;;  %v274_v26 = vld [vmem:[%s1769_s18 + $0x2c0] sm:$0xff]  ;;  %v275_v28 = vld [vmem:[%s1769_s18 + $0x2c8] sm:$0xff]  ;;  %v1578_v30 = vcombine.low %v266_v18, %v270_v19 }
  0x29   : > { %v278_v27 = vld [vmem:[%s1769_s18 + $0x2e0] sm:$0xff]  ;;  %v279_v29 = vld [vmem:[%s1769_s18 + $0x2e8] sm:$0xff]  ;;  %v1580_v31 = vcombine.low %v267_v20, %v271_v21  ;;  %v188_v21 = vld [vmem:[%s1769_s18 + $0x10] sm:$0xff] }
  0x2a   : > { %v1587_v32 = vcombine.high %v274_v26, %v278_v27  ;;  %v1589_v33 = vcombine.high %v275_v28, %v279_v29  ;;  %v282_v34 = vld [vmem:[%s1769_s18 + $0x300] sm:$0xff]  ;;  %v283_v36 = vld [vmem:[%s1769_s18 + $0x308] sm:$0xff]  ;;  %v1586_v38 = vcombine.low %v274_v26, %v278_v27  ;;  %v1588_v39 = vcombine.low %v275_v28, %v279_v29  ;;  %v196_v29 = vld [vmem:[%s1769_s18 + $0x50] sm:$0xff] }
  0x2b   : > { %1075 = vmatpush1.bf16.msra.mxu0 %v1538_v52  ;;  %1157 = vmatpush1.bf16.msra.mxu1 %v1540_v53  ;;  %v286_v35 = vld [vmem:[%s1769_s18 + $0x320] sm:$0xff]  ;;  %v287_v37 = vld [vmem:[%s1769_s18 + $0x328] sm:$0xff]  ;;  %v1718_v27 = vmov 0  }
  0x2c   : > { %1076 = vmatprep.subr.bf16.mxu0 %v1547_v54  ;;  %1158 = vmatprep.subr.bf16.mxu1 %v1549_v55  ;;  %v1595_v40 = vcombine.high %v282_v34, %v286_v35  ;;  %v1597_v41 = vcombine.high %v283_v36, %v287_v37  ;;  %v290_v42 = vld [vmem:[%s1769_s18 + $0x340] sm:$0xff]  ;;  %v291_v44 = vld [vmem:[%s1769_s18 + $0x348] sm:$0xff]  ;;  %v1594_v46 = vcombine.low %v282_v34, %v286_v35 }
  0x2d   : > { %v294_v43 = vld [vmem:[%s1769_s18 + $0x360] sm:$0xff]  ;;  %v295_v45 = vld [vmem:[%s1769_s18 + $0x368] sm:$0xff]  ;;  %v1596_v47 = vcombine.low %v283_v36, %v287_v37 }
  0x2e   : > { %v1603_v48 = vcombine.high %v290_v42, %v294_v43  ;;  %v1605_v49 = vcombine.high %v291_v44, %v295_v45  ;;  %v298_v50 = vld [vmem:[%s1769_s18 + $0x380] sm:$0xff]  ;;  %v299_v52 = vld [vmem:[%s1769_s18 + $0x388] sm:$0xff]  ;;  %v1602_v54 = vcombine.low %v290_v42, %v294_v43  ;;  %v1604_v55 = vcombine.low %v291_v44, %v295_v45 }
  0x2f   : > { %1077 = vmatpush1.bf16.msra.mxu0 %v1546_v60  ;;  %1159 = vmatpush1.bf16.msra.mxu1 %v1548_v61  ;;  %v302_v51 = vld [vmem:[%s1769_s18 + $0x3a0] sm:$0xff]  ;;  %v303_v53 = vld [vmem:[%s1769_s18 + $0x3a8] sm:$0xff] }
  0x30   : > { %1078 = vmatprep.subr.bf16.mxu0 %v1555_v62  ;;  %1160 = vmatprep.subr.bf16.mxu1 %v1557_v63  ;;  %v1611_v56 = vcombine.high %v298_v50, %v302_v51  ;;  %v1613_v57 = vcombine.high %v299_v52, %v303_v53  ;;  %v306_v58 = vld [vmem:[%s1769_s18 + $0x3c0] sm:$0xff]  ;;  %v307_v60 = vld [vmem:[%s1769_s18 + $0x3c8] sm:$0xff]  ;;  %v1610_v62 = vcombine.low %v298_v50, %v302_v51 }
  0x31   : > { %v310_v59 = vld [vmem:[%s1769_s18 + $0x3e0] sm:$0xff]  ;;  %v311_v61 = vld [vmem:[%s1769_s18 + $0x3e8] sm:$0xff]  ;;  %v1612_v63 = vcombine.low %v299_v52, %v303_v53 }
  0x32   : > { %v1619_v2 = vcombine.high %v306_v58, %v310_v59  ;;  %v1621_v3 = vcombine.high %v307_v60, %v311_v61  ;;  %v314_v4 = vld [vmem:[%s1769_s18 + $0x400] sm:$0xff] }
  0x33   : > { %1079 = vmatpush1.bf16.msra.mxu0 %v1554_v6  ;;  %1161 = vmatpush1.bf16.msra.mxu1 %v1556_v7  ;;  %v318_v5 = vld [vmem:[%s1769_s18 + $0x420] sm:$0xff]  ;;  %v315_v6 = vld [vmem:[%s1769_s18 + $0x408] sm:$0xff] }
  0x34   : > { %1080 = vmatprep.subr.bf16.mxu0 %v1563_v8  ;;  %1162 = vmatprep.subr.bf16.mxu1 %v1565_v9  ;;  %v319_v7 = vld [vmem:[%s1769_s18 + $0x428] sm:$0xff]  ;;  %v1618_v8 = vcombine.low %v306_v58, %v310_v59  ;;  %v1620_v9 = vcombine.low %v307_v60, %v311_v61  ;;  %v1627_v10 = vcombine.high %v314_v4, %v318_v5  ;;  %v322_v12 = vld [vmem:[%s1769_s18 + $0x440] sm:$0xff]  ;;  %v228_v61 = vld [vmem:[%s1769_s18 + $0x150] sm:$0xff] }
  0x35   : > { %v1629_v11 = vcombine.high %v315_v6, %v319_v7  ;;  %v326_v13 = vld [vmem:[%s1769_s18 + $0x460] sm:$0xff]  ;;  %v1628_v18 = vcombine.low %v315_v6, %v319_v7  ;;  %v236_v7 = vld [vmem:[%s1769_s18 + $0x190] sm:$0xff] }
  0x36   : > { %v1635_v19 = vcombine.high %v322_v12, %v326_v13 }
  0x37   : > { %1081 = vmatpush1.bf16.msra.mxu0 %v1562_v14  ;;  %1163 = vmatpush1.bf16.msra.mxu1 %v1564_v15  ;;  %v1843_v14 = vcombine.low %v1755_v0, %v1755_v0  ;;  %v323_v15 = vld [vmem:[%s1769_s18 + $0x448] sm:$0xff]  ;;  %v1634_v0 = vcombine.low %v322_v12, %v326_v13 }
  0x38   : > { %1082 = vmatprep.subr.bf16.mxu0 %v1571_v16  ;;  %1164 = vmatprep.subr.bf16.mxu1 %v1573_v17  ;;  %v327_v16 = vld [vmem:[%s1769_s18 + $0x468] sm:$0xff]  ;;  %v1626_v17 = vcombine.low %v314_v4, %v318_v5 }
  0x39   : > { %v1637_v20 = vcombine.high %v323_v15, %v327_v16 }
  0x3b   : > { %1083 = vmatpush1.bf16.msra.mxu0 %v1570_v22  ;;  %1165 = vmatpush1.bf16.msra.mxu1 %v1572_v23  ;;  %v192_v22 = vld [vmem:[%s1769_s18 + $0x30] sm:$0xff]  ;;  %v189_v23 = vld [vmem:[%s1769_s18 + $0x18] sm:$0xff] }
  0x3c   : > { %1084 = vmatprep.subr.bf16.mxu0 %v1579_v24  ;;  %1166 = vmatprep.subr.bf16.mxu1 %v1581_v25  ;;  %v193_v24 = vld [vmem:[%s1769_s18 + $0x38] sm:$0xff]  ;;  %v1636_v25 = vcombine.low %v323_v15, %v327_v16  ;;  %v1503_v26 = vcombine.high %v188_v21, %v192_v22  ;;  %v1502_v34 = vcombine.low %v188_v21, %v192_v22  ;;  %v244_v16 = vld [vmem:[%s1769_s18 + $0x1d0] sm:$0xff] }
  0x3d   : > { %v1505_v28 = vcombine.high %v189_v23, %v193_v24  ;;  %v1504_v35 = vcombine.low %v189_v23, %v193_v24  ;;  %v252_v24 = vld [vmem:[%s1769_s18 + $0x210] sm:$0xff] }
  0x3f   : > { %1085 = vmatpush1.bf16.msra.mxu0 %v1578_v30  ;;  %1167 = vmatpush1.bf16.msra.mxu1 %v1580_v31  ;;  %v200_v30 = vld [vmem:[%s1769_s18 + $0x70] sm:$0xff]  ;;  %v1860_v31 = vld [vmem:[%s1955_s0 + $0x8] ss:$0 sps:$4 sm:$0xff]  }
  0x40   : > { %1086 = vmatprep.subr.bf16.mxu0 %v1587_v32  ;;  %1168 = vmatprep.subr.bf16.mxu1 %v1589_v33  ;;  %v197_v32 = vld [vmem:[%s1769_s18 + $0x58] sm:$0xff]  ;;  %v1511_v36 = vcombine.high %v196_v29, %v200_v30  ;;  %v1510_v42 = vcombine.low %v196_v29, %v200_v30 }
  0x41   : > { %v201_v33 = vld [vmem:[%s1769_s18 + $0x78] sm:$0xff] }
  0x42   : > { %v1513_v37 = vcombine.high %v197_v32, %v201_v33  ;;  %v1512_v43 = vcombine.low %v197_v32, %v201_v33  ;;  %v260_v33 = vld [vmem:[%s1769_s18 + $0x250] sm:$0xff] }
  0x43   : > { %1087 = vmatpush1.bf16.msra.mxu0 %v1586_v38  ;;  %1169 = vmatpush1.bf16.msra.mxu1 %v1588_v39  ;;  %v204_v38 = vld [vmem:[%s1769_s18 + $0x90] sm:$0xff] }
  0x44   : > { %1088 = vmatprep.subr.bf16.mxu0 %v1595_v40  ;;  %1170 = vmatprep.subr.bf16.mxu1 %v1597_v41  ;;  %v208_v39 = vld [vmem:[%s1769_s18 + $0xb0] sm:$0xff]  ;;  %v205_v40 = vld [vmem:[%s1769_s18 + $0x98] sm:$0xff] }
  0x45   : > { %v209_v41 = vld [vmem:[%s1769_s18 + $0xb8] sm:$0xff]  ;;  %v1519_v44 = vcombine.high %v204_v38, %v208_v39  ;;  %v1518_v50 = vcombine.low %v204_v38, %v208_v39 }
  0x46   : > { %v1521_v45 = vcombine.high %v205_v40, %v209_v41  ;;  %v1520_v51 = vcombine.low %v205_v40, %v209_v41  ;;  %v268_v41 = vld [vmem:[%s1769_s18 + $0x290] sm:$0xff] }
  0x47   : > { %1089 = vmatpush1.bf16.msra.mxu0 %v1594_v46  ;;  %1171 = vmatpush1.bf16.msra.mxu1 %v1596_v47  ;;  %v212_v46 = vld [vmem:[%s1769_s18 + $0xd0] sm:$0xff] }
  0x48   : > { %1090 = vmatprep.subr.bf16.mxu0 %v1603_v48  ;;  %1172 = vmatprep.subr.bf16.mxu1 %v1605_v49  ;;  %v216_v47 = vld [vmem:[%s1769_s18 + $0xf0] sm:$0xff]  ;;  %v213_v48 = vld [vmem:[%s1769_s18 + $0xd8] sm:$0xff] }
  0x49   : > { %v217_v49 = vld [vmem:[%s1769_s18 + $0xf8] sm:$0xff]  ;;  %v1527_v52 = vcombine.high %v212_v46, %v216_v47  ;;  %v1526_v58 = vcombine.low %v212_v46, %v216_v47 }
  0x4a   : > { %v1529_v53 = vcombine.high %v213_v48, %v217_v49 }
  0x4b   : > { %1091 = vmatpush1.bf16.msra.mxu0 %v1602_v54  ;;  %1173 = vmatpush1.bf16.msra.mxu1 %v1604_v55  ;;  %v220_v54 = vld [vmem:[%s1769_s18 + $0x110] sm:$0xff] }
  0x4c   : > { %1092 = vmatprep.subr.bf16.mxu0 %v1611_v56  ;;  %1174 = vmatprep.subr.bf16.mxu1 %v1613_v57  ;;  %v224_v55 = vld [vmem:[%s1769_s18 + $0x130] sm:$0xff]  ;;  %v221_v56 = vld [vmem:[%s1769_s18 + $0x118] sm:$0xff] }
  0x4d   : > { %v225_v57 = vld [vmem:[%s1769_s18 + $0x138] sm:$0xff]  ;;  %v1535_v59 = vcombine.high %v220_v54, %v224_v55 }
  0x4e   : > { %v1537_v60 = vcombine.high %v221_v56, %v225_v57  ;;  %v1536_v4 = vcombine.low %v221_v56, %v225_v57  ;;  %v284_v57 = vld [vmem:[%s1769_s18 + $0x310] sm:$0xff] }
  0x4f   : > { %1093 = vmatpush1.bf16.msra.mxu0 %v1610_v62  ;;  %1175 = vmatpush1.bf16.msra.mxu1 %v1612_v63  ;;  %v232_v62 = vld [vmem:[%s1769_s18 + $0x170] sm:$0xff]  ;;  %v229_v63 = vld [vmem:[%s1769_s18 + $0x158] sm:$0xff] }
  0x50   : > { %1094 = vmatprep.subr.bf16.mxu0 %v1619_v2  ;;  %1176 = vmatprep.subr.bf16.mxu1 %v1621_v3  ;;  %v233_v2 = vld [vmem:[%s1769_s18 + $0x178] sm:$0xff]  ;;  %v1534_v3 = vcombine.low %v220_v54, %v224_v55  ;;  %v1543_v5 = vcombine.high %v228_v61, %v232_v62 }
  0x51   : > { %v1545_v6 = vcombine.high %v229_v63, %v233_v2  ;;  %v1544_v12 = vcombine.low %v229_v63, %v233_v2  ;;  %v292_v2 = vld [vmem:[%s1769_s18 + $0x350] sm:$0xff] }
  0x53   : > { %1095 = vmatpush1.bf16.msra.mxu0 %v1618_v8  ;;  %1177 = vmatpush1.bf16.msra.mxu1 %v1620_v9  ;;  %v240_v8 = vld [vmem:[%s1769_s18 + $0x1b0] sm:$0xff]  ;;  %v237_v9 = vld [vmem:[%s1769_s18 + $0x198] sm:$0xff] }
  0x54   : > { %1105 = vmatprep.subr.bf16.mxu0 %v1627_v10  ;;  %1187 = vmatprep.subr.bf16.mxu1 %v1629_v11  ;;  %v241_v10 = vld [vmem:[%s1769_s18 + $0x1b8] sm:$0xff]  ;;  %v1542_v11 = vcombine.low %v228_v61, %v232_v62  ;;  %v1551_v13 = vcombine.high %v236_v7, %v240_v8 }
  0x55   : > { %v1553_v15 = vcombine.high %v237_v9, %v241_v10  ;;  %v1552_v21 = vcombine.low %v237_v9, %v241_v10  ;;  %v300_v10 = vld [vmem:[%s1769_s18 + $0x390] sm:$0xff] }
  0x56   : > { %1097 = vmatmul.mubr.bf16.vlgmr.msra.gmra.mrb[0].mxu0 %v1843_v14  ;;  %1179 = vmatmul.mubr.bf16.vlgmr.msra.gmra.mrb[0].mxu1 %v1843_v14 }
  0x57   : > { %1106 = vmatpush1.bf16.msra.mxu0 %v1626_v17  ;;  %1188 = vmatpush1.bf16.msra.mxu1 %v1628_v18  ;;  %v248_v17 = vld [vmem:[%s1769_s18 + $0x1f0] sm:$0xff]  ;;  %v245_v18 = vld [vmem:[%s1769_s18 + $0x1d8] sm:$0xff] }
  0x58   : > { %1107 = vmatprep.subr.bf16.mxu0 %v1635_v19  ;;  %1189 = vmatprep.subr.bf16.mxu1 %v1637_v20  ;;  %v249_v19 = vld [vmem:[%s1769_s18 + $0x1f8] sm:$0xff]  ;;  %v1550_v20 = vcombine.low %v236_v7, %v240_v8  ;;  %v1559_v22 = vcombine.high %v244_v16, %v248_v17 }
  0x59   : > { %1137 = vmatprep.mubr.bf16.mxu0 %v1718_v27  ;;  %1219 = vmatprep.mubr.bf16.mxu1 %v1718_v27  ;;  %v1561_v23 = vcombine.high %v245_v18, %v249_v19  ;;  %v1560_v29 = vcombine.low %v245_v18, %v249_v19  ;;  %v308_v19 = vld [vmem:[%s1769_s18 + $0x3d0] sm:$0xff] }
  0x5b   : > { %1108 = vmatpush1.bf16.msra.mxu0 %v1634_v0  ;;  %1190 = vmatpush1.bf16.msra.mxu1 %v1636_v25  ;;  %v256_v0 = vld [vmem:[%s1769_s18 + $0x230] sm:$0xff]  ;;  %v253_v25 = vld [vmem:[%s1769_s18 + $0x218] sm:$0xff] }
  0x5c   : > { %1228 = vmatprep.subr.bf16.mxu0 %v1503_v26  ;;  %1310 = vmatprep.subr.bf16.mxu1 %v1505_v28  ;;  %v257_v26 = vld [vmem:[%s1769_s18 + $0x238] sm:$0xff]  ;;  %v1558_v28 = vcombine.low %v244_v16, %v248_v17  ;;  %v1567_v30 = vcombine.high %v252_v24, %v256_v0 }
  0x5d   : > { %v1569_v32 = vcombine.high %v253_v25, %v257_v26  ;;  %v1568_v38 = vcombine.low %v253_v25, %v257_v26  ;;  %v316_v26 = vld [vmem:[%s1769_s18 + $0x410] sm:$0xff] }
  0x62   : > { %1642 = vmatmul.mubr.msk.bf16.vlgmr.msra.gmra.mrb[0].mxu0 %vm1060_vm0, %v1860_v31  ;;  %1643 = vmatmul.mubr.msk.bf16.vlgmr.msra.gmra.mrb[0].mxu1 %vm1060_vm0, %v1860_v31 }
  0x63   : > { %1229 = vmatpush1.bf16.msra.mxu0 %v1502_v34  ;;  %1311 = vmatpush1.bf16.msra.mxu1 %v1504_v35  ;;  %v264_v34 = vld [vmem:[%s1769_s18 + $0x270] sm:$0xff]  ;;  %v261_v35 = vld [vmem:[%s1769_s18 + $0x258] sm:$0xff] }
  0x64   : > { %1230 = vmatprep.subr.bf16.mxu0 %v1511_v36  ;;  %1312 = vmatprep.subr.bf16.mxu1 %v1513_v37  ;;  %v265_v36 = vld [vmem:[%s1769_s18 + $0x278] sm:$0xff]  ;;  %v1566_v37 = vcombine.low %v252_v24, %v256_v0  ;;  %v1575_v39 = vcombine.high %v260_v33, %v264_v34 }
  0x65   : > { %1260 = vmatprep.mubr.bf16.mxu0 %v1759_v1  ;;  %1342 = vmatprep.mubr.bf16.mxu1 %v1759_v1  ;;  %v1528_v1 = vcombine.low %v213_v48, %v217_v49  ;;  %v1577_v40 = vcombine.high %v261_v35, %v265_v36  ;;  %v1576_v46 = vcombine.low %v261_v35, %v265_v36  ;;  %v276_v49 = vld [vmem:[%s1769_s18 + $0x2d0] sm:$0xff] }
  0x66   : > { %v324_v36 = vld [vmem:[%s1769_s18 + $0x450] sm:$0xff] }
  0x67   : > { %1231 = vmatpush1.bf16.msra.mxu0 %v1510_v42  ;;  %1313 = vmatpush1.bf16.msra.mxu1 %v1512_v43  ;;  %v272_v42 = vld [vmem:[%s1769_s18 + $0x2b0] sm:$0xff]  ;;  %v269_v43 = vld [vmem:[%s1769_s18 + $0x298] sm:$0xff] }
  0x68   : > { %1232 = vmatprep.subr.bf16.mxu0 %v1519_v44  ;;  %1314 = vmatprep.subr.bf16.mxu1 %v1521_v45  ;;  %v273_v44 = vld [vmem:[%s1769_s18 + $0x2b8] sm:$0xff]  ;;  %v1574_v45 = vcombine.low %v260_v33, %v264_v34  ;;  %v1583_v47 = vcombine.high %v268_v41, %v272_v42 }
  0x69   : > { %v1585_v48 = vcombine.high %v269_v43, %v273_v44  ;;  %v1584_v54 = vcombine.low %v269_v43, %v273_v44 }
  0x6b   : > { %1233 = vmatpush1.bf16.msra.mxu0 %v1518_v50  ;;  %1315 = vmatpush1.bf16.msra.mxu1 %v1520_v51  ;;  %v280_v50 = vld [vmem:[%s1769_s18 + $0x2f0] sm:$0xff]  ;;  %v277_v51 = vld [vmem:[%s1769_s18 + $0x2d8] sm:$0xff] }
  0x6c   : > { %1234 = vmatprep.subr.bf16.mxu0 %v1527_v52  ;;  %1316 = vmatprep.subr.bf16.mxu1 %v1529_v53  ;;  %v281_v52 = vld [vmem:[%s1769_s18 + $0x2f8] sm:$0xff]  ;;  %v1582_v53 = vcombine.low %v268_v41, %v272_v42  ;;  %v1591_v55 = vcombine.high %v276_v49, %v280_v50 }
  0x6d   : > { %v1593_v56 = vcombine.high %v277_v51, %v281_v52  ;;  %v1592_v61 = vcombine.low %v277_v51, %v281_v52 }
  0x6f   : > { %1235 = vmatpush1.bf16.msra.mxu0 %v1526_v58  ;;  %1317 = vmatpush1.bf16.msra.mxu1 %v1528_v1  ;;  %v288_v58 = vld [vmem:[%s1769_s18 + $0x330] sm:$0xff]  ;;  %v285_v1 = vld [vmem:[%s1769_s18 + $0x318] sm:$0xff] }
  0x70   : > { %1236 = vmatprep.subr.bf16.mxu0 %v1535_v59  ;;  %1318 = vmatprep.subr.bf16.mxu1 %v1537_v60  ;;  %v289_v59 = vld [vmem:[%s1769_s18 + $0x338] sm:$0xff]  ;;  %v1590_v60 = vcombine.low %v276_v49, %v280_v50  ;;  %v1599_v62 = vcombine.high %v284_v57, %v288_v58 }
  0x71   : > { %v1601_v63 = vcombine.high %v285_v1, %v289_v59  ;;  %v1600_v7 = vcombine.low %v285_v1, %v289_v59 }
  0x73   : > { %1237 = vmatpush1.bf16.msra.mxu0 %v1534_v3  ;;  %1319 = vmatpush1.bf16.msra.mxu1 %v1536_v4  ;;  %v296_v3 = vld [vmem:[%s1769_s18 + $0x370] sm:$0xff]  ;;  %v293_v4 = vld [vmem:[%s1769_s18 + $0x358] sm:$0xff] }
  0x74   : > { %1238 = vmatprep.subr.bf16.mxu0 %v1543_v5  ;;  %1320 = vmatprep.subr.bf16.mxu1 %v1545_v6  ;;  %v297_v5 = vld [vmem:[%s1769_s18 + $0x378] sm:$0xff]  ;;  %v1598_v6 = vcombine.low %v284_v57, %v288_v58  ;;  %v1607_v8 = vcombine.high %v292_v2, %v296_v3 }
  0x75   : > { %v1609_v9 = vcombine.high %v293_v4, %v297_v5  ;;  %v1608_v16 = vcombine.low %v293_v4, %v297_v5 }
  0x77   : > { %1239 = vmatpush1.bf16.msra.mxu0 %v1542_v11  ;;  %1321 = vmatpush1.bf16.msra.mxu1 %v1544_v12  ;;  %v304_v11 = vld [vmem:[%s1769_s18 + $0x3b0] sm:$0xff]  ;;  %v301_v12 = vld [vmem:[%s1769_s18 + $0x398] sm:$0xff] }
  0x78   : > { %1240 = vmatprep.subr.bf16.mxu0 %v1551_v13  ;;  %1322 = vmatprep.subr.bf16.mxu1 %v1553_v15  ;;  %v305_v13 = vld [vmem:[%s1769_s18 + $0x3b8] sm:$0xff]  ;;  %v1606_v15 = vcombine.low %v292_v2, %v296_v3  ;;  %v1615_v17 = vcombine.high %v300_v10, %v304_v11 }
  0x79   : > { %v1617_v18 = vcombine.high %v301_v12, %v305_v13  ;;  %v1616_v24 = vcombine.low %v301_v12, %v305_v13 }
  0x7b   : > { %1241 = vmatpush1.bf16.msra.mxu0 %v1550_v20  ;;  %1323 = vmatpush1.bf16.msra.mxu1 %v1552_v21  ;;  %v312_v20 = vld [vmem:[%s1769_s18 + $0x3f0] sm:$0xff]  ;;  %v309_v21 = vld [vmem:[%s1769_s18 + $0x3d8] sm:$0xff] }
  0x7c   : > { %1242 = vmatprep.subr.bf16.mxu0 %v1559_v22  ;;  %1324 = vmatprep.subr.bf16.mxu1 %v1561_v23  ;;  %v313_v22 = vld [vmem:[%s1769_s18 + $0x3f8] sm:$0xff]  ;;  %v1614_v23 = vcombine.low %v300_v10, %v304_v11  ;;  %v1623_v0 = vcombine.high %v308_v19, %v312_v20 }
  0x7d   : > { %v1625_v25 = vcombine.high %v309_v21, %v313_v22  ;;  %v1624_v33 = vcombine.low %v309_v21, %v313_v22 }
  0x7f   : > { %1243 = vmatpush1.bf16.msra.mxu0 %v1558_v28  ;;  %1325 = vmatpush1.bf16.msra.mxu1 %v1560_v29  ;;  %v320_v28 = vld [vmem:[%s1769_s18 + $0x430] sm:$0xff]  ;;  %v317_v29 = vld [vmem:[%s1769_s18 + $0x418] sm:$0xff] }
  0x80   : > { %1244 = vmatprep.subr.bf16.mxu0 %v1567_v30  ;;  %1326 = vmatprep.subr.bf16.mxu1 %v1569_v32  ;;  %v321_v30 = vld [vmem:[%s1769_s18 + $0x438] sm:$0xff]  ;;  %v1622_v32 = vcombine.low %v308_v19, %v312_v20  ;;  %v1631_v34 = vcombine.high %v316_v26, %v320_v28 }
  0x81   : > { %v1633_v35 = vcombine.high %v317_v29, %v321_v30  ;;  %v1632_v41 = vcombine.low %v317_v29, %v321_v30 }
  0x83   : > { %1245 = vmatpush1.bf16.msra.mxu0 %v1566_v37  ;;  %1327 = vmatpush1.bf16.msra.mxu1 %v1568_v38  ;;  %v328_v37 = vld [vmem:[%s1769_s18 + $0x470] sm:$0xff]  ;;  %v325_v38 = vld [vmem:[%s1769_s18 + $0x458] sm:$0xff] }
  0x84   : > { %1246 = vmatprep.subr.bf16.mxu0 %v1575_v39  ;;  %1328 = vmatprep.subr.bf16.mxu1 %v1577_v40  ;;  %v329_v39 = vld [vmem:[%s1769_s18 + $0x478] sm:$0xff]  ;;  %v1630_v40 = vcombine.low %v316_v26, %v320_v28  ;;  %v1639_v42 = vcombine.high %v324_v36, %v328_v37  ;;  %v1638_v44 = vcombine.low %v324_v36, %v328_v37 }
  0x85   : > { %v1641_v43 = vcombine.high %v325_v38, %v329_v39 }
  0x87   : > { %1247 = vmatpush1.bf16.msra.mxu0 %v1574_v45  ;;  %1329 = vmatpush1.bf16.msra.mxu1 %v1576_v46  ;;  %v1640_v45 = vcombine.low %v325_v38, %v329_v39 }
  0x88   : > { %1248 = vmatprep.subr.bf16.mxu0 %v1583_v47  ;;  %1330 = vmatprep.subr.bf16.mxu1 %v1585_v48 }
  0x8b   : > { %1249 = vmatpush1.bf16.msra.mxu0 %v1582_v53  ;;  %1331 = vmatpush1.bf16.msra.mxu1 %v1584_v54 }
  0x8c   : > { %1250 = vmatprep.subr.bf16.mxu0 %v1591_v55  ;;  %1332 = vmatprep.subr.bf16.mxu1 %v1593_v56 }
  0x8f   : > { %1251 = vmatpush1.bf16.msra.mxu0 %v1590_v60  ;;  %1333 = vmatpush1.bf16.msra.mxu1 %v1592_v61 }
  0x90   : > { %1252 = vmatprep.subr.bf16.mxu0 %v1599_v62  ;;  %1334 = vmatprep.subr.bf16.mxu1 %v1601_v63 }
  0x93   : > { %1253 = vmatpush1.bf16.msra.mxu0 %v1598_v6  ;;  %1335 = vmatpush1.bf16.msra.mxu1 %v1600_v7 }
  0x94   : > { %1254 = vmatprep.subr.bf16.mxu0 %v1607_v8  ;;  %1336 = vmatprep.subr.bf16.mxu1 %v1609_v9 }
  0x97   : > { %1255 = vmatpush1.bf16.msra.mxu0 %v1606_v15  ;;  %1337 = vmatpush1.bf16.msra.mxu1 %v1608_v16 }
  0x98   : > { %1256 = vmatprep.subr.bf16.mxu0 %v1615_v17  ;;  %1338 = vmatprep.subr.bf16.mxu1 %v1617_v18 }
  0x9b   : > { %1257 = vmatpush1.bf16.msra.mxu0 %v1614_v23  ;;  %1339 = vmatpush1.bf16.msra.mxu1 %v1616_v24 }
  0x9c   : > { %1258 = vmatprep.subr.bf16.mxu0 %v1623_v0  ;;  %1340 = vmatprep.subr.bf16.mxu1 %v1625_v25 }
  0x9f   : > { %1259 = vmatpush1.bf16.msra.mxu0 %v1622_v32  ;;  %1341 = vmatpush1.bf16.msra.mxu1 %v1624_v33 }
  0xa0   : > { %1269 = vmatprep.subr.bf16.mxu0 %v1631_v34  ;;  %1351 = vmatprep.subr.bf16.mxu1 %v1633_v35 }
  0xa2   : > { %1261 = vmatmul.mubr.bf16.vlgmr.msra.gmra.mrb[4].mxu0 %v1843_v14  ;;  %1343 = vmatmul.mubr.bf16.vlgmr.msra.gmra.mrb[4].mxu1 %v1843_v14 }
  0xa3   : > { %1270 = vmatpush1.bf16.msra.mxu0 %v1630_v40  ;;  %1352 = vmatpush1.bf16.msra.mxu1 %v1632_v41 }
  0xa4   : > { %1271 = vmatprep.subr.bf16.mxu0 %v1639_v42  ;;  %1353 = vmatprep.subr.bf16.mxu1 %v1641_v43 }
  0xa5   : > { %1301 = vmatprep.mubr.bf16.mxu0 %v1718_v27  ;;  %1383 = vmatprep.mubr.bf16.mxu1 %v1718_v27 }
  0xa7   : > { %1272 = vmatpush1.bf16.msra.mxu0 %v1638_v44  ;;  %1354 = vmatpush1.bf16.msra.mxu1 %v1640_v45 }
  0xae   : > { %1644 = vmatmul.mubr.msk.bf16.vlgmr.msra.gmra.mrb[4].mxu0 %vm1060_vm0, %v1860_v31  ;;  %1645 = vmatmul.mubr.msk.bf16.vlgmr.msra.gmra.mrb[4].mxu1 %vm1060_vm0, %v1860_v31 }
 0x135   : > { %v1139_v14 = vpop.f32.mrb[0].mxu0  ;;  %v1221_v46 = vpop.f32.mrb[0].mxu1 }
 0x136   : > { %1392 = vst [vmem:[%s181_s24] sm:$0xff] %v1139_v14  ;;  %v1141_v47 = vpop.f32.mrb[1].mxu0  ;;  %1394 = vst [vmem:[%s181_s24 + $0x10] sm:$0xff] %v1221_v46  ;;  %v1223_v27 = vpop.f32.mrb[1].mxu1 }
 0x137   : > { %1393 = vst [vmem:[%s181_s24 + $0x8] sm:$0xff] %v1141_v47  ;;  %v1143_v48 = vpop.f32.mrb[2].mxu0  ;;  %1395 = vst [vmem:[%s181_s24 + $0x18] sm:$0xff] %v1223_v27  ;;  %v1225_v49 = vpop.f32.mrb[2].mxu1 }
 0x138   : > { %v1144_v50 = vpop.f32.mrb[3].mxu0  ;;  %v1226_v51 = vpop.f32.mrb[3].mxu1 }
 0x181   : > { %v1303_v52 = vpop.f32.mrb[4].mxu0  ;;  %v1385_v31 = vpop.f32.mrb[4].mxu1 }
 0x182   : > { %1396 = vst [vmem:[%s181_s24 + $0x20] sm:$0xff] %v1303_v52  ;;  %v1305_v53 = vpop.f32.mrb[5].mxu0  ;;  %1398 = vst [vmem:[%s181_s24 + $0x30] sm:$0xff] %v1385_v31  ;;  %v1387_v54 = vpop.f32.mrb[5].mxu1 }
 0x183   : > { %1397 = vst [vmem:[%s181_s24 + $0x28] sm:$0xff] %v1305_v53  ;;  %v1307_v55 = vpop.f32.mrb[6].mxu0  ;;  %1399 = vst [vmem:[%s181_s24 + $0x38] sm:$0xff] %v1387_v54  ;;  %v1389_v56 = vpop.f32.mrb[6].mxu1 }
 0x184   : > { %v1308_v57 = vpop.f32.mrb[7].mxu0  ;;  %v1390_v58 = vpop.f32.mrb[7].mxu1 }
 0x185 PF: > { %s12_s11 = sadd.s32 1, %s1716_s11   ;;  %s1958_s9 = smov %s1712_s10 }
 0x186   : > { %p9_p5 = scmp.ge.s32.totalorder %s12_s11, 4   ;;  %s1959_s10 = smov %s1961_s12 }
 0x188   :  { %11 = sbr.rel (!%p9_p5) target bundleno = 2 (0x2), region = 58 }

// kernel: feature_network_forward.23
= control target key start
LH: loop header
LB: loop body
LE: loop exit
PB: predicated region body
PF: predicated region fallthrough
CT: control target
= control target key end

     0   :  { %s763_s9 = smov 0   ;;  %s765_s10 = smov 0   ;;  %s850_s0 = inlined_call_operand.vmem [shape: bf16[8,288], index: 0, kind: input, shape index: {}]   ;;  %s851_s1 = inlined_call_operand.vmem [shape: bf16[2,288,256], index: 1, kind: input, shape index: {}]   ;;  %s852_s2 = inlined_call_operand.vmem [shape: f32[2,8,256], index: 2, kind: output, shape index: {}]  }
   0x1   :  { %s767_s11 = smov 0  }
   0x2 LB: > { %s24_s12 = sadd.s32 1, %s741_s10  ;;  %p591_p0 = scmp.ge.s32.totalorder %s745_s11, 1  ;;  %s745_s11 = sphi %s767_s11, %s12_s11   ;;  %s741_s10 = sphi %s765_s10, %s854_s10   ;;  %s737_s9 = sphi %s763_s9, %s853_s9  }
   0x3   : > { %p26_p1 = scmp.ge.s32.totalorder %s24_s12, 2  ;;  %p133_p2 = scmp.lt.s32.totalorder %s745_s11, 3 }
   0x5   : > { %s856_s12 = smov (%p26_p1, %s24_s12), 0  ;;  %p134_p3 = pnand %p591_p0, %p133_p2 }
   0x6   : > { %p164_p4 = scmp.lt.s32.totalorder (!%p134_p3), %s737_s9, 1  ;;  %v747_v0 = vmov (!%p134_p3), 0   ;;  %v784_v1 = vld [vmem:[%s850_s0] sm:$0xff] (!%p134_p3)  ;;  %v720_v22 = vld [vmem:[%s850_s0 + $0x8] ss:$0 sps:$4 sm:$0xff] (!%p134_p3)   ;;  %vm412_vm0 = vcmask (!%p134_p3), 261120  }
   0x7   : > { %137 = sbr.rel (%p134_p3) target bundleno = 299 (0x12b), region = 28  ;;  %489 = vmatprep.mubr.bf16.mxu0 (!%p134_p3), %v747_v0  ;;  %v596_v2 = vcombine.high (!%p134_p3), %v784_v1, %v784_v1  ;;  %v595_v40 = vcombine.low (!%p134_p3), %v784_v1, %v784_v1 }
   0x9   : > { %448 = vmatprep.mubr.bf16.mxu1 (!%p134_p3), %v596_v2 }
   0xe   : > { %s858_s9 = smov (!%p164_p4, %s737_s9), 1 }
   0xf   : > { %s640_s15 = smul.u32 288, %s858_s9  ;;  %s637_s21 = sshll.u32 %s858_s9, 4 }
  0x10   : > { %s181_s24 = scalar_lea.vmem %s852_s2, %s637_s21 }
  0x11   : > { %s794_s18 = scalar_lea.vmem %s851_s1, %s640_s15 }
  0x12   : > { %v666_v3 = vld [vmem:[%s794_s18 + $0x4] ss:$8 sps:$4 sm:$0xff]   ;;  %v668_v4 = vld [vmem:[%s794_s18] ss:$8 sps:$4 sm:$0xff]   ;;  %v669_v5 = vld [vmem:[%s794_s18 + $0x14] ss:$8 sps:$4 sm:$0xff]  }
  0x13   : > { %416 = vmatprep.subr.bf16.mxu1 %v666_v3  ;;  %v671_v6 = vld [vmem:[%s794_s18 + $0x10] ss:$8 sps:$4 sm:$0xff]   ;;  %v672_v7 = vld [vmem:[%s794_s18 + $0x24] ss:$8 sps:$4 sm:$0xff]   ;;  %v674_v8 = vld [vmem:[%s794_s18 + $0x20] ss:$8 sps:$4 sm:$0xff]  }
  0x14   : > { %417 = vmatpush1.bf16.msra.mxu1 %v668_v4  ;;  %v675_v9 = vld [vmem:[%s794_s18 + $0x34] ss:$8 sps:$4 sm:$0xff]   ;;  %v677_v10 = vld [vmem:[%s794_s18 + $0x30] ss:$8 sps:$4 sm:$0xff]   ;;  %v678_v11 = vld [vmem:[%s794_s18 + $0x44] ss:$8 sps:$4 sm:$0xff]  }
  0x15   : > { %418 = vmatprep.subr.bf16.mxu1 %v669_v5  ;;  %v680_v12 = vld [vmem:[%s794_s18 + $0x40] ss:$8 sps:$4 sm:$0xff]   ;;  %v681_v13 = vld [vmem:[%s794_s18 + $0x54] ss:$8 sps:$4 sm:$0xff]   ;;  %v683_v14 = vld [vmem:[%s794_s18 + $0x50] ss:$8 sps:$4 sm:$0xff]  }
  0x16   : > { %v708_v15 = vld [vmem:[%s794_s18 + $0x104] ss:$8 sps:$4 sm:$0xff]   ;;  %v710_v16 = vld [vmem:[%s794_s18 + $0x100] ss:$8 sps:$4 sm:$0xff]   ;;  %v714_v18 = vld [vmem:[%s794_s18 + $0x114] ss:$8 sps:$4 sm:$0xff]  }
  0x17   : > { %v684_v17 = vld [vmem:[%s794_s18 + $0x64] ss:$8 sps:$4 sm:$0xff]   ;;  %457 = vmatprep.subr.bf16.mxu0 %v708_v15  ;;  %v716_v19 = vld [vmem:[%s794_s18 + $0x110] ss:$8 sps:$4 sm:$0xff]   ;;  %v686_v20 = vld [vmem:[%s794_s18 + $0x60] ss:$8 sps:$4 sm:$0xff]  }
  0x18   : > { %419 = vmatpush1.bf16.msra.mxu1 %v671_v6  ;;  %458 = vmatpush1.bf16.msra.mxu0 %v710_v16  ;;  %v687_v21 = vld [vmem:[%s794_s18 + $0x74] ss:$8 sps:$4 sm:$0xff]   ;;  %v689_v23 = vld [vmem:[%s794_s18 + $0x70] ss:$8 sps:$4 sm:$0xff]   ;;  %v690_v24 = vld [vmem:[%s794_s18 + $0x84] ss:$8 sps:$4 sm:$0xff]  }
  0x19   : > { %420 = vmatprep.subr.bf16.mxu1 %v672_v7  ;;  %459 = vmatprep.subr.bf16.mxu0 %v714_v18  ;;  %v692_v25 = vld [vmem:[%s794_s18 + $0x80] ss:$8 sps:$4 sm:$0xff]   ;;  %v693_v26 = vld [vmem:[%s794_s18 + $0x94] ss:$8 sps:$4 sm:$0xff]   ;;  %v695_v27 = vld [vmem:[%s794_s18 + $0x90] ss:$8 sps:$4 sm:$0xff]  }
  0x1a   : > { %v696_v28 = vld [vmem:[%s794_s18 + $0xa4] ss:$8 sps:$4 sm:$0xff]   ;;  %v698_v29 = vld [vmem:[%s794_s18 + $0xa0] ss:$8 sps:$4 sm:$0xff]   ;;  %v699_v30 = vld [vmem:[%s794_s18 + $0xb4] ss:$8 sps:$4 sm:$0xff]  }
  0x1b   : > { %v701_v31 = vld [vmem:[%s794_s18 + $0xb0] ss:$8 sps:$4 sm:$0xff]   ;;  %v702_v32 = vld [vmem:[%s794_s18 + $0xc4] ss:$8 sps:$4 sm:$0xff]   ;;  %v704_v33 = vld [vmem:[%s794_s18 + $0xc0] ss:$8 sps:$4 sm:$0xff]  }
  0x1c   : > { %421 = vmatpush1.bf16.msra.mxu1 %v674_v8  ;;  %460 = vmatpush1.bf16.msra.mxu0 %v716_v19  ;;  %v705_v34 = vld [vmem:[%s794_s18 + $0xd4] ss:$8 sps:$4 sm:$0xff]   ;;  %v707_v35 = vld [vmem:[%s794_s18 + $0xd0] ss:$8 sps:$4 sm:$0xff]   ;;  %v711_v36 = vld [vmem:[%s794_s18 + $0xe4] ss:$8 sps:$4 sm:$0xff]  }
  0x1d   : > { %422 = vmatprep.subr.bf16.mxu1 %v675_v9  ;;  %v713_v37 = vld [vmem:[%s794_s18 + $0xe0] ss:$8 sps:$4 sm:$0xff]   ;;  %v717_v38 = vld [vmem:[%s794_s18 + $0xf4] ss:$8 sps:$4 sm:$0xff]   ;;  %v719_v39 = vld [vmem:[%s794_s18 + $0xf0] ss:$8 sps:$4 sm:$0xff]  }
  0x1f   : > { %634 = vmatmul.mubr.msk.bf16.vlgmr.msra.gmra.mrb[0].mxu0 %vm412_vm0, %v720_v22 }
  0x20   : > { %423 = vmatpush1.bf16.msra.mxu1 %v677_v10 }
  0x21   : > { %424 = vmatprep.subr.bf16.mxu1 %v678_v11 }
  0x24   : > { %425 = vmatpush1.bf16.msra.mxu1 %v680_v12 }
  0x25   : > { %426 = vmatprep.subr.bf16.mxu1 %v681_v13 }
  0x28   : > { %427 = vmatpush1.bf16.msra.mxu1 %v683_v14 }
  0x29   : > { %428 = vmatprep.subr.bf16.mxu1 %v684_v17 }
  0x2c   : > { %429 = vmatpush1.bf16.msra.mxu1 %v686_v20 }
  0x2d   : > { %430 = vmatprep.subr.bf16.mxu1 %v687_v21 }
  0x30   : > { %431 = vmatpush1.bf16.msra.mxu1 %v689_v23 }
  0x31   : > { %432 = vmatprep.subr.bf16.mxu1 %v690_v24 }
  0x34   : > { %433 = vmatpush1.bf16.msra.mxu1 %v692_v25 }
  0x35   : > { %434 = vmatprep.subr.bf16.mxu1 %v693_v26 }
  0x38   : > { %435 = vmatpush1.bf16.msra.mxu1 %v695_v27 }
  0x39   : > { %436 = vmatprep.subr.bf16.mxu1 %v696_v28 }
  0x3c   : > { %437 = vmatpush1.bf16.msra.mxu1 %v698_v29 }
  0x3d   : > { %438 = vmatprep.subr.bf16.mxu1 %v699_v30 }
  0x40   : > { %439 = vmatpush1.bf16.msra.mxu1 %v701_v31 }
  0x41   : > { %440 = vmatprep.subr.bf16.mxu1 %v702_v32 }
  0x44   : > { %441 = vmatpush1.bf16.msra.mxu1 %v704_v33 }
  0x45   : > { %442 = vmatprep.subr.bf16.mxu1 %v705_v34 }
  0x48   : > { %443 = vmatpush1.bf16.msra.mxu1 %v707_v35 }
  0x49   : > { %444 = vmatprep.subr.bf16.mxu1 %v711_v36 }
  0x4c   : > { %445 = vmatpush1.bf16.msra.mxu1 %v713_v37 }
  0x4d   : > { %446 = vmatprep.subr.bf16.mxu1 %v717_v38 }
  0x50   : > { %447 = vmatpush1.bf16.msra.mxu1 %v719_v39 }
  0x53   : > { %449 = vmatmul.mubr.bf16.vlgmr.msra.gmra.mrb[0].mxu1 %v595_v40 }
  0xf2   : > { %v491_v41 = vpop.f32.mrb[0].mxu0 }
  0xf3   : > { %v493_v42 = vpop.f32.mrb[1].mxu0 }
  0xf4   : > { %v495_v43 = vpop.f32.mrb[2].mxu0 }
  0xf5   : > { %v496_v44 = vpop.f32.mrb[3].mxu0 }
 0x126   : > { %v450_v45 = vpop.f32.mrb[0].mxu1 }
 0x127   : > { %v492_v46 = vadd.f32 %v491_v41, %v450_v45  ;;  %v452_v47 = vpop.f32.mrb[1].mxu1 }
 0x128   : > { %v494_v48 = vadd.f32 %v493_v42, %v452_v47  ;;  %v454_v49 = vpop.f32.mrb[2].mxu1 }
 0x129   : > { %498 = vst [vmem:[%s181_s24] sm:$0xff] %v492_v46  ;;  %v455_v50 = vpop.f32.mrb[3].mxu1 }
 0x12a   : > { %499 = vst [vmem:[%s181_s24 + $0x8] sm:$0xff] %v494_v48 }
 0x12b PF: > { %s12_s11 = sadd.s32 1, %s745_s11   ;;  %s853_s9 = smov %s741_s10 }
 0x12c   : > { %p9_p5 = scmp.ge.s32.totalorder %s12_s11, 4   ;;  %s854_s10 = smov %s856_s12 }
 0x12e   :  { %11 = sbr.rel (!%p9_p5) target bundleno = 2 (0x2), region = 58 }

</bundles_post_ra>
